<compile_context>
chip_gen: v6e
topology: v6e:2x2x1
jax: 0.10.0
libtpu: 0.0.40
codegen_flags: <defaults>
</compile_context>

<pallas_src>
import functools
import numpy as np
import jax
import jax.numpy as jnp
from jax import lax
from jax.experimental import pallas as pl
from jax.experimental.pallas import tpu as pltpu


# ----------------------------------------------------------------------------
# Fused kernel: (input Linear∘Conv) + 4 residual blocks + (output Conv∘fc)
# ----------------------------------------------------------------------------
def _sionna_kernel(x_ref, win_ref, seg_ref, ln_ref, tblk_ref, wout_ref, o_ref,
                   *, n_blocks):

    def _dot(a, b):
        # bf16 operands (weights are already packed bf16), f32 accumulation.
        return jnp.dot(a.astype(jnp.bfloat16), b,
                       preferred_element_type=jnp.float32)

    seg_avg = seg_ref[...]            # (CL, CL) bf16 block-diag averaging matrix

    def layer_norm(v, ln_row, eps=1e-5):
        rows = v.shape[0]
        # One stat matmul instead of two: mu and E[x^2] from row-stacked [v ; v*v].
        stats = _dot(jnp.concatenate([v, v * v], axis=0), seg_avg)   # (2*rows, CL) f32
        mu = stats[:rows]
        var = stats[rows:] - mu * mu                                 # f32 arithmetic
        w = ln_ref[ln_row:ln_row + 1, :]                             # (1, CL) f32
        b = ln_ref[ln_row + 1:ln_row + 2, :]
        return (v - mu) * lax.rsqrt(var + eps) * w + b

    # fused input Linear + input Conv1d (single pre-folded matrix)
    z = _dot(x_ref[...], win_ref[...])              # (tn, C_out*L)

    skip = z                                        # running sum  z + z1 + ...
    zk = z
    for blk in range(n_blocks):                     # unrolled: all weights resident
        inp = skip
        a = layer_norm(inp, 4 * blk + 0)
        a = _dot(jnp.maximum(a, 0.0), tblk_ref[blk, 0])        # conv1d_1 (Toeplitz)
        a = layer_norm(a, 4 * blk + 2)
        a = _dot(jnp.maximum(a, 0.0), tblk_ref[blk, 1])        # conv1d_2 (Toeplitz)
        zk = a + inp                                           # residual
        skip = skip + zk                                       # outer skip accumulation

    # fused output Conv1d + fc_out (single pre-folded, 128-lane-padded matrix)
    o_ref[...] = _dot(zk, wout_ref[...])


# ----------------------------------------------------------------------------
# Wrapper-side (exact) weight re-packing
# ----------------------------------------------------------------------------
def conv1d_to_toeplitz(w, length):
    """Conv1d weight (C_out, C_in, K), padding=(K-1)//2  ->  dense matrix T of
    shape (C_in*length, C_out*length) with y_flat = x_flat @ T."""
    c_out, c_in, k = w.shape
    pad = (k - 1) // 2
    m = np.arange(length)[:, None]        # input position
    l = np.arange(length)[None, :]        # output position
    w_t = jnp.transpose(w, (1, 0, 2))     # (C_in, C_out, K)
    t = jnp.zeros((c_in, length, c_out, length), jnp.float32)
    for dk in range(k):
        mask = jnp.asarray((m == (l + dk - pad)).astype(np.float32))   # (L, L)
        t = t + w_t[:, None, :, None, dk] * mask[None, :, None, :]
    return t.reshape(c_in * length, c_out * length)


def _block_diag_linear(w_in_t, n_ch):
    """Per-channel Linear (in_f -> out_f) as a block-diagonal (n_ch*in_f, n_ch*out_f)."""
    in_f, out_f = w_in_t.shape
    wb = jnp.zeros((n_ch * in_f, n_ch * out_f), jnp.float32)
    for c in range(n_ch):
        wb = wb.at[c * in_f:(c + 1) * in_f, c * out_f:(c + 1) * out_f].set(w_in_t)
    return wb


def pack_kernel_params(p, input_size, n_in_ch, n_out_ch, n_classes):
    L = 2 * input_size
    CL = n_out_ch * L
    n_blocks = len(p['blocks'])

    # ---- fused input stage: Linear (block-diag) @ Conv1d (Toeplitz), exact ----
    wb = _block_diag_linear(p['w_in'].T, n_in_ch)                   # (C_in*IS, C_in*L)
    t_in = conv1d_to_toeplitz(p['conv_in'], L)                      # (C_in*L, C_out*L)
    w_in_conv = wb @ t_in                                           # (C_in*IS, C_out*L)

    # ---- LN affine params, densely packed as (n_blocks*4, CL) ----
    ln = jnp.concatenate([
        jnp.stack([b['ln1w'], b['ln1b'], b['ln2w'], b['ln2b']])
        for b in p['blocks']], axis=0)                              # (4*nb, L)
    ln = jnp.tile(ln, (1, n_out_ch))                                # (4*nb, CL)

    # ---- residual-block conv weights as Toeplitz matrices ----
    t_blk = jnp.stack([
        jnp.stack([conv1d_to_toeplitz(b['conv1'], L),
                   conv1d_to_toeplitz(b['conv2'], L)])
        for b in p['blocks']])                                      # (nb, 2, CL, CL)

    # ---- fused output stage: output Conv1d (Toeplitz) @ fc_out, exact ----
    t_out = conv1d_to_toeplitz(p['conv_out'], L)                    # (CL, n_classes*L)
    out_w = ((n_classes + 127) // 128) * 128                        # lane-dense output
    w_fc = jnp.zeros((n_classes * L, out_w), jnp.float32).at[:, :n_classes].set(p['fc'].T)
    w_out_fc = t_out @ w_fc                                         # (CL, out_w)

    # ---- segment-averaging matrix for LN statistics (1/L exact in bf16) ----
    seg = jnp.arange(CL) // L
    seg_avg = (seg[:, None] == seg[None, :]).astype(jnp.float32) / float(L)  # (CL, CL)

    bf16 = jnp.bfloat16
    return dict(w_in_conv=w_in_conv.astype(bf16),
                seg_avg=seg_avg.astype(bf16),
                ln=ln.astype(jnp.float32),
                t_blk=t_blk.astype(bf16),
                w_out_fc=w_out_fc.astype(bf16))


# ----------------------------------------------------------------------------
# Forward pass (single fused pallas_call)
# ----------------------------------------------------------------------------
def sionna_skip_forward(inputs, kp, *, input_size, n_in_ch, n_out_ch, n_classes,
                        n_blocks=4):
    B, T = inputs.shape[0], inputs.shape[1]
    N = B * T
    x2 = inputs.reshape(N, n_in_ch * input_size).astype(jnp.float32)

    # Row padding / tiling:
    #   small N   -> whole batch in one grid step
    #   mid N     -> 256-row tiles (>=2 "parallel" steps so v7x's 2 TCs both work)
    #   N >= 1024 -> 512-row tiles (amortize per-step overhead; still >=2 steps)
    n_pad = ((N + 7) // 8) * 8
    if n_pad <= 256:
        tn = n_pad
    elif n_pad >= 1024:
        tn = 512
    else:
        tn = 256
    n_pad = ((n_pad + tn - 1) // tn) * tn
    if n_pad != N:
        x2 = jnp.pad(x2, ((0, n_pad - N), (0, 0)))

    out_w = kp['w_out_fc'].shape[1]

    def full(a):
        return pl.BlockSpec(a.shape, lambda i, nd=a.ndim: (0,) * nd)

    res = pl.pallas_call(
        functools.partial(_sionna_kernel, n_blocks=n_blocks),
        grid=(n_pad // tn,),
        in_specs=[pl.BlockSpec((tn, n_in_ch * input_size), lambda i: (i, 0)),
                  full(kp['w_in_conv']), full(kp['seg_avg']), full(kp['ln']),
                  full(kp['t_blk']), full(kp['w_out_fc'])],
        out_specs=pl.BlockSpec((tn, out_w), lambda i: (i, 0)),
        out_shape=jax.ShapeDtypeStruct((n_pad, out_w), jnp.float32),
        compiler_params=pltpu.CompilerParams(
            dimension_semantics=("parallel",),
            vmem_limit_bytes=32 * 1024 * 1024),
    )(x2, kp['w_in_conv'], kp['seg_avg'], kp['ln'], kp['t_blk'], kp['w_out_fc'])

    return res[:N, :n_classes].reshape(B, T, n_classes)


# ----------------------------------------------------------------------------
# Pure-JAX reference (mirrors the PyTorch module op-for-op, all f32)
# ----------------------------------------------------------------------------
def _ref_forward(inputs, p, n_in_ch, input_size):
    B, T = inputs.shape[0], inputs.shape[1]
    x = inputs.reshape(-1, n_in_ch, input_size).astype(jnp.float32)
    x = jnp.einsum('nci,oi->nco', x, p['w_in'])               # Linear, no bias

    def conv1d(v, w):
        return lax.conv_general_dilated(v, w, window_strides=(1,), padding=[(2, 2)],
                                        dimension_numbers=('NCH', 'OIH', 'NCH'))

    def ln(v, w, b, eps=1e-5):
        mu = jnp.mean(v, axis=-1, keepdims=True)
        var = jnp.mean((v - mu) ** 2, axis=-1, keepdims=True)
        return (v - mu) / jnp.sqrt(var + eps) * w + b

    def res_block(v, bp):
        h = conv1d(jnp.maximum(ln(v, bp['ln1w'], bp['ln1b']), 0.0), bp['conv1'])
        h = conv1d(jnp.maximum(ln(h, bp['ln2w'], bp['ln2b']), 0.0), bp['conv2'])
        return h + v

    z = conv1d(x, p['conv_in'])
    s, zk = z, z
    for bp in p['blocks']:
        zk = res_block(s, bp)
        s = s + zk
    out = conv1d(zk, p['conv_out'])                           # (N, n_classes, L)
    out = out.reshape(B, T, -1)
    return jnp.einsum('btf,of->bto', out, p['fc'])            # fc_out, no bias


# ----------------------------------------------------------------------------
# Deterministic parameter init (PyTorch weight layouts)
# ----------------------------------------------------------------------------
def init_params(key, input_size, n_in_ch, n_out_ch, n_classes, n_blocks=4):
    L = 2 * input_size

    def nrm(k, shape, scale):
        return jax.random.normal(k, shape, jnp.float32) * scale

    ks = jax.random.split(key, 4 + n_blocks)
    p = {
        'w_in': nrm(ks[0], (L, input_size), 1.0 / np.sqrt(input_size)),
        'conv_in': nrm(ks[1], (n_out_ch, n_in_ch, 5), 1.0 / np.sqrt(n_in_ch * 5)),
        'conv_out': nrm(ks[2], (n_classes, n_out_ch, 5), 1.0 / np.sqrt(n_out_ch * 5)),
        'fc': nrm(ks[3], (n_classes, n_classes * L), 1.0 / np.sqrt(n_classes * L)),
        'blocks': [],
    }
    for i in range(n_blocks):
        bk = jax.random.split(ks[4 + i], 6)
        p['blocks'].append({
            'ln1w': 1.0 + nrm(bk[0], (L,), 0.05),
            'ln1b': nrm(bk[1], (L,), 0.05),
            'ln2w': 1.0 + nrm(bk[2], (L,), 0.05),
            'ln2b': nrm(bk[3], (L,), 0.05),
            'conv1': nrm(bk[4], (n_out_ch, n_out_ch, 5), 1.0 / np.sqrt(n_out_ch * 5)),
            'conv2': nrm(bk[5], (n_out_ch, n_out_ch, 5), 1.0 / np.sqrt(n_out_ch * 5)),
        })
    return p


if __name__ == "__main__":
    # Small shapes consistent with the module: inputs (B, T, C_in, input_size).
    input_size, n_in_ch, n_out_ch, n_classes = 16, 2, 8, 4
    batch, trans_len = 2, 8

    key = jax.random.PRNGKey(0)
    k_x, k_p = jax.random.split(key)
    inputs = jax.random.normal(k_x, (batch, trans_len, n_in_ch, input_size), jnp.float32)
    params = init_params(k_p, input_size, n_in_ch, n_out_ch, n_classes)
    kp = pack_kernel_params(params, input_size, n_in_ch, n_out_ch, n_classes)

    fwd = jax.jit(functools.partial(
        sionna_skip_forward, input_size=input_size, n_in_ch=n_in_ch,
        n_out_ch=n_out_ch, n_classes=n_classes))
    out = jax.block_until_ready(fwd(inputs, kp))
    assert out.shape == (batch, trans_len, n_classes)

    ref = jax.block_until_ready(_ref_forward(inputs, params, n_in_ch, input_size))
    out_np, ref_np = np.asarray(out), np.asarray(ref)

    # bf16 matmul operands on a ~18-matmul-deep path (f32 reference): compare
    # with a tolerance scaled to the output magnitude + relative L2 check.
    scale = float(np.max(np.abs(ref_np)))
    np.testing.assert_allclose(out_np, ref_np, rtol=2e-2, atol=2e-2 * scale)
    rel_l2 = float(np.linalg.norm(out_np - ref_np) / (np.linalg.norm(ref_np) + 1e-9))
    assert rel_l2 < 2e-2, f"relative L2 error too large: {rel_l2}"

    print("KERNEL_OK")
</pallas_src>

<mosaic_0001>
module attributes {stable_mosaic.version = 11 : i64} {
  func.func @_sionna_kernel(%arg0: i32, %arg1: memref<16x32xf32, #tpu.memory_space<vmem>>, %arg2: memref<32x256xbf16, #tpu.memory_space<vmem>>, %arg3: memref<256x256xbf16, #tpu.memory_space<vmem>>, %arg4: memref<16x256xf32, #tpu.memory_space<vmem>>, %arg5: memref<4x2x256x256xbf16, #tpu.memory_space<vmem>>, %arg6: memref<256x128xbf16, #tpu.memory_space<vmem>>, %arg7: memref<16x128xf32, #tpu.memory_space<vmem>>) attributes {dimension_semantics = [#tpu.dimension_semantics<parallel>], iteration_bounds = array<i64: 1>, scalar_prefetch = 0 : i64, scratch_operands = 0 : i64, tpu.core_type = #tpu.core_type<tc>, window_params = [{transform_indices = @transform_0, window_bounds = array<i64: 16, 32>}, {pipeline_mode = #tpu.pipeline_mode<synchronous>, transform_indices = @transform_1, window_bounds = array<i64: 32, 256>}, {pipeline_mode = #tpu.pipeline_mode<synchronous>, transform_indices = @transform_2, window_bounds = array<i64: 256, 256>}, {pipeline_mode = #tpu.pipeline_mode<synchronous>, transform_indices = @transform_3, window_bounds = array<i64: 16, 256>}, {pipeline_mode = #tpu.pipeline_mode<synchronous>, transform_indices = @transform_4, window_bounds = array<i64: 4, 2, 256, 256>}, {pipeline_mode = #tpu.pipeline_mode<synchronous>, transform_indices = @transform_5, window_bounds = array<i64: 256, 128>}, {transform_indices = @transform_6, window_bounds = array<i64: 16, 128>}]} {
    %c0 = arith.constant 0 : index
    %c0_0 = arith.constant 0 : index
    %0 = vector.load %arg3[%c0, %c0_0] : memref<256x256xbf16, #tpu.memory_space<vmem>>, vector<256x256xbf16>
    %c0_1 = arith.constant 0 : index
    %c0_2 = arith.constant 0 : index
    %1 = vector.load %arg1[%c0_1, %c0_2] : memref<16x32xf32, #tpu.memory_space<vmem>>, vector<16x32xf32>
    %c0_3 = arith.constant 0 : index
    %c0_4 = arith.constant 0 : index
    %2 = vector.load %arg2[%c0_3, %c0_4] : memref<32x256xbf16, #tpu.memory_space<vmem>>, vector<32x256xbf16>
    %3 = arith.truncf %1 : vector<16x32xf32> to vector<16x32xbf16>
    %cst = arith.constant dense<0.000000e+00> : vector<16x256xf32>
    %4 = tpu.matmul %3, %2, %cst {dimension_numbers = #tpu.dot_dimension_numbers<[1], [0], [0], [1], [0, 0, 1, 1], [], []>} : vector<16x32xbf16>, vector<32x256xbf16>, vector<16x256xf32> -> vector<16x256xf32>
    %5 = arith.mulf %4, %4 : vector<16x256xf32>
    %6 = tpu.concatenate %4, %5 in 0 : vector<16x256xf32>, vector<16x256xf32> -> vector<32x256xf32>
    %7 = arith.truncf %6 : vector<32x256xf32> to vector<32x256xbf16>
    %cst_5 = arith.constant dense<0.000000e+00> : vector<32x256xf32>
    %8 = tpu.matmul %7, %0, %cst_5 {dimension_numbers = #tpu.dot_dimension_numbers<[1], [0], [0], [1], [0, 0, 1, 1], [], []>} : vector<32x256xbf16>, vector<256x256xbf16>, vector<32x256xf32> -> vector<32x256xf32>
    %9 = vector.extract_strided_slice %8 {offsets = [0, 0], sizes = [16, 256], strides = [1, 1]} : vector<32x256xf32> to vector<16x256xf32>
    %10 = vector.extract_strided_slice %8 {offsets = [16, 0], sizes = [16, 256], strides = [1, 1]} : vector<32x256xf32> to vector<16x256xf32>
    %11 = arith.mulf %9, %9 : vector<16x256xf32>
    %12 = arith.subf %10, %11 : vector<16x256xf32>
    %c0_6 = arith.constant 0 : index
    %c0_7 = arith.constant 0 : index
    %13 = vector.load %arg4[%c0_6, %c0_7] : memref<16x256xf32, #tpu.memory_space<vmem>>, vector<1x256xf32>
    %c1 = arith.constant 1 : index
    %c0_8 = arith.constant 0 : index
    %14 = vector.load %arg4[%c1, %c0_8] : memref<16x256xf32, #tpu.memory_space<vmem>>, vector<1x256xf32>
    %15 = arith.subf %4, %9 : vector<16x256xf32>
    %cst_9 = arith.constant 9.99999974E-6 : f32
    %16 = vector.broadcast %cst_9 : f32 to vector<16x256xf32>
    %17 = arith.addf %12, %16 : vector<16x256xf32>
    %18 = math.rsqrt %17 : vector<16x256xf32>
    %19 = arith.mulf %15, %18 : vector<16x256xf32>
    %20 = vector.broadcast %13 : vector<1x256xf32> to vector<16x256xf32>
    %21 = arith.mulf %19, %20 : vector<16x256xf32>
    %22 = vector.broadcast %14 : vector<1x256xf32> to vector<16x256xf32>
    %23 = arith.addf %21, %22 : vector<16x256xf32>
    %cst_10 = arith.constant 0.000000e+00 : f32
    %24 = vector.broadcast %cst_10 : f32 to vector<16x256xf32>
    %25 = arith.maximumf %23, %24 : vector<16x256xf32>
    %c0_11 = arith.constant 0 : index
    %c0_12 = arith.constant 0 : index
    %c0_13 = arith.constant 0 : index
    %c0_14 = arith.constant 0 : index
    %26 = vector.load %arg5[%c0_11, %c0_12, %c0_13, %c0_14] : memref<4x2x256x256xbf16, #tpu.memory_space<vmem>>, vector<1x1x256x256xbf16>
    %27 = vector.shape_cast %26 : vector<1x1x256x256xbf16> to vector<256x256xbf16>
    %28 = arith.truncf %25 : vector<16x256xf32> to vector<16x256xbf16>
    %cst_15 = arith.constant dense<0.000000e+00> : vector<16x256xf32>
    %29 = tpu.matmul %28, %27, %cst_15 {dimension_numbers = #tpu.dot_dimension_numbers<[1], [0], [0], [1], [0, 0, 1, 1], [], []>} : vector<16x256xbf16>, vector<256x256xbf16>, vector<16x256xf32> -> vector<16x256xf32>
    %30 = arith.mulf %29, %29 : vector<16x256xf32>
    %31 = tpu.concatenate %29, %30 in 0 : vector<16x256xf32>, vector<16x256xf32> -> vector<32x256xf32>
    %32 = arith.truncf %31 : vector<32x256xf32> to vector<32x256xbf16>
    %cst_16 = arith.constant dense<0.000000e+00> : vector<32x256xf32>
    %33 = tpu.matmul %32, %0, %cst_16 {dimension_numbers = #tpu.dot_dimension_numbers<[1], [0], [0], [1], [0, 0, 1, 1], [], []>} : vector<32x256xbf16>, vector<256x256xbf16>, vector<32x256xf32> -> vector<32x256xf32>
    %34 = vector.extract_strided_slice %33 {offsets = [0, 0], sizes = [16, 256], strides = [1, 1]} : vector<32x256xf32> to vector<16x256xf32>
    %35 = vector.extract_strided_slice %33 {offsets = [16, 0], sizes = [16, 256], strides = [1, 1]} : vector<32x256xf32> to vector<16x256xf32>
    %36 = arith.mulf %34, %34 : vector<16x256xf32>
    %37 = arith.subf %35, %36 : vector<16x256xf32>
    %c2 = arith.constant 2 : index
    %c0_17 = arith.constant 0 : index
    %38 = vector.load %arg4[%c2, %c0_17] : memref<16x256xf32, #tpu.memory_space<vmem>>, vector<1x256xf32>
    %c3 = arith.constant 3 : index
    %c0_18 = arith.constant 0 : index
    %39 = vector.load %arg4[%c3, %c0_18] : memref<16x256xf32, #tpu.memory_space<vmem>>, vector<1x256xf32>
    %40 = arith.subf %29, %34 : vector<16x256xf32>
    %cst_19 = arith.constant 9.99999974E-6 : f32
    %41 = vector.broadcast %cst_19 : f32 to vector<16x256xf32>
    %42 = arith.addf %37, %41 : vector<16x256xf32>
    %43 = math.rsqrt %42 : vector<16x256xf32>
    %44 = arith.mulf %40, %43 : vector<16x256xf32>
    %45 = vector.broadcast %38 : vector<1x256xf32> to vector<16x256xf32>
    %46 = arith.mulf %44, %45 : vector<16x256xf32>
    %47 = vector.broadcast %39 : vector<1x256xf32> to vector<16x256xf32>
    %48 = arith.addf %46, %47 : vector<16x256xf32>
    %cst_20 = arith.constant 0.000000e+00 : f32
    %49 = vector.broadcast %cst_20 : f32 to vector<16x256xf32>
    %50 = arith.maximumf %48, %49 : vector<16x256xf32>
    %c0_21 = arith.constant 0 : index
    %c1_22 = arith.constant 1 : index
    %c0_23 = arith.constant 0 : index
    %c0_24 = arith.constant 0 : index
    %51 = vector.load %arg5[%c0_21, %c1_22, %c0_23, %c0_24] : memref<4x2x256x256xbf16, #tpu.memory_space<vmem>>, vector<1x1x256x256xbf16>
    %52 = vector.shape_cast %51 : vector<1x1x256x256xbf16> to vector<256x256xbf16>
    %53 = arith.truncf %50 : vector<16x256xf32> to vector<16x256xbf16>
    %cst_25 = arith.constant dense<0.000000e+00> : vector<16x256xf32>
    %54 = tpu.matmul %53, %52, %cst_25 {dimension_numbers = #tpu.dot_dimension_numbers<[1], [0], [0], [1], [0, 0, 1, 1], [], []>} : vector<16x256xbf16>, vector<256x256xbf16>, vector<16x256xf32> -> vector<16x256xf32>
    %55 = arith.addf %54, %4 : vector<16x256xf32>
    %56 = arith.addf %4, %55 : vector<16x256xf32>
    %57 = arith.mulf %56, %56 : vector<16x256xf32>
    %58 = tpu.concatenate %56, %57 in 0 : vector<16x256xf32>, vector<16x256xf32> -> vector<32x256xf32>
    %59 = arith.truncf %58 : vector<32x256xf32> to vector<32x256xbf16>
    %cst_26 = arith.constant dense<0.000000e+00> : vector<32x256xf32>
    %60 = tpu.matmul %59, %0, %cst_26 {dimension_numbers = #tpu.dot_dimension_numbers<[1], [0], [0], [1], [0, 0, 1, 1], [], []>} : vector<32x256xbf16>, vector<256x256xbf16>, vector<32x256xf32> -> vector<32x256xf32>
    %61 = vector.extract_strided_slice %60 {offsets = [0, 0], sizes = [16, 256], strides = [1, 1]} : vector<32x256xf32> to vector<16x256xf32>
    %62 = vector.extract_strided_slice %60 {offsets = [16, 0], sizes = [16, 256], strides = [1, 1]} : vector<32x256xf32> to vector<16x256xf32>
    %63 = arith.mulf %61, %61 : vector<16x256xf32>
    %64 = arith.subf %62, %63 : vector<16x256xf32>
    %c4 = arith.constant 4 : index
    %c0_27 = arith.constant 0 : index
    %65 = vector.load %arg4[%c4, %c0_27] : memref<16x256xf32, #tpu.memory_space<vmem>>, vector<1x256xf32>
    %c5 = arith.constant 5 : index
    %c0_28 = arith.constant 0 : index
    %66 = vector.load %arg4[%c5, %c0_28] : memref<16x256xf32, #tpu.memory_space<vmem>>, vector<1x256xf32>
    %67 = arith.subf %56, %61 : vector<16x256xf32>
    %cst_29 = arith.constant 9.99999974E-6 : f32
    %68 = vector.broadcast %cst_29 : f32 to vector<16x256xf32>
    %69 = arith.addf %64, %68 : vector<16x256xf32>
    %70 = math.rsqrt %69 : vector<16x256xf32>
    %71 = arith.mulf %67, %70 : vector<16x256xf32>
    %72 = vector.broadcast %65 : vector<1x256xf32> to vector<16x256xf32>
    %73 = arith.mulf %71, %72 : vector<16x256xf32>
    %74 = vector.broadcast %66 : vector<1x256xf32> to vector<16x256xf32>
    %75 = arith.addf %73, %74 : vector<16x256xf32>
    %cst_30 = arith.constant 0.000000e+00 : f32
    %76 = vector.broadcast %cst_30 : f32 to vector<16x256xf32>
    %77 = arith.maximumf %75, %76 : vector<16x256xf32>
    %c1_31 = arith.constant 1 : index
    %c0_32 = arith.constant 0 : index
    %c0_33 = arith.constant 0 : index
    %c0_34 = arith.constant 0 : index
    %78 = vector.load %arg5[%c1_31, %c0_32, %c0_33, %c0_34] : memref<4x2x256x256xbf16, #tpu.memory_space<vmem>>, vector<1x1x256x256xbf16>
    %79 = vector.shape_cast %78 : vector<1x1x256x256xbf16> to vector<256x256xbf16>
    %80 = arith.truncf %77 : vector<16x256xf32> to vector<16x256xbf16>
    %cst_35 = arith.constant dense<0.000000e+00> : vector<16x256xf32>
    %81 = tpu.matmul %80, %79, %cst_35 {dimension_numbers = #tpu.dot_dimension_numbers<[1], [0], [0], [1], [0, 0, 1, 1], [], []>} : vector<16x256xbf16>, vector<256x256xbf16>, vector<16x256xf32> -> vector<16x256xf32>
    %82 = arith.mulf %81, %81 : vector<16x256xf32>
    %83 = tpu.concatenate %81, %82 in 0 : vector<16x256xf32>, vector<16x256xf32> -> vector<32x256xf32>
    %84 = arith.truncf %83 : vector<32x256xf32> to vector<32x256xbf16>
    %cst_36 = arith.constant dense<0.000000e+00> : vector<32x256xf32>
    %85 = tpu.matmul %84, %0, %cst_36 {dimension_numbers = #tpu.dot_dimension_numbers<[1], [0], [0], [1], [0, 0, 1, 1], [], []>} : vector<32x256xbf16>, vector<256x256xbf16>, vector<32x256xf32> -> vector<32x256xf32>
    %86 = vector.extract_strided_slice %85 {offsets = [0, 0], sizes = [16, 256], strides = [1, 1]} : vector<32x256xf32> to vector<16x256xf32>
    %87 = vector.extract_strided_slice %85 {offsets = [16, 0], sizes = [16, 256], strides = [1, 1]} : vector<32x256xf32> to vector<16x256xf32>
    %88 = arith.mulf %86, %86 : vector<16x256xf32>
    %89 = arith.subf %87, %88 : vector<16x256xf32>
    %c6 = arith.constant 6 : index
    %c0_37 = arith.constant 0 : index
    %90 = vector.load %arg4[%c6, %c0_37] : memref<16x256xf32, #tpu.memory_space<vmem>>, vector<1x256xf32>
    %c7 = arith.constant 7 : index
    %c0_38 = arith.constant 0 : index
    %91 = vector.load %arg4[%c7, %c0_38] : memref<16x256xf32, #tpu.memory_space<vmem>>, vector<1x256xf32>
    %92 = arith.subf %81, %86 : vector<16x256xf32>
    %cst_39 = arith.constant 9.99999974E-6 : f32
    %93 = vector.broadcast %cst_39 : f32 to vector<16x256xf32>
    %94 = arith.addf %89, %93 : vector<16x256xf32>
    %95 = math.rsqrt %94 : vector<16x256xf32>
    %96 = arith.mulf %92, %95 : vector<16x256xf32>
    %97 = vector.broadcast %90 : vector<1x256xf32> to vector<16x256xf32>
    %98 = arith.mulf %96, %97 : vector<16x256xf32>
    %99 = vector.broadcast %91 : vector<1x256xf32> to vector<16x256xf32>
    %100 = arith.addf %98, %99 : vector<16x256xf32>
    %cst_40 = arith.constant 0.000000e+00 : f32
    %101 = vector.broadcast %cst_40 : f32 to vector<16x256xf32>
    %102 = arith.maximumf %100, %101 : vector<16x256xf32>
    %c1_41 = arith.constant 1 : index
    %c1_42 = arith.constant 1 : index
    %c0_43 = arith.constant 0 : index
    %c0_44 = arith.constant 0 : index
    %103 = vector.load %arg5[%c1_41, %c1_42, %c0_43, %c0_44] : memref<4x2x256x256xbf16, #tpu.memory_space<vmem>>, vector<1x1x256x256xbf16>
    %104 = vector.shape_cast %103 : vector<1x1x256x256xbf16> to vector<256x256xbf16>
    %105 = arith.truncf %102 : vector<16x256xf32> to vector<16x256xbf16>
    %cst_45 = arith.constant dense<0.000000e+00> : vector<16x256xf32>
    %106 = tpu.matmul %105, %104, %cst_45 {dimension_numbers = #tpu.dot_dimension_numbers<[1], [0], [0], [1], [0, 0, 1, 1], [], []>} : vector<16x256xbf16>, vector<256x256xbf16>, vector<16x256xf32> -> vector<16x256xf32>
    %107 = arith.addf %106, %56 : vector<16x256xf32>
    %108 = arith.addf %56, %107 : vector<16x256xf32>
    %109 = arith.mulf %108, %108 : vector<16x256xf32>
    %110 = tpu.concatenate %108, %109 in 0 : vector<16x256xf32>, vector<16x256xf32> -> vector<32x256xf32>
    %111 = arith.truncf %110 : vector<32x256xf32> to vector<32x256xbf16>
    %cst_46 = arith.constant dense<0.000000e+00> : vector<32x256xf32>
    %112 = tpu.matmul %111, %0, %cst_46 {dimension_numbers = #tpu.dot_dimension_numbers<[1], [0], [0], [1], [0, 0, 1, 1], [], []>} : vector<32x256xbf16>, vector<256x256xbf16>, vector<32x256xf32> -> vector<32x256xf32>
    %113 = vector.extract_strided_slice %112 {offsets = [0, 0], sizes = [16, 256], strides = [1, 1]} : vector<32x256xf32> to vector<16x256xf32>
    %114 = vector.extract_strided_slice %112 {offsets = [16, 0], sizes = [16, 256], strides = [1, 1]} : vector<32x256xf32> to vector<16x256xf32>
    %115 = arith.mulf %113, %113 : vector<16x256xf32>
    %116 = arith.subf %114, %115 : vector<16x256xf32>
    %c8 = arith.constant 8 : index
    %c0_47 = arith.constant 0 : index
    %117 = vector.load %arg4[%c8, %c0_47] : memref<16x256xf32, #tpu.memory_space<vmem>>, vector<1x256xf32>
    %c9 = arith.constant 9 : index
    %c0_48 = arith.constant 0 : index
    %118 = vector.load %arg4[%c9, %c0_48] : memref<16x256xf32, #tpu.memory_space<vmem>>, vector<1x256xf32>
    %119 = arith.subf %108, %113 : vector<16x256xf32>
    %cst_49 = arith.constant 9.99999974E-6 : f32
    %120 = vector.broadcast %cst_49 : f32 to vector<16x256xf32>
    %121 = arith.addf %116, %120 : vector<16x256xf32>
    %122 = math.rsqrt %121 : vector<16x256xf32>
    %123 = arith.mulf %119, %122 : vector<16x256xf32>
    %124 = vector.broadcast %117 : vector<1x256xf32> to vector<16x256xf32>
    %125 = arith.mulf %123, %124 : vector<16x256xf32>
    %126 = vector.broadcast %118 : vector<1x256xf32> to vector<16x256xf32>
    %127 = arith.addf %125, %126 : vector<16x256xf32>
    %cst_50 = arith.constant 0.000000e+00 : f32
    %128 = vector.broadcast %cst_50 : f32 to vector<16x256xf32>
    %129 = arith.maximumf %127, %128 : vector<16x256xf32>
    %c2_51 = arith.constant 2 : index
    %c0_52 = arith.constant 0 : index
    %c0_53 = arith.constant 0 : index
    %c0_54 = arith.constant 0 : index
    %130 = vector.load %arg5[%c2_51, %c0_52, %c0_53, %c0_54] : memref<4x2x256x256xbf16, #tpu.memory_space<vmem>>, vector<1x1x256x256xbf16>
    %131 = vector.shape_cast %130 : vector<1x1x256x256xbf16> to vector<256x256xbf16>
    %132 = arith.truncf %129 : vector<16x256xf32> to vector<16x256xbf16>
    %cst_55 = arith.constant dense<0.000000e+00> : vector<16x256xf32>
    %133 = tpu.matmul %132, %131, %cst_55 {dimension_numbers = #tpu.dot_dimension_numbers<[1], [0], [0], [1], [0, 0, 1, 1], [], []>} : vector<16x256xbf16>, vector<256x256xbf16>, vector<16x256xf32> -> vector<16x256xf32>
    %134 = arith.mulf %133, %133 : vector<16x256xf32>
    %135 = tpu.concatenate %133, %134 in 0 : vector<16x256xf32>, vector<16x256xf32> -> vector<32x256xf32>
    %136 = arith.truncf %135 : vector<32x256xf32> to vector<32x256xbf16>
    %cst_56 = arith.constant dense<0.000000e+00> : vector<32x256xf32>
    %137 = tpu.matmul %136, %0, %cst_56 {dimension_numbers = #tpu.dot_dimension_numbers<[1], [0], [0], [1], [0, 0, 1, 1], [], []>} : vector<32x256xbf16>, vector<256x256xbf16>, vector<32x256xf32> -> vector<32x256xf32>
    %138 = vector.extract_strided_slice %137 {offsets = [0, 0], sizes = [16, 256], strides = [1, 1]} : vector<32x256xf32> to vector<16x256xf32>
    %139 = vector.extract_strided_slice %137 {offsets = [16, 0], sizes = [16, 256], strides = [1, 1]} : vector<32x256xf32> to vector<16x256xf32>
    %140 = arith.mulf %138, %138 : vector<16x256xf32>
    %141 = arith.subf %139, %140 : vector<16x256xf32>
    %c10 = arith.constant 10 : index
    %c0_57 = arith.constant 0 : index
    %142 = vector.load %arg4[%c10, %c0_57] : memref<16x256xf32, #tpu.memory_space<vmem>>, vector<1x256xf32>
    %c11 = arith.constant 11 : index
    %c0_58 = arith.constant 0 : index
    %143 = vector.load %arg4[%c11, %c0_58] : memref<16x256xf32, #tpu.memory_space<vmem>>, vector<1x256xf32>
    %144 = arith.subf %133, %138 : vector<16x256xf32>
    %cst_59 = arith.constant 9.99999974E-6 : f32
    %145 = vector.broadcast %cst_59 : f32 to vector<16x256xf32>
    %146 = arith.addf %141, %145 : vector<16x256xf32>
    %147 = math.rsqrt %146 : vector<16x256xf32>
    %148 = arith.mulf %144, %147 : vector<16x256xf32>
    %149 = vector.broadcast %142 : vector<1x256xf32> to vector<16x256xf32>
    %150 = arith.mulf %148, %149 : vector<16x256xf32>
    %151 = vector.broadcast %143 : vector<1x256xf32> to vector<16x256xf32>
    %152 = arith.addf %150, %151 : vector<16x256xf32>
    %cst_60 = arith.constant 0.000000e+00 : f32
    %153 = vector.broadcast %cst_60 : f32 to vector<16x256xf32>
    %154 = arith.maximumf %152, %153 : vector<16x256xf32>
    %c2_61 = arith.constant 2 : index
    %c1_62 = arith.constant 1 : index
    %c0_63 = arith.constant 0 : index
    %c0_64 = arith.constant 0 : index
    %155 = vector.load %arg5[%c2_61, %c1_62, %c0_63, %c0_64] : memref<4x2x256x256xbf16, #tpu.memory_space<vmem>>, vector<1x1x256x256xbf16>
    %156 = vector.shape_cast %155 : vector<1x1x256x256xbf16> to vector<256x256xbf16>
    %157 = arith.truncf %154 : vector<16x256xf32> to vector<16x256xbf16>
    %cst_65 = arith.constant dense<0.000000e+00> : vector<16x256xf32>
    %158 = tpu.matmul %157, %156, %cst_65 {dimension_numbers = #tpu.dot_dimension_numbers<[1], [0], [0], [1], [0, 0, 1, 1], [], []>} : vector<16x256xbf16>, vector<256x256xbf16>, vector<16x256xf32> -> vector<16x256xf32>
    %159 = arith.addf %158, %108 : vector<16x256xf32>
    %160 = arith.addf %108, %159 : vector<16x256xf32>
    %161 = arith.mulf %160, %160 : vector<16x256xf32>
    %162 = tpu.concatenate %160, %161 in 0 : vector<16x256xf32>, vector<16x256xf32> -> vector<32x256xf32>
    %163 = arith.truncf %162 : vector<32x256xf32> to vector<32x256xbf16>
    %cst_66 = arith.constant dense<0.000000e+00> : vector<32x256xf32>
    %164 = tpu.matmul %163, %0, %cst_66 {dimension_numbers = #tpu.dot_dimension_numbers<[1], [0], [0], [1], [0, 0, 1, 1], [], []>} : vector<32x256xbf16>, vector<256x256xbf16>, vector<32x256xf32> -> vector<32x256xf32>
    %165 = vector.extract_strided_slice %164 {offsets = [0, 0], sizes = [16, 256], strides = [1, 1]} : vector<32x256xf32> to vector<16x256xf32>
    %166 = vector.extract_strided_slice %164 {offsets = [16, 0], sizes = [16, 256], strides = [1, 1]} : vector<32x256xf32> to vector<16x256xf32>
    %167 = arith.mulf %165, %165 : vector<16x256xf32>
    %168 = arith.subf %166, %167 : vector<16x256xf32>
    %c12 = arith.constant 12 : index
    %c0_67 = arith.constant 0 : index
    %169 = vector.load %arg4[%c12, %c0_67] : memref<16x256xf32, #tpu.memory_space<vmem>>, vector<1x256xf32>
    %c13 = arith.constant 13 : index
    %c0_68 = arith.constant 0 : index
    %170 = vector.load %arg4[%c13, %c0_68] : memref<16x256xf32, #tpu.memory_space<vmem>>, vector<1x256xf32>
    %171 = arith.subf %160, %165 : vector<16x256xf32>
    %cst_69 = arith.constant 9.99999974E-6 : f32
    %172 = vector.broadcast %cst_69 : f32 to vector<16x256xf32>
    %173 = arith.addf %168, %172 : vector<16x256xf32>
    %174 = math.rsqrt %173 : vector<16x256xf32>
    %175 = arith.mulf %171, %174 : vector<16x256xf32>
    %176 = vector.broadcast %169 : vector<1x256xf32> to vector<16x256xf32>
    %177 = arith.mulf %175, %176 : vector<16x256xf32>
    %178 = vector.broadcast %170 : vector<1x256xf32> to vector<16x256xf32>
    %179 = arith.addf %177, %178 : vector<16x256xf32>
    %cst_70 = arith.constant 0.000000e+00 : f32
    %180 = vector.broadcast %cst_70 : f32 to vector<16x256xf32>
    %181 = arith.maximumf %179, %180 : vector<16x256xf32>
    %c3_71 = arith.constant 3 : index
    %c0_72 = arith.constant 0 : index
    %c0_73 = arith.constant 0 : index
    %c0_74 = arith.constant 0 : index
    %182 = vector.load %arg5[%c3_71, %c0_72, %c0_73, %c0_74] : memref<4x2x256x256xbf16, #tpu.memory_space<vmem>>, vector<1x1x256x256xbf16>
    %183 = vector.shape_cast %182 : vector<1x1x256x256xbf16> to vector<256x256xbf16>
    %184 = arith.truncf %181 : vector<16x256xf32> to vector<16x256xbf16>
    %cst_75 = arith.constant dense<0.000000e+00> : vector<16x256xf32>
    %185 = tpu.matmul %184, %183, %cst_75 {dimension_numbers = #tpu.dot_dimension_numbers<[1], [0], [0], [1], [0, 0, 1, 1], [], []>} : vector<16x256xbf16>, vector<256x256xbf16>, vector<16x256xf32> -> vector<16x256xf32>
    %186 = arith.mulf %185, %185 : vector<16x256xf32>
    %187 = tpu.concatenate %185, %186 in 0 : vector<16x256xf32>, vector<16x256xf32> -> vector<32x256xf32>
    %188 = arith.truncf %187 : vector<32x256xf32> to vector<32x256xbf16>
    %cst_76 = arith.constant dense<0.000000e+00> : vector<32x256xf32>
    %189 = tpu.matmul %188, %0, %cst_76 {dimension_numbers = #tpu.dot_dimension_numbers<[1], [0], [0], [1], [0, 0, 1, 1], [], []>} : vector<32x256xbf16>, vector<256x256xbf16>, vector<32x256xf32> -> vector<32x256xf32>
    %190 = vector.extract_strided_slice %189 {offsets = [0, 0], sizes = [16, 256], strides = [1, 1]} : vector<32x256xf32> to vector<16x256xf32>
    %191 = vector.extract_strided_slice %189 {offsets = [16, 0], sizes = [16, 256], strides = [1, 1]} : vector<32x256xf32> to vector<16x256xf32>
    %192 = arith.mulf %190, %190 : vector<16x256xf32>
    %193 = arith.subf %191, %192 : vector<16x256xf32>
    %c14 = arith.constant 14 : index
    %c0_77 = arith.constant 0 : index
    %194 = vector.load %arg4[%c14, %c0_77] : memref<16x256xf32, #tpu.memory_space<vmem>>, vector<1x256xf32>
    %c15 = arith.constant 15 : index
    %c0_78 = arith.constant 0 : index
    %195 = vector.load %arg4[%c15, %c0_78] : memref<16x256xf32, #tpu.memory_space<vmem>>, vector<1x256xf32>
    %196 = arith.subf %185, %190 : vector<16x256xf32>
    %cst_79 = arith.constant 9.99999974E-6 : f32
    %197 = vector.broadcast %cst_79 : f32 to vector<16x256xf32>
    %198 = arith.addf %193, %197 : vector<16x256xf32>
    %199 = math.rsqrt %198 : vector<16x256xf32>
    %200 = arith.mulf %196, %199 : vector<16x256xf32>
    %201 = vector.broadcast %194 : vector<1x256xf32> to vector<16x256xf32>
    %202 = arith.mulf %200, %201 : vector<16x256xf32>
    %203 = vector.broadcast %195 : vector<1x256xf32> to vector<16x256xf32>
    %204 = arith.addf %202, %203 : vector<16x256xf32>
    %cst_80 = arith.constant 0.000000e+00 : f32
    %205 = vector.broadcast %cst_80 : f32 to vector<16x256xf32>
    %206 = arith.maximumf %204, %205 : vector<16x256xf32>
    %c3_81 = arith.constant 3 : index
    %c1_82 = arith.constant 1 : index
    %c0_83 = arith.constant 0 : index
    %c0_84 = arith.constant 0 : index
    %207 = vector.load %arg5[%c3_81, %c1_82, %c0_83, %c0_84] : memref<4x2x256x256xbf16, #tpu.memory_space<vmem>>, vector<1x1x256x256xbf16>
    %208 = vector.shape_cast %207 : vector<1x1x256x256xbf16> to vector<256x256xbf16>
    %209 = arith.truncf %206 : vector<16x256xf32> to vector<16x256xbf16>
    %cst_85 = arith.constant dense<0.000000e+00> : vector<16x256xf32>
    %210 = tpu.matmul %209, %208, %cst_85 {dimension_numbers = #tpu.dot_dimension_numbers<[1], [0], [0], [1], [0, 0, 1, 1], [], []>} : vector<16x256xbf16>, vector<256x256xbf16>, vector<16x256xf32> -> vector<16x256xf32>
    %211 = arith.addf %210, %160 : vector<16x256xf32>
    %c0_86 = arith.constant 0 : index
    %c0_87 = arith.constant 0 : index
    %212 = vector.load %arg6[%c0_86, %c0_87] : memref<256x128xbf16, #tpu.memory_space<vmem>>, vector<256x128xbf16>
    %213 = arith.truncf %211 : vector<16x256xf32> to vector<16x256xbf16>
    %cst_88 = arith.constant dense<0.000000e+00> : vector<16x128xf32>
    %214 = tpu.matmul %213, %212, %cst_88 {dimension_numbers = #tpu.dot_dimension_numbers<[1], [0], [0], [1], [0, 0, 1, 1], [], []>} : vector<16x256xbf16>, vector<256x128xbf16>, vector<16x128xf32> -> vector<16x128xf32>
    %c0_89 = arith.constant 0 : index
    %c0_90 = arith.constant 0 : index
    %215 = vector.load %arg7[%c0_89, %c0_90] : memref<16x128xf32, #tpu.memory_space<vmem>>, vector<16x128xf32>
    tpu.vector_store %arg7[%c0_89, %c0_90], %214 {strides = array<i32>} : memref<16x128xf32, #tpu.memory_space<vmem>>, vector<16x128xf32>,
    return
  }
  func.func @transform_0(%arg0: i32) -> (i32, i32) {
    %c0_i32 = arith.constant 0 : i32
    %c0_i32_0 = arith.constant 0 : i32
    return %arg0, %c0_i32 : i32, i32
  }
  func.func @transform_1(%arg0: i32) -> (i32, i32) {
    %c0_i32 = arith.constant 0 : i32
    %c0_i32_0 = arith.constant 0 : i32
    %c0_i32_1 = arith.constant 0 : i32
    return %c0_i32, %c0_i32_0 : i32, i32
  }
  func.func @transform_2(%arg0: i32) -> (i32, i32) {
    %c0_i32 = arith.constant 0 : i32
    %c0_i32_0 = arith.constant 0 : i32
    %c0_i32_1 = arith.constant 0 : i32
    return %c0_i32, %c0_i32_0 : i32, i32
  }
  func.func @transform_3(%arg0: i32) -> (i32, i32) {
    %c0_i32 = arith.constant 0 : i32
    %c0_i32_0 = arith.constant 0 : i32
    %c0_i32_1 = arith.constant 0 : i32
    return %c0_i32, %c0_i32_0 : i32, i32
  }
  func.func @transform_4(%arg0: i32) -> (i32, i32, i32, i32) {
    %c0_i32 = arith.constant 0 : i32
    %c0_i32_0 = arith.constant 0 : i32
    %c0_i32_1 = arith.constant 0 : i32
    %c0_i32_2 = arith.constant 0 : i32
    %c0_i32_3 = arith.constant 0 : i32
    return %c0_i32, %c0_i32_0, %c0_i32_1, %c0_i32_2 : i32, i32, i32, i32
  }
  func.func @transform_5(%arg0: i32) -> (i32, i32) {
    %c0_i32 = arith.constant 0 : i32
    %c0_i32_0 = arith.constant 0 : i32
    %c0_i32_1 = arith.constant 0 : i32
    return %c0_i32, %c0_i32_0 : i32, i32
  }
  func.func @transform_6(%arg0: i32) -> (i32, i32) {
    %c0_i32 = arith.constant 0 : i32
    %c0_i32_0 = arith.constant 0 : i32
    return %arg0, %c0_i32 : i32, i32
  }
}

</mosaic_0001>

<bundles_post_ra>
// kernel: sionna_skip_forward.1
= control target key start
LH: loop header
LB: loop body
LE: loop exit
PB: predicated region body
PF: predicated region fallthrough
CT: control target
= control target key end

     0   :  { %11 = vsyncpa [#allocation3], 0  ;;  %s5219_s0 = inlined_call_operand.vmem [shape: f32[16,32], index: 0, kind: input, shape index: {}]   ;;  %s5220_s1 = inlined_call_operand.vmem [shape: bf16[32,256], index: 1, kind: input, shape index: {}]   ;;  %s5221_s2 = inlined_call_operand.hbm [shape: bf16[256,256], index: 2, kind: input, shape index: {}]   ;;  %s5222_s3 = inlined_call_operand.hbm [shape: f32[16,256], index: 3, kind: input, shape index: {}]   ;;  %s5223_s4 = inlined_call_operand.hbm [shape: bf16[4,2,256,256], index: 4, kind: input, shape index: {}]   ;;  %s5224_s5 = inlined_call_operand.hbm [shape: bf16[256,128], index: 5, kind: input, shape index: {}]   ;;  %s5225_s6 = inlined_call_operand.vmem [shape: f32[16,128], index: 6, kind: output, shape index: {}]  }
   0x1   :  { %12 = vsyncpa [#allocation5], 0 }
   0x2   :  { %13 = vsyncpa [#allocation8], 0  ;;  %s4433_s21 = smov [#allocation4]  }
   0x3   :  { %s35_s22 = sshll.u32 %s4433_s21, 4  ;;  %s36_s22 = int_to_ptr.vmem [resolvable:$true] %s35_s22 }
   0x4   :  { %s4355_s23 = scalar_lea.vmem %s36_s22, 512  ;;  %p4360_p1 = scmp.lt.s32.totalorder %s36_s22, %s36_s22 }
   0x5   :  { %p4356_p0 = scmp.ne.s32.totalorder %s36_s22, %s4355_s23  ;;  %p4361_p2 = scmp.lt.s32.totalorder %s4355_s23, %s4355_s23 }
   0x7   :  { %p4362_p3 = por %p4361_p2, %p4360_p1 }
   0x9   :  { %p4363_p4 = pnand %p4362_p3, %p4356_p0 }
   0xb   :  { %4366 = shalt.err (!%p4363_p4)
}
   0xc   :  { %s4434_s24 = smov 256   ;;  %s4435_s25 = smov 16  }
   0xd   :  { %41 = dma.hbm_to_vmem [thread:$0]  %s5222_s3, 512, %s36_s22, [#allocation5], %s4434_s24, %s4434_s24, %s4435_s25  }
   0xe   :  { %s4436_s28 = smov [#allocation2]  }
   0xf   :  { %s23_s29 = sshll.u32 %s4436_s28, 4  ;;  %s24_s29 = int_to_ptr.vmem [resolvable:$true] %s23_s29 }
  0x10   :  { %s4375_s30 = scalar_lea.vmem %s24_s29, 4096  ;;  %p4380_p6 = scmp.lt.s32.totalorder %s24_s29, %s24_s29 }
  0x11   :  { %p4376_p5 = scmp.ne.s32.totalorder %s24_s29, %s4375_s30  ;;  %p4381_p7 = scmp.lt.s32.totalorder %s4375_s30, %s4375_s30 }
  0x13   :  { %p4382_p8 = por %p4381_p7, %p4380_p6 }
  0x15   :  { %p4383_p9 = pnand %p4382_p8, %p4376_p5 }
  0x17   :  { %4386 = shalt.err (!%p4383_p9)
}
  0x18   :  { %s4437_s7 = smov 128   ;;  %s4438_s8 = smov 8  }
  0x19   :  { %29 = dma.hbm_to_vmem [thread:$0]  %s5221_s2, 4096, %s24_s29, [#allocation3], %s4437_s7, %s4437_s7, %s4438_s8  }
  0x1a   :  { %s4439_s11 = smov [#allocation6]   ;;  %s4440_s13 = smov [#allocation7]  }
  0x1b   :  { %s47_s12 = sshll.u32 %s4439_s11, 4  ;;  %s59_s3 = sshll.u32 %s4440_s13, 4  ;;  %s48_s12 = int_to_ptr.vmem [resolvable:$true] %s47_s12  ;;  %s60_s3 = int_to_ptr.vmem [resolvable:$true] %s59_s3 }
  0x1c   :  { %s4395_s14 = scalar_lea.vmem %s48_s12, 32768  ;;  %p4400_p11 = scmp.lt.s32.totalorder %s48_s12, %s48_s12 }
  0x1d   :  { %p4396_p10 = scmp.ne.s32.totalorder %s48_s12, %s4395_s14  ;;  %p4401_p12 = scmp.lt.s32.totalorder %s4395_s14, %s4395_s14 }
  0x1f   :  { %p4402_p13 = por %p4401_p12, %p4400_p11 }
  0x21   :  { %p4403_p0 = pnand %p4402_p13, %p4396_p10 }
  0x23   :  { %4406 = shalt.err (!%p4403_p0)
}
  0x24   :  { %53 = dma.hbm_to_vmem [thread:$0]  %s5223_s4, 32768, %s48_s12, [#allocation5], %s4437_s7, %s4437_s7, %s4438_s8  }
  0x25   :  { %s4415_s17 = scalar_lea.vmem %s60_s3, 2048  ;;  %p4420_p2 = scmp.lt.s32.totalorder %s60_s3, %s60_s3 }
  0x26   :  { %p4416_p1 = scmp.ne.s32.totalorder %s60_s3, %s4415_s17  ;;  %p4421_p3 = scmp.lt.s32.totalorder %s4415_s17, %s4415_s17 }
  0x28   :  { %p4422_p4 = por %p4421_p3, %p4420_p2 }
  0x2a   :  { %p4423_p5 = pnand %p4422_p4, %p4416_p1 }
  0x2c   :  { %4426 = shalt.err (!%p4423_p5)
}
  0x2d   :  { %s4441_s2 = smov 64   ;;  %s4442_s18 = smov 4  }
  0x2e   :  { %65 = dma.hbm_to_vmem [thread:$0]  %s5224_s5, 2048, %s60_s3, [#allocation8], %s4441_s2, %s4441_s2, %s4442_s18  }
  0x2f   :  { %4427 = dma.done.wait [#allocation3], 4096  }
  0x30   :  { %4428 = vsyncadd [#allocation3], 4294963200 }
  0x31   :  { %4429 = dma.done.wait [#allocation5], 33280  }
  0x32   :  { %4430 = vsyncadd [#allocation5], 4294934016 }
  0x33   :  { %4431 = dma.done.wait [#allocation8], 2048  }
  0x34   :  { %4432 = vsyncadd [#allocation8], 4294965248  ;;  %v4443_v0 = vmov 0   ;;  %v3765_v1 = vld [vmem:[%s5220_s1 + $0x14] ss:$8 sps:$4 sm:$0xff]   ;;  %v111_v5 = vld [vmem:[%s5219_s0] sm:$0xff] }
  0x35   :  { %174 = vmatprep.mubr.bf16.mxu0 %v4443_v0  ;;  %v3767_v2 = vld [vmem:[%s5220_s1 + $0x10] ss:$8 sps:$4 sm:$0xff]   ;;  %154 = vmatprep.subr.bf16.mxu0 %v3765_v1  ;;  %v3768_v3 = vld [vmem:[%s5220_s1 + $0x4] ss:$8 sps:$4 sm:$0xff]   ;;  %v3770_v4 = vld [vmem:[%s5220_s1] ss:$8 sps:$4 sm:$0xff]  }
  0x36   :  { %155 = vmatpush1.bf16.msra.mxu0 %v3767_v2  ;;  %v112_v6 = vld [vmem:[%s5219_s0 + $0x8] sm:$0xff]  ;;  %v4509_v7 = vld [vmem:[#allocation2 + $0x74] ss:$8 sps:$4 sm:$0xff]   ;;  %v4511_v8 = vld [vmem:[#allocation2 + $0x70] ss:$8 sps:$4 sm:$0xff]   ;;  %vm138_vm0 = vcmask 261120  }
  0x37   :  { %156 = vmatprep.subr.bf16.mxu0 %v3768_v3  ;;  %v4513_v9 = vld [vmem:[#allocation2 + $0x64] ss:$8 sps:$4 sm:$0xff]   ;;  %v117_v10 = vpack.c.bf16 %v112_v6, %v111_v5  ;;  %353 = vmatprep.subr.bf16.mxu1 %v4509_v7  ;;  %v4517_v11 = vld [vmem:[#allocation2 + $0x60] ss:$8 sps:$4 sm:$0xff]   ;;  %v4520_v12 = vld [vmem:[#allocation2 + $0x54] ss:$8 sps:$4 sm:$0xff]  }
  0x38   :  { %354 = vmatpush1.bf16.msra.mxu1 %v4511_v8  ;;  %v4523_v13 = vld [vmem:[#allocation2 + $0x50] ss:$8 sps:$4 sm:$0xff]   ;;  %v4526_v14 = vld [vmem:[#allocation2 + $0x44] ss:$8 sps:$4 sm:$0xff]   ;;  %v4529_v15 = vld [vmem:[#allocation2 + $0x40] ss:$8 sps:$4 sm:$0xff]  }
  0x39   :  { %355 = vmatprep.subr.bf16.mxu1 %v4513_v9  ;;  %v4532_v16 = vld [vmem:[#allocation2 + $0x34] ss:$8 sps:$4 sm:$0xff]   ;;  %v4535_v17 = vld [vmem:[#allocation2 + $0x30] ss:$8 sps:$4 sm:$0xff]   ;;  %v4538_v18 = vld [vmem:[#allocation2 + $0x24] ss:$8 sps:$4 sm:$0xff]  }
  0x3a   :  { %157 = vmatpush1.bf16.msra.mxu0 %v3770_v4  ;;  %v4540_v19 = vld [vmem:[#allocation2 + $0x20] ss:$8 sps:$4 sm:$0xff]   ;;  %v4542_v20 = vld [vmem:[#allocation2 + $0x14] ss:$8 sps:$4 sm:$0xff]   ;;  %v4546_v21 = vld [vmem:[#allocation2 + $0x10] ss:$8 sps:$4 sm:$0xff]  }
  0x3b   :  { %v4548_v22 = vld [vmem:[#allocation2 + $0x4] ss:$8 sps:$4 sm:$0xff]   ;;  %v4552_v23 = vld [vmem:[#allocation2] ss:$8 sps:$4 sm:$0xff]   ;;  %v4554_v24 = vld [vmem:[#allocation2 + $0xf4] ss:$8 sps:$4 sm:$0xff]  }
  0x3c   :  { %356 = vmatpush1.bf16.msra.mxu1 %v4517_v11  ;;  %v4558_v25 = vld [vmem:[#allocation2 + $0xf0] ss:$8 sps:$4 sm:$0xff]   ;;  %v4560_v26 = vld [vmem:[#allocation2 + $0xe4] ss:$8 sps:$4 sm:$0xff]   ;;  %v4564_v27 = vld [vmem:[#allocation2 + $0xe0] ss:$8 sps:$4 sm:$0xff]  }
  0x3d   :  { %3427 = vmatmul.mubr.msk.bf16.vlgmr.msra.gmra.mxu0 %vm138_vm0, %v117_v10  ;;  %357 = vmatprep.subr.bf16.mxu1 %v4520_v12  ;;  %v4566_v28 = vld [vmem:[#allocation2 + $0xd4] ss:$8 sps:$4 sm:$0xff]   ;;  %v4570_v29 = vld [vmem:[#allocation2 + $0xd0] ss:$8 sps:$4 sm:$0xff]   ;;  %v4572_v30 = vld [vmem:[#allocation2 + $0xc4] ss:$8 sps:$4 sm:$0xff]  }
  0x3e   :  { %v4576_v31 = vld [vmem:[#allocation2 + $0xc0] ss:$8 sps:$4 sm:$0xff]   ;;  %v4578_v32 = vld [vmem:[#allocation2 + $0xb4] ss:$8 sps:$4 sm:$0xff]   ;;  %v4582_v33 = vld [vmem:[#allocation2 + $0xb0] ss:$8 sps:$4 sm:$0xff]  }
  0x3f   :  { %v4584_v34 = vld [vmem:[#allocation2 + $0xa4] ss:$8 sps:$4 sm:$0xff]   ;;  %v4588_v35 = vld [vmem:[#allocation2 + $0xa0] ss:$8 sps:$4 sm:$0xff]   ;;  %v4593_v36 = vld [vmem:[#allocation2 + $0x94] ss:$8 sps:$4 sm:$0xff]  }
  0x40   :  { %358 = vmatpush1.bf16.msra.mxu1 %v4523_v13  ;;  %v4595_v37 = vld [vmem:[#allocation2 + $0x90] ss:$8 sps:$4 sm:$0xff]   ;;  %v4599_v38 = vld [vmem:[#allocation2 + $0x84] ss:$8 sps:$4 sm:$0xff]   ;;  %v4601_v39 = vld [vmem:[#allocation2 + $0x80] ss:$8 sps:$4 sm:$0xff]  }
  0x41   :  { %359 = vmatprep.subr.bf16.mxu1 %v4526_v14  ;;  %v3819_v40 = vld [vmem:[#allocation6 + $0x70] ss:$8 sps:$4 sm:$0xff]   ;;  %v3821_v41 = vld [vmem:[#allocation6 + $0x74] ss:$8 sps:$4 sm:$0xff]   ;;  %v3824_v42 = vld [vmem:[#allocation6 + $0x64] ss:$8 sps:$4 sm:$0xff]  }
  0x42   :  { %661 = vmatprep.subr.bf16.mxu0 %v3821_v41  ;;  %v3822_v43 = vld [vmem:[#allocation6 + $0x60] ss:$8 sps:$4 sm:$0xff]   ;;  %v3827_v44 = vld [vmem:[#allocation6 + $0x54] ss:$8 sps:$4 sm:$0xff]   ;;  %v3825_v45 = vld [vmem:[#allocation6 + $0x50] ss:$8 sps:$4 sm:$0xff]  }
  0x43   :  { %662 = vmatpush1.bf16.msra.mxu0 %v3819_v40  ;;  %v3830_v46 = vld [vmem:[#allocation6 + $0x44] ss:$8 sps:$4 sm:$0xff]   ;;  %v3828_v47 = vld [vmem:[#allocation6 + $0x40] ss:$8 sps:$4 sm:$0xff]   ;;  %v3833_v48 = vld [vmem:[#allocation6 + $0x34] ss:$8 sps:$4 sm:$0xff]  }
  0x44   :  { %360 = vmatpush1.bf16.msra.mxu1 %v4529_v15  ;;  %663 = vmatprep.subr.bf16.mxu0 %v3824_v42  ;;  %v3831_v49 = vld [vmem:[#allocation6 + $0x30] ss:$8 sps:$4 sm:$0xff]   ;;  %v3836_v62 = vld [vmem:[#allocation6 + $0x24] ss:$8 sps:$4 sm:$0xff]   ;;  %v3834_v63 = vld [vmem:[#allocation6 + $0x20] ss:$8 sps:$4 sm:$0xff]  }
  0x45   :  { %361 = vmatprep.subr.bf16.mxu1 %v4532_v16  ;;  %v3839_v0 = vld [vmem:[#allocation6 + $0x14] ss:$8 sps:$4 sm:$0xff]   ;;  %v3837_v1 = vld [vmem:[#allocation6 + $0x10] ss:$8 sps:$4 sm:$0xff]   ;;  %v3842_v2 = vld [vmem:[#allocation6 + $0x4] ss:$8 sps:$4 sm:$0xff]  }
  0x46   :  { %v3840_v3 = vld [vmem:[#allocation6] ss:$8 sps:$4 sm:$0xff]   ;;  %v3845_v4 = vld [vmem:[#allocation6 + $0xf4] ss:$8 sps:$4 sm:$0xff]   ;;  %v3843_v5 = vld [vmem:[#allocation6 + $0xf0] ss:$8 sps:$4 sm:$0xff]  }
  0x47   :  { %664 = vmatpush1.bf16.msra.mxu0 %v3822_v43  ;;  %v3848_v6 = vld [vmem:[#allocation6 + $0xe4] ss:$8 sps:$4 sm:$0xff]  }
  0x48   :  { %362 = vmatpush1.bf16.msra.mxu1 %v4535_v17  ;;  %665 = vmatprep.subr.bf16.mxu0 %v3827_v44  ;;  %v3854_v10 = vld [vmem:[#allocation6 + $0xc4] ss:$8 sps:$4 sm:$0xff]  }
  0x49   :  { %363 = vmatprep.subr.bf16.mxu1 %v4538_v18 }
  0x4b   :  { %666 = vmatpush1.bf16.msra.mxu0 %v3825_v45 }
  0x4c   :  { %364 = vmatpush1.bf16.msra.mxu1 %v4540_v19  ;;  %667 = vmatprep.subr.bf16.mxu0 %v3830_v46 }
  0x4d   :  { %365 = vmatprep.subr.bf16.mxu1 %v4542_v20 }
  0x4f   :  { %668 = vmatpush1.bf16.msra.mxu0 %v3828_v47 }
  0x50   :  { %366 = vmatpush1.bf16.msra.mxu1 %v4546_v21  ;;  %669 = vmatprep.subr.bf16.mxu0 %v3833_v48 }
  0x51   :  { %367 = vmatprep.subr.bf16.mxu1 %v4548_v22 }
  0x53   :  { %670 = vmatpush1.bf16.msra.mxu0 %v3831_v49 }
  0x54   :  { %368 = vmatpush1.bf16.msra.mxu1 %v4552_v23  ;;  %671 = vmatprep.subr.bf16.mxu0 %v3836_v62 }
  0x55   :  { %369 = vmatprep.subr.bf16.mxu1 %v4554_v24 }
  0x57   :  { %672 = vmatpush1.bf16.msra.mxu0 %v3834_v63 }
  0x58   :  { %370 = vmatpush2.bf16.msra.mxu1 %v4558_v25  ;;  %673 = vmatprep.subr.bf16.mxu0 %v3839_v0 }
  0x59   :  { %371 = vmatprep.subr.bf16.mxu1 %v4560_v26 }
  0x5b   :  { %674 = vmatpush1.bf16.msra.mxu0 %v3837_v1 }
  0x5c   :  { %372 = vmatpush2.bf16.msra.mxu1 %v4564_v27  ;;  %675 = vmatprep.subr.bf16.mxu0 %v3842_v2 }
  0x5d   :  { %373 = vmatprep.subr.bf16.mxu1 %v4566_v28 }
  0x5f   :  { %676 = vmatpush1.bf16.msra.mxu0 %v3840_v3 }
  0x60   :  { %374 = vmatpush2.bf16.msra.mxu1 %v4570_v29  ;;  %677 = vmatprep.subr.bf16.mxu0 %v3845_v4 }
  0x61   :  { %375 = vmatprep.subr.bf16.mxu1 %v4572_v30 }
  0x63   :  { %678 = vmatpush2.bf16.msra.mxu0 %v3843_v5 }
  0x64   :  { %376 = vmatpush2.bf16.msra.mxu1 %v4576_v31  ;;  %679 = vmatprep.subr.bf16.mxu0 %v3848_v6  ;;  %v416_v6 = vld [vmem:[#allocation4 + $0x1] ss:$8 sm:$0x3] }
  0x65   :  { %377 = vmatprep.subr.bf16.mxu1 %v4578_v32 }
  0x68   :  { %378 = vmatpush2.bf16.msra.mxu1 %v4582_v33 }
  0x69   :  { %379 = vmatprep.subr.bf16.mxu1 %v4584_v34 }
  0x6c   :  { %380 = vmatpush2.bf16.msra.mxu1 %v4588_v35 }
  0x6d   :  { %381 = vmatprep.subr.bf16.mxu1 %v4593_v36 }
  0x70   :  { %382 = vmatpush2.bf16.msra.mxu1 %v4595_v37 }
  0x71   :  { %383 = vmatprep.subr.bf16.mxu1 %v4599_v38 }
  0x74   :  { %384 = vmatpush2.bf16.msra.mxu1 %v4601_v39 }
  0x75   :  { %712 = vmatprep.subr.bf16.mxu1 %v4509_v7 }
  0xfd   :  { %v4606_v50 = vpop.f32.mrf.mxu0 }
  0xfe   :  { %v185_v60 = vmul.f32 %v4606_v50, %v4606_v50 }
  0xff   :  { %v4608_v51 = vpop.f32.mrf.mxu0 }
 0x100   :  { %v186_v55 = vmul.f32 %v4608_v51, %v4608_v51 }
 0x101   :  { %v4610_v52 = vpop.f32.mrf.mxu0 }
 0x102   :  { %v189_v57 = vpack.c.bf16 %v4610_v52, %v4606_v50  ;;  %v187_v59 = vmul.f32 %v4610_v52, %v4610_v52 }
 0x103   :  { %v4612_v53 = vpop.f32.mrf.mxu0 }
 0x104   :  { %v190_v54 = vpack.c.bf16 %v4612_v53, %v4608_v51  ;;  %v188_v56 = vmul.f32 %v4612_v53, %v4612_v53  ;;  %v191_v61 = vpack.c.bf16 %v187_v59, %v185_v60 }
 0x106   :  { %385 = vmatprep.mubr.bf16.mxu1 %v190_v54  ;;  %v192_v58 = vpack.c.bf16 %v188_v56, %v186_v55  ;;  %v434_v56 = vlaneseq }
 0x107   :  { %386 = vmatmul.mubr.bf16.vlgmr.msra.gmra.mxu1 %v189_v57 }
 0x108   :  { %395 = vmatprep.mubr.bf16.mxu1 %v192_v58  ;;  %713 = vmatpush1.bf16.msra.mxu1 %v4511_v8  ;;  %v3846_v8 = vld [vmem:[#allocation6 + $0xe0] ss:$8 sps:$4 sm:$0xff]   ;;  %v435_v58 = vshrl.u32 %v434_v56, 7 }
 0x109   :  { %714 = vmatprep.subr.bf16.mxu1 %v4513_v9  ;;  %680 = vmatpush2.bf16.msra.mxu0 %v3846_v8  ;;  %v3849_v9 = vld [vmem:[#allocation6 + $0xd0] ss:$8 sps:$4 sm:$0xff]  }
 0x10a   :  { %v4658_v59 = vsub.s32 1, %v435_v58  ;;  %v4660_v60 = vsub.s32 0, %v435_v58 }
 0x10c   :  { %715 = vmatpush1.bf16.msra.mxu1 %v4517_v11  ;;  %v3852_v11 = vld [vmem:[#allocation6 + $0xc0] ss:$8 sps:$4 sm:$0xff]  }
 0x10d   :  { %716 = vmatprep.subr.bf16.mxu1 %v4520_v12  ;;  %v3857_v12 = vld [vmem:[#allocation6 + $0xb4] ss:$8 sps:$4 sm:$0xff]  }
 0x10f   :  { %396 = vmatmul.mubr.bf16.gmra.mxu1 %v191_v61  ;;  %v414_v61 = vld [vmem:[#allocation4] ss:$8 sm:$0x3] }
 0x110   :  { %717 = vmatpush1.bf16.msra.mxu1 %v4523_v13  ;;  %v3855_v13 = vld [vmem:[#allocation6 + $0xb0] ss:$8 sps:$4 sm:$0xff]   ;;  %v441_v1 = vrot.slane %v414_v61, %v4658_v59  ;;  %v437_v3 = vrot.slane %v414_v61, %v4660_v60 }
 0x111   :  { %718 = vmatprep.subr.bf16.mxu1 %v4526_v14  ;;  %v3860_v14 = vld [vmem:[#allocation6 + $0xa4] ss:$8 sps:$4 sm:$0xff]  }
 0x114   :  { %719 = vmatpush1.bf16.msra.mxu1 %v4529_v15  ;;  %v3858_v15 = vld [vmem:[#allocation6 + $0xa0] ss:$8 sps:$4 sm:$0xff]  }
 0x115   :  { %720 = vmatprep.subr.bf16.mxu1 %v4532_v16  ;;  %v3863_v16 = vld [vmem:[#allocation6 + $0x94] ss:$8 sps:$4 sm:$0xff]  }
 0x118   :  { %721 = vmatpush1.bf16.msra.mxu1 %v4535_v17  ;;  %v3861_v17 = vld [vmem:[#allocation6 + $0x90] ss:$8 sps:$4 sm:$0xff]  }
 0x119   :  { %722 = vmatprep.subr.bf16.mxu1 %v4538_v18  ;;  %v3866_v18 = vld [vmem:[#allocation6 + $0x84] ss:$8 sps:$4 sm:$0xff]  }
 0x11c   :  { %723 = vmatpush1.bf16.msra.mxu1 %v4540_v19  ;;  %v3864_v19 = vld [vmem:[#allocation6 + $0x80] ss:$8 sps:$4 sm:$0xff]  }
 0x11d   :  { %724 = vmatprep.subr.bf16.mxu1 %v4542_v20 }
 0x120   :  { %725 = vmatpush1.bf16.msra.mxu1 %v4546_v21 }
 0x121   :  { %726 = vmatprep.subr.bf16.mxu1 %v4548_v22 }
 0x124   :  { %727 = vmatpush1.bf16.msra.mxu1 %v4552_v23 }
 0x125   :  { %728 = vmatprep.subr.bf16.mxu1 %v4554_v24 }
 0x128   :  { %729 = vmatpush2.bf16.msra.mxu1 %v4558_v25 }
 0x129   :  { %730 = vmatprep.subr.bf16.mxu1 %v4560_v26 }
 0x12c   :  { %731 = vmatpush2.bf16.msra.mxu1 %v4564_v27 }
 0x12d   :  { %732 = vmatprep.subr.bf16.mxu1 %v4566_v28 }
 0x130   :  { %733 = vmatpush2.bf16.msra.mxu1 %v4570_v29 }
 0x131   :  { %734 = vmatprep.subr.bf16.mxu1 %v4572_v30 }
 0x134   :  { %735 = vmatpush2.bf16.msra.mxu1 %v4576_v31 }
 0x135   :  { %736 = vmatprep.subr.bf16.mxu1 %v4578_v32 }
 0x138   :  { %737 = vmatpush2.bf16.msra.mxu1 %v4582_v33 }
 0x139   :  { %738 = vmatprep.subr.bf16.mxu1 %v4584_v34 }
 0x13c   :  { %739 = vmatpush2.bf16.msra.mxu1 %v4588_v35 }
 0x13d   :  { %740 = vmatprep.subr.bf16.mxu1 %v4593_v36 }
 0x140   :  { %741 = vmatpush2.bf16.msra.mxu1 %v4595_v37 }
 0x141   :  { %742 = vmatprep.subr.bf16.mxu1 %v4599_v38 }
 0x144   :  { %743 = vmatpush2.bf16.msra.mxu1 %v4601_v39 }
 0x145   :  { %1077 = vmatprep.subr.bf16.mxu1 %v4509_v7  ;;  %v3851_v7 = vld [vmem:[#allocation6 + $0xd4] ss:$8 sps:$4 sm:$0xff]  }
 0x146   :  { %681 = vmatprep.subr.bf16.mxu0 %v3851_v7 }
 0x147   :  { %682 = vmatpush2.bf16.msra.mxu0 %v3849_v9 }
 0x148   :  { %683 = vmatprep.subr.bf16.mxu0 %v3854_v10 }
 0x14b   :  { %684 = vmatpush2.bf16.msra.mxu0 %v3852_v11  ;;  %v456_v11 = vrot.slane %v416_v6, %v4658_v59 }
 0x14c   :  { %685 = vmatprep.subr.bf16.mxu0 %v3857_v12 }
 0x14f   :  { %686 = vmatpush2.bf16.msra.mxu0 %v3855_v13 }
 0x150   :  { %687 = vmatprep.subr.bf16.mxu0 %v3860_v14  ;;  %v452_v14 = vrot.slane %v416_v6, %v4660_v60 }
 0x153   :  { %688 = vmatpush2.bf16.msra.mxu0 %v3858_v15 }
 0x154   :  { %689 = vmatprep.subr.bf16.mxu0 %v3863_v16 }
 0x157   :  { %690 = vmatpush2.bf16.msra.mxu0 %v3861_v17 }
 0x158   :  { %691 = vmatprep.subr.bf16.mxu0 %v3866_v18 }
 0x15b   :  { %692 = vmatpush2.bf16.msra.mxu0 %v3864_v19 }
 0x1c7   :  { %v387_v20 = vpop.f32.mrf.mxu1 }
 0x1c8   :  { %v406_v24 = vmul.f32 %v387_v20, %v387_v20  ;;  %v417_v63 = vsub.f32 %v4606_v50, %v387_v20 }
 0x1c9   :  { %v389_v21 = vpop.f32.mrf.mxu1 }
 0x1ca   :  { %v407_v26 = vmul.f32 %v389_v21, %v389_v21  ;;  %v418_v0 = vsub.f32 %v4608_v51, %v389_v21 }
 0x1cb   :  { %v391_v22 = vpop.f32.mrf.mxu1 }
 0x1cc   :  { %v408_v42 = vmul.f32 %v391_v22, %v391_v22  ;;  %v419_v5 = vsub.f32 %v4610_v52, %v391_v22 }
 0x1cd   :  { %v393_v23 = vpop.f32.mrf.mxu1 }
 0x1ce   :  { %v409_v46 = vmul.f32 %v393_v23, %v393_v23  ;;  %v420_v9 = vsub.f32 %v4612_v53, %v393_v23 }
 0x1cf   :  { %v397_v25 = vpop.f32.mrf.mxu1 }
 0x1d0   :  { %v410_v40 = vsub.f32 %v397_v25, %v406_v24 }
 0x1d1   :  { %v399_v41 = vpop.f32.mrf.mxu1 }
 0x1d2   :  { %v421_v43 = vadd.f32 1e-05, %v410_v40  ;;  %v411_v44 = vsub.f32 %v399_v41, %v407_v26 }
 0x1d3   :  { %v401_v45 = vpop.f32.mrf.mxu1 }
 0x1d4   :  { %4219 = vrsqrt.f32 %v421_v43  ;;  %v422_v47 = vadd.f32 1e-05, %v411_v44  ;;  %v412_v48 = vsub.f32 %v401_v45, %v408_v42  ;;  %v3867_v42 = vld [vmem:[#allocation6 + $0x170] ss:$8 sps:$4 sm:$0xff]   ;;  %v3869_v43 = vld [vmem:[#allocation6 + $0x174] ss:$8 sps:$4 sm:$0xff]  }
 0x1d5   :  { %v403_v49 = vpop.f32.mrf.mxu1  ;;  %v3872_v44 = vld [vmem:[#allocation6 + $0x164] ss:$8 sps:$4 sm:$0xff]   ;;  %1022 = vmatprep.subr.bf16.mxu0 %v3869_v43  ;;  %v3870_v45 = vld [vmem:[#allocation6 + $0x160] ss:$8 sps:$4 sm:$0xff]   ;;  %v3911_v43 = vld [vmem:[#allocation6 + $0x194] ss:$8 sps:$4 sm:$0xff]  }
 0x1d6   :  { %4221 = vrsqrt.f32 %v422_v47  ;;  %v423_v54 = vadd.f32 1e-05, %v412_v48  ;;  %v413_v55 = vsub.f32 %v403_v49, %v409_v46  ;;  %v3875_v46 = vld [vmem:[#allocation6 + $0x154] ss:$8 sps:$4 sm:$0xff]   ;;  %v3873_v47 = vld [vmem:[#allocation6 + $0x150] ss:$8 sps:$4 sm:$0xff]  }
 0x1d7   :  { %v3878_v48 = vld [vmem:[#allocation6 + $0x144] ss:$8 sps:$4 sm:$0xff]   ;;  %v3876_v49 = vld [vmem:[#allocation6 + $0x140] ss:$8 sps:$4 sm:$0xff]  }
 0x1d8   :  { %4223 = vrsqrt.f32 %v423_v54  ;;  %v424_v57 = vadd.f32 1e-05, %v413_v55  ;;  %v3881_v54 = vld [vmem:[#allocation6 + $0x134] ss:$8 sps:$4 sm:$0xff]   ;;  %v3879_v55 = vld [vmem:[#allocation6 + $0x130] ss:$8 sps:$4 sm:$0xff]  }
 0x1da   :  { %4225 = vrsqrt.f32 %v424_v57 }
 0x1e1   :  { %v4220_v62 = vpop.eup %4219 }
 0x1e2   :  { %v429_v4 = vmul.f32 %v4220_v62, %v417_v63 }
 0x1e3   :  { %v4222_v2 = vpop.eup %4221 }
 0x1e4   :  { %v430_v8 = vmul.f32 %v4222_v2, %v418_v0  ;;  %v444_v15 = vmul.f32 %v437_v3, %v429_v4 }
 0x1e5   :  { %v4224_v7 = vpop.eup %4223 }
 0x1e6   :  { %v445_v10 = vmul.f32 %v441_v1, %v430_v8  ;;  %v431_v12 = vmul.f32 %v4224_v7, %v419_v5  ;;  %v459_v21 = vadd.f32 %v452_v14, %v444_v15  ;;  %v4691_v5 = vld [vmem:[#allocation2 + $0x64] ss:$8 sps:$4 sm:$0xff]   ;;  %v4696_v8 = vld [vmem:[#allocation2 + $0x60] ss:$8 sps:$4 sm:$0xff]  }
 0x1e7   :  { %v4226_v13 = vpop.eup %4225  ;;  %v4717_v15 = vld [vmem:[#allocation2 + $0x24] ss:$8 sps:$4 sm:$0xff]  }
 0x1e8   :  { %v432_v16 = vmul.f32 %v4226_v13, %v420_v9  ;;  %v446_v17 = vmul.f32 %v437_v3, %v431_v12  ;;  %v460_v19 = vadd.f32 %v456_v11, %v445_v10  ;;  %v463_v40 = vmax.f32 %v459_v21, 0.0  ;;  %v4686_v3 = vld [vmem:[#allocation2 + $0x70] ss:$8 sps:$4 sm:$0xff]   ;;  %v4699_v9 = vld [vmem:[#allocation2 + $0x54] ss:$8 sps:$4 sm:$0xff]  }
 0x1e9   :  { %v4702_v10 = vld [vmem:[#allocation2 + $0x50] ss:$8 sps:$4 sm:$0xff]   ;;  %v4708_v12 = vld [vmem:[#allocation2 + $0x40] ss:$8 sps:$4 sm:$0xff]   ;;  %v4711_v13 = vld [vmem:[#allocation2 + $0x34] ss:$8 sps:$4 sm:$0xff]  }
 0x1ea   :  { %v447_v18 = vmul.f32 %v441_v1, %v432_v16  ;;  %v461_v20 = vadd.f32 %v452_v14, %v446_v17  ;;  %v464_v25 = vmax.f32 %v460_v19, 0.0  ;;  %v4714_v14 = vld [vmem:[#allocation2 + $0x30] ss:$8 sps:$4 sm:$0xff]   ;;  %v4720_v16 = vld [vmem:[#allocation2 + $0x20] ss:$8 sps:$4 sm:$0xff]  }
 0x1eb   :  { %v4723_v17 = vld [vmem:[#allocation2 + $0x14] ss:$8 sps:$4 sm:$0xff]   ;;  %v4729_v19 = vld [vmem:[#allocation2 + $0x4] ss:$8 sps:$4 sm:$0xff]  }
 0x1ec   :  { %v462_v22 = vadd.f32 %v456_v11, %v447_v18  ;;  %v465_v24 = vmax.f32 %v461_v20, 0.0  ;;  %v4705_v11 = vld [vmem:[#allocation2 + $0x44] ss:$8 sps:$4 sm:$0xff]   ;;  %v4726_v18 = vld [vmem:[#allocation2 + $0x10] ss:$8 sps:$4 sm:$0xff]  }
 0x1ed   :  { %v4732_v20 = vld [vmem:[#allocation2] ss:$8 sps:$4 sm:$0xff]   ;;  %v4735_v21 = vld [vmem:[#allocation2 + $0xf4] ss:$8 sps:$4 sm:$0xff]  }
 0x1ee   :  { %v466_v26 = vmax.f32 %v462_v22, 0.0  ;;  %v499_v41 = vpack.c.bf16 %v465_v24, %v463_v40  ;;  %v4738_v22 = vld [vmem:[#allocation2 + $0xf0] ss:$8 sps:$4 sm:$0xff]   ;;  %v4741_v24 = vld [vmem:[#allocation2 + $0xe4] ss:$8 sps:$4 sm:$0xff]  }
 0x1ef   :  { %v3905_v40 = vld [vmem:[#allocation6 + $0x1b4] ss:$8 sps:$4 sm:$0xff]  }
 0x1f0   :  { %v500_v23 = vpack.c.bf16 %v466_v26, %v464_v25  ;;  %v3902_v25 = vld [vmem:[#allocation6 + $0x1c4] ss:$8 sps:$4 sm:$0xff]   ;;  %v3900_v26 = vld [vmem:[#allocation6 + $0x1c0] ss:$8 sps:$4 sm:$0xff]  }
 0x1f2   :  { %693 = vmatprep.mubr.bf16.mxu0 %v500_v23  ;;  %v3903_v23 = vld [vmem:[#allocation6 + $0x1b0] ss:$8 sps:$4 sm:$0xff]  }
 0x1f3   :  { %694 = vmatmul.mubr.bf16.vlgmr.msra.gmra.mxu0 %v499_v41  ;;  %v3908_v41 = vld [vmem:[#allocation6 + $0x1a4] ss:$8 sps:$4 sm:$0xff]  }
 0x1f4   :  { %1023 = vmatpush1.bf16.msra.mxu0 %v3867_v42  ;;  %v3906_v42 = vld [vmem:[#allocation6 + $0x1a0] ss:$8 sps:$4 sm:$0xff]  }
 0x1f5   :  { %1024 = vmatprep.subr.bf16.mxu0 %v3872_v44  ;;  %v3909_v44 = vld [vmem:[#allocation6 + $0x190] ss:$8 sps:$4 sm:$0xff]  }
 0x1f8   :  { %1025 = vmatpush1.bf16.msra.mxu0 %v3870_v45  ;;  %v3914_v45 = vld [vmem:[#allocation6 + $0x184] ss:$8 sps:$4 sm:$0xff]  }
 0x1f9   :  { %1026 = vmatprep.subr.bf16.mxu0 %v3875_v46  ;;  %v3912_v46 = vld [vmem:[#allocation6 + $0x180] ss:$8 sps:$4 sm:$0xff]  }
 0x1fc   :  { %1027 = vmatpush1.bf16.msra.mxu0 %v3873_v47 }
 0x1fd   :  { %1028 = vmatprep.subr.bf16.mxu0 %v3878_v48 }
 0x200   :  { %1029 = vmatpush1.bf16.msra.mxu0 %v3876_v49 }
 0x201   :  { %1030 = vmatprep.subr.bf16.mxu0 %v3881_v54 }
 0x204   :  { %1031 = vmatpush1.bf16.msra.mxu0 %v3879_v55 }
 0x2b3   :  { %v4670_v56 = vpop.f32.mrf.mxu0 }
 0x2b4   :  { %v704_v6 = vmul.f32 %v4670_v56, %v4670_v56 }
 0x2b5   :  { %v4672_v57 = vpop.f32.mrf.mxu0 }
 0x2b6   :  { %v705_v62 = vmul.f32 %v4672_v57, %v4672_v57 }
 0x2b7   :  { %v4674_v58 = vpop.f32.mrf.mxu0 }
 0x2b8   :  { %v708_v1 = vpack.c.bf16 %v4674_v58, %v4670_v56  ;;  %v706_v4 = vmul.f32 %v4674_v58, %v4674_v58 }
 0x2b9   :  { %v4676_v61 = vpop.f32.mrf.mxu0 }
 0x2ba   :  { %v707_v63 = vmul.f32 %v4676_v61, %v4676_v61  ;;  %v709_v0 = vpack.c.bf16 %v4676_v61, %v4672_v57  ;;  %v710_v7 = vpack.c.bf16 %v706_v4, %v704_v6 }
 0x2bc   :  { %744 = vmatprep.mubr.bf16.mxu1 %v709_v0  ;;  %v711_v2 = vpack.c.bf16 %v707_v63, %v705_v62 }
 0x2bd   :  { %745 = vmatmul.mubr.bf16.vlgmr.msra.gmra.mxu1 %v708_v1 }
 0x2be   :  { %754 = vmatprep.mubr.bf16.mxu1 %v711_v2  ;;  %1078 = vmatpush1.bf16.msra.mxu1 %v4686_v3 }
 0x2bf   :  { %1079 = vmatprep.subr.bf16.mxu1 %v4691_v5 }
 0x2c2   :  { %1080 = vmatpush1.bf16.msra.mxu1 %v4696_v8 }
 0x2c3   :  { %1081 = vmatprep.subr.bf16.mxu1 %v4699_v9 }
 0x2c5   :  { %755 = vmatmul.mubr.bf16.gmra.mxu1 %v710_v7 }
 0x2c6   :  { %1082 = vmatpush1.bf16.msra.mxu1 %v4702_v10 }
 0x2c7   :  { %1083 = vmatprep.subr.bf16.mxu1 %v4705_v11 }
 0x2ca   :  { %1084 = vmatpush1.bf16.msra.mxu1 %v4708_v12 }
 0x2cb   :  { %1085 = vmatprep.subr.bf16.mxu1 %v4711_v13 }
 0x2ce   :  { %1086 = vmatpush1.bf16.msra.mxu1 %v4714_v14 }
 0x2cf   :  { %1087 = vmatprep.subr.bf16.mxu1 %v4717_v15 }
 0x2d2   :  { %1088 = vmatpush1.bf16.msra.mxu1 %v4720_v16 }
 0x2d3   :  { %1089 = vmatprep.subr.bf16.mxu1 %v4723_v17 }
 0x2d6   :  { %1090 = vmatpush1.bf16.msra.mxu1 %v4726_v18 }
 0x2d7   :  { %1091 = vmatprep.subr.bf16.mxu1 %v4729_v19 }
 0x2da   :  { %1092 = vmatpush1.bf16.msra.mxu1 %v4732_v20 }
 0x2db   :  { %1093 = vmatprep.subr.bf16.mxu1 %v4735_v21 }
 0x2de   :  { %1094 = vmatpush2.bf16.msra.mxu1 %v4738_v22 }
 0x2df   :  { %1095 = vmatprep.subr.bf16.mxu1 %v4741_v24 }
 0x2e2   :  { %1096 = vmatpush2.bf16.msra.mxu1 %v4564_v27  ;;  %v3884_v27 = vld [vmem:[#allocation6 + $0x124] ss:$8 sps:$4 sm:$0xff]  }
 0x2e3   :  { %1097 = vmatprep.subr.bf16.mxu1 %v4566_v28  ;;  %v4757_v28 = vld [vmem:[#allocation2 + $0x74] ss:$8 sps:$4 sm:$0xff]   ;;  %1032 = vmatprep.subr.bf16.mxu0 %v3884_v27 }
 0x2e6   :  { %1098 = vmatpush2.bf16.msra.mxu1 %v4570_v29  ;;  %v3882_v29 = vld [vmem:[#allocation6 + $0x120] ss:$8 sps:$4 sm:$0xff]  }
 0x2e7   :  { %1099 = vmatprep.subr.bf16.mxu1 %v4572_v30  ;;  %1033 = vmatpush1.bf16.msra.mxu0 %v3882_v29  ;;  %v3887_v30 = vld [vmem:[#allocation6 + $0x114] ss:$8 sps:$4 sm:$0xff]  }
 0x2e8   :  { %1034 = vmatprep.subr.bf16.mxu0 %v3887_v30 }
 0x2ea   :  { %1100 = vmatpush2.bf16.msra.mxu1 %v4576_v31  ;;  %v3885_v31 = vld [vmem:[#allocation6 + $0x110] ss:$8 sps:$4 sm:$0xff]  }
 0x2eb   :  { %1101 = vmatprep.subr.bf16.mxu1 %v4578_v32  ;;  %1035 = vmatpush1.bf16.msra.mxu0 %v3885_v31  ;;  %v3890_v32 = vld [vmem:[#allocation6 + $0x104] ss:$8 sps:$4 sm:$0xff]  }
 0x2ec   :  { %1036 = vmatprep.subr.bf16.mxu0 %v3890_v32 }
 0x2ee   :  { %1102 = vmatpush2.bf16.msra.mxu1 %v4582_v33  ;;  %v3888_v33 = vld [vmem:[#allocation6 + $0x100] ss:$8 sps:$4 sm:$0xff]  }
 0x2ef   :  { %1103 = vmatprep.subr.bf16.mxu1 %v4584_v34  ;;  %1037 = vmatpush1.bf16.msra.mxu0 %v3888_v33  ;;  %v3893_v34 = vld [vmem:[#allocation6 + $0x1f4] ss:$8 sps:$4 sm:$0xff]  }
 0x2f0   :  { %1038 = vmatprep.subr.bf16.mxu0 %v3893_v34 }
 0x2f2   :  { %1104 = vmatpush2.bf16.msra.mxu1 %v4588_v35  ;;  %v3891_v35 = vld [vmem:[#allocation6 + $0x1f0] ss:$8 sps:$4 sm:$0xff]  }
 0x2f3   :  { %1105 = vmatprep.subr.bf16.mxu1 %v4593_v36  ;;  %1039 = vmatpush2.bf16.msra.mxu0 %v3891_v35  ;;  %v3896_v36 = vld [vmem:[#allocation6 + $0x1e4] ss:$8 sps:$4 sm:$0xff]   ;;  %v774_v35 = vld [vmem:[#allocation4 + $0x2] ss:$8 sm:$0x3] }
 0x2f4   :  { %1040 = vmatprep.subr.bf16.mxu0 %v3896_v36 }
 0x2f6   :  { %1106 = vmatpush2.bf16.msra.mxu1 %v4595_v37  ;;  %v3894_v37 = vld [vmem:[#allocation6 + $0x1e0] ss:$8 sps:$4 sm:$0xff]  }
 0x2f7   :  { %1107 = vmatprep.subr.bf16.mxu1 %v4599_v38  ;;  %1041 = vmatpush2.bf16.msra.mxu0 %v3894_v37  ;;  %v3899_v38 = vld [vmem:[#allocation6 + $0x1d4] ss:$8 sps:$4 sm:$0xff]  }
 0x2f8   :  { %1042 = vmatprep.subr.bf16.mxu0 %v3899_v38 }
 0x2fa   :  { %1108 = vmatpush2.bf16.msra.mxu1 %v4601_v39  ;;  %v3897_v39 = vld [vmem:[#allocation6 + $0x1d0] ss:$8 sps:$4 sm:$0xff]  }
 0x2fb   :  { %1438 = vmatprep.subr.bf16.mxu1 %v4757_v28  ;;  %1043 = vmatpush2.bf16.msra.mxu0 %v3897_v39  ;;  %v801_v39 = vrot.slane %v774_v35, %v4658_v59 }
 0x2fc   :  { %1044 = vmatprep.subr.bf16.mxu0 %v3902_v25 }
 0x2ff   :  { %1045 = vmatpush2.bf16.msra.mxu0 %v3900_v26  ;;  %v797_v26 = vrot.slane %v774_v35, %v4660_v60  ;;  %v3924_v35 = vld [vmem:[#allocation6 + $0x240] ss:$8 sps:$4 sm:$0xff]  }
 0x300   :  { %1046 = vmatprep.subr.bf16.mxu0 %v3905_v40 }
 0x303   :  { %1047 = vmatpush2.bf16.msra.mxu0 %v3903_v23 }
 0x304   :  { %1048 = vmatprep.subr.bf16.mxu0 %v3908_v41  ;;  %v776_v41 = vld [vmem:[#allocation4 + $0x3] ss:$8 sm:$0x3] }
 0x307   :  { %1049 = vmatpush2.bf16.msra.mxu0 %v3906_v42 }
 0x308   :  { %1050 = vmatprep.subr.bf16.mxu0 %v3911_v43 }
 0x30b   :  { %1051 = vmatpush2.bf16.msra.mxu0 %v3909_v44 }
 0x30c   :  { %1052 = vmatprep.subr.bf16.mxu0 %v3914_v45 }
 0x30f   :  { %1053 = vmatpush2.bf16.msra.mxu0 %v3912_v46  ;;  %v816_v46 = vrot.slane %v776_v41, %v4658_v59 }
 0x37d   :  { %v746_v47 = vpop.f32.mrf.mxu1 }
 0x37e   :  { %v765_v55 = vmul.f32 %v746_v47, %v746_v47  ;;  %v777_v37 = vsub.f32 %v4670_v56, %v746_v47 }
 0x37f   :  { %v748_v48 = vpop.f32.mrf.mxu1 }
 0x380   :  { %v766_v63 = vmul.f32 %v748_v48, %v748_v48  ;;  %v778_v38 = vsub.f32 %v4672_v57, %v748_v48  ;;  %v812_v57 = vrot.slane %v776_v41, %v4660_v60 }
 0x381   :  { %v750_v49 = vpop.f32.mrf.mxu1 }
 0x382   :  { %v767_v2 = vmul.f32 %v750_v49, %v750_v49  ;;  %v779_v23 = vsub.f32 %v4674_v58, %v750_v49 }
 0x383   :  { %v752_v54 = vpop.f32.mrf.mxu1 }
 0x384   :  { %v768_v27 = vmul.f32 %v752_v54, %v752_v54  ;;  %v780_v44 = vsub.f32 %v4676_v61, %v752_v54 }
 0x385   :  { %v756_v62 = vpop.f32.mrf.mxu1 }
 0x386   :  { %v769_v0 = vsub.f32 %v756_v62, %v765_v55 }
 0x387   :  { %v758_v1 = vpop.f32.mrf.mxu1 }
 0x388   :  { %v781_v4 = vadd.f32 1e-05, %v769_v0  ;;  %v770_v6 = vsub.f32 %v758_v1, %v766_v63 }
 0x389   :  { %v760_v7 = vpop.f32.mrf.mxu1 }
 0x38a   :  { %4227 = vrsqrt.f32 %v781_v4  ;;  %v782_v29 = vadd.f32 1e-05, %v770_v6  ;;  %v771_v30 = vsub.f32 %v760_v7, %v767_v2 }
 0x38b   :  { %v762_v31 = vpop.f32.mrf.mxu1 }
 0x38c   :  { %4229 = vrsqrt.f32 %v782_v29  ;;  %v783_v32 = vadd.f32 1e-05, %v771_v30  ;;  %v772_v33 = vsub.f32 %v762_v31, %v768_v27  ;;  %v3915_v27 = vld [vmem:[#allocation6 + $0x270] ss:$8 sps:$4 sm:$0xff]   ;;  %v3917_v29 = vld [vmem:[#allocation6 + $0x274] ss:$8 sps:$4 sm:$0xff]  }
 0x38d   :  { %v3920_v30 = vld [vmem:[#allocation6 + $0x264] ss:$8 sps:$4 sm:$0xff]   ;;  %1387 = vmatprep.subr.bf16.mxu0 %v3917_v29  ;;  %v3918_v31 = vld [vmem:[#allocation6 + $0x260] ss:$8 sps:$4 sm:$0xff]  }
 0x38e   :  { %4231 = vrsqrt.f32 %v783_v32  ;;  %v784_v34 = vadd.f32 1e-05, %v772_v33  ;;  %v3923_v32 = vld [vmem:[#allocation6 + $0x254] ss:$8 sps:$4 sm:$0xff]   ;;  %v3921_v33 = vld [vmem:[#allocation6 + $0x250] ss:$8 sps:$4 sm:$0xff]  }
 0x38f   :  { %v3930_v29 = vld [vmem:[#allocation6 + $0x220] ss:$8 sps:$4 sm:$0xff]  }
 0x390   :  { %4233 = vrsqrt.f32 %v784_v34  ;;  %v3926_v34 = vld [vmem:[#allocation6 + $0x244] ss:$8 sps:$4 sm:$0xff]  }
 0x397   :  { %v4228_v36 = vpop.eup %4227 }
 0x398   :  { %v789_v40 = vmul.f32 %v4228_v36, %v777_v37  ;;  %v3929_v36 = vld [vmem:[#allocation6 + $0x234] ss:$8 sps:$4 sm:$0xff]   ;;  %v3927_v37 = vld [vmem:[#allocation6 + $0x230] ss:$8 sps:$4 sm:$0xff]  }
 0x399   :  { %v4230_v25 = vpop.eup %4229 }
 0x39a   :  { %v790_v42 = vmul.f32 %v4230_v25, %v778_v38  ;;  %v804_v47 = vmul.f32 %v797_v26, %v789_v40 }
 0x39b   :  { %v4232_v43 = vpop.eup %4231 }
 0x39c   :  { %v805_v45 = vmul.f32 %v801_v39, %v790_v42  ;;  %v791_v55 = vmul.f32 %v4232_v43, %v779_v23  ;;  %v819_v2 = vadd.f32 %v812_v57, %v804_v47 }
 0x39d   :  { %v4234_v56 = vpop.eup %4233 }
 0x39e   :  { %v792_v48 = vmul.f32 %v4234_v56, %v780_v44  ;;  %v806_v62 = vmul.f32 %v797_v26, %v791_v55  ;;  %v820_v0 = vadd.f32 %v816_v46, %v805_v45  ;;  %v823_v7 = vmax.f32 %v819_v2, 0.0  ;;  %v4829_v2 = vld [vmem:[#allocation2 + $0xb4] ss:$8 sps:$4 sm:$0xff]  }
 0x3a0   :  { %v807_v63 = vmul.f32 %v801_v39, %v792_v48  ;;  %v821_v1 = vadd.f32 %v812_v57, %v806_v62  ;;  %v824_v4 = vmax.f32 %v820_v0, 0.0  ;;  %v4814_v48 = vld [vmem:[#allocation2 + $0xe0] ss:$8 sps:$4 sm:$0xff]   ;;  %v4817_v62 = vld [vmem:[#allocation2 + $0xd4] ss:$8 sps:$4 sm:$0xff]  }
 0x3a1   :  { %v4823_v0 = vld [vmem:[#allocation2 + $0xc4] ss:$8 sps:$4 sm:$0xff]  }
 0x3a2   :  { %v822_v58 = vadd.f32 %v816_v46, %v807_v63  ;;  %v825_v49 = vmax.f32 %v821_v1, 0.0  ;;  %v4820_v63 = vld [vmem:[#allocation2 + $0xd0] ss:$8 sps:$4 sm:$0xff]   ;;  %v4826_v1 = vld [vmem:[#allocation2 + $0xc0] ss:$8 sps:$4 sm:$0xff]  }
 0x3a4   :  { %v826_v6 = vmax.f32 %v822_v58, 0.0  ;;  %v860_v54 = vpack.c.bf16 %v825_v49, %v823_v7  ;;  %v4832_v58 = vld [vmem:[#allocation2 + $0xb0] ss:$8 sps:$4 sm:$0xff]   ;;  %v4835_v49 = vld [vmem:[#allocation2 + $0xa4] ss:$8 sps:$4 sm:$0xff]  }
 0x3a5   :  { %v4844_v7 = vld [vmem:[#allocation2 + $0x90] ss:$8 sps:$4 sm:$0xff]  }
 0x3a6   :  { %v861_v61 = vpack.c.bf16 %v826_v6, %v824_v4  ;;  %v4838_v4 = vld [vmem:[#allocation2 + $0xa0] ss:$8 sps:$4 sm:$0xff]   ;;  %v4841_v6 = vld [vmem:[#allocation2 + $0x94] ss:$8 sps:$4 sm:$0xff]  }
 0x3a8   :  { %1054 = vmatprep.mubr.bf16.mxu0 %v861_v61  ;;  %v4847_v61 = vld [vmem:[#allocation2 + $0x84] ss:$8 sps:$4 sm:$0xff]  }
 0x3a9   :  { %1055 = vmatmul.mubr.bf16.vlgmr.msra.gmra.mxu0 %v860_v54  ;;  %v4850_v54 = vld [vmem:[#allocation2 + $0x80] ss:$8 sps:$4 sm:$0xff]  }
 0x3aa   :  { %1388 = vmatpush1.bf16.msra.mxu0 %v3915_v27  ;;  %v3932_v27 = vld [vmem:[#allocation6 + $0x224] ss:$8 sps:$4 sm:$0xff]  }
 0x3ab   :  { %1389 = vmatprep.subr.bf16.mxu0 %v3920_v30  ;;  %v3935_v30 = vld [vmem:[#allocation6 + $0x214] ss:$8 sps:$4 sm:$0xff]  }
 0x3ae   :  { %1390 = vmatpush1.bf16.msra.mxu0 %v3918_v31  ;;  %v3933_v31 = vld [vmem:[#allocation6 + $0x210] ss:$8 sps:$4 sm:$0xff]  }
 0x3af   :  { %1391 = vmatprep.subr.bf16.mxu0 %v3923_v32  ;;  %v3938_v32 = vld [vmem:[#allocation6 + $0x204] ss:$8 sps:$4 sm:$0xff]  }
 0x3b2   :  { %1392 = vmatpush1.bf16.msra.mxu0 %v3921_v33  ;;  %v3936_v33 = vld [vmem:[#allocation6 + $0x200] ss:$8 sps:$4 sm:$0xff]  }
 0x3b3   :  { %1393 = vmatprep.subr.bf16.mxu0 %v3926_v34  ;;  %v3941_v34 = vld [vmem:[#allocation6 + $0x2f4] ss:$8 sps:$4 sm:$0xff]  }
 0x3b6   :  { %1394 = vmatpush1.bf16.msra.mxu0 %v3924_v35  ;;  %v3939_v35 = vld [vmem:[#allocation6 + $0x2f0] ss:$8 sps:$4 sm:$0xff]  }
 0x3b7   :  { %1395 = vmatprep.subr.bf16.mxu0 %v3929_v36  ;;  %v3944_v36 = vld [vmem:[#allocation6 + $0x2e4] ss:$8 sps:$4 sm:$0xff]  }
 0x3ba   :  { %1396 = vmatpush1.bf16.msra.mxu0 %v3927_v37  ;;  %v3942_v37 = vld [vmem:[#allocation6 + $0x2e0] ss:$8 sps:$4 sm:$0xff]  }
 0x3bb   :  { %1397 = vmatprep.subr.bf16.mxu0 %v3932_v27 }
 0x3be   :  { %1398 = vmatpush1.bf16.msra.mxu0 %v3930_v29 }
 0x3bf   :  { %1399 = vmatprep.subr.bf16.mxu0 %v3935_v30 }
 0x3c2   :  { %1400 = vmatpush1.bf16.msra.mxu0 %v3933_v31 }
 0x3c3   :  { %1401 = vmatprep.subr.bf16.mxu0 %v3938_v32 }
 0x3c6   :  { %1402 = vmatpush1.bf16.msra.mxu0 %v3936_v33 }
 0x3c7   :  { %1403 = vmatprep.subr.bf16.mxu0 %v3941_v34 }
 0x3ca   :  { %1404 = vmatpush2.bf16.msra.mxu0 %v3939_v35 }
 0x3cb   :  { %1405 = vmatprep.subr.bf16.mxu0 %v3944_v36 }
 0x3ce   :  { %1406 = vmatpush2.bf16.msra.mxu0 %v3942_v37 }
 0x469   :  { %v1056_v38 = vpop.f32.mrf.mxu0 }
 0x46a   :  { %v1057_v23 = vadd.f32 %v1056_v38, %v4606_v50  ;;  %v3947_v38 = vld [vmem:[#allocation6 + $0x2d4] ss:$8 sps:$4 sm:$0xff]  }
 0x46b   :  { %v1058_v39 = vpop.f32.mrf.mxu0  ;;  %1407 = vmatprep.subr.bf16.mxu0 %v3947_v38 }
 0x46c   :  { %v1059_v25 = vadd.f32 %v1058_v39, %v4608_v51  ;;  %v4782_v46 = vadd.f32 %v1057_v23, %v4606_v50  ;;  %v3945_v39 = vld [vmem:[#allocation6 + $0x2d0] ss:$8 sps:$4 sm:$0xff]  }
 0x46d   :  { %v1060_v26 = vpop.f32.mrf.mxu0  ;;  %1408 = vmatpush2.bf16.msra.mxu0 %v3945_v39  ;;  %v3951_v23 = vld [vmem:[#allocation6 + $0x2b0] ss:$8 sps:$4 sm:$0xff]  }
 0x46e   :  { %v1061_v40 = vadd.f32 %v1060_v26, %v4610_v52  ;;  %v4772_v42 = vadd.f32 %v1059_v25, %v4608_v51  ;;  %v3950_v25 = vld [vmem:[#allocation6 + $0x2c4] ss:$8 sps:$4 sm:$0xff]   ;;  %v3948_v26 = vld [vmem:[#allocation6 + $0x2c0] ss:$8 sps:$4 sm:$0xff]  }
 0x46f   :  { %v1062_v41 = vpop.f32.mrf.mxu0  ;;  %1409 = vmatprep.subr.bf16.mxu0 %v3950_v25 }
 0x470   :  { %v1063_v43 = vadd.f32 %v1062_v41, %v4612_v53  ;;  %v4776_v44 = vadd.f32 %v1061_v40, %v4610_v52  ;;  %v1070_v56 = vmul.f32 %v4772_v42, %v4772_v42  ;;  %v3953_v40 = vld [vmem:[#allocation6 + $0x2b4] ss:$8 sps:$4 sm:$0xff]   ;;  %v3956_v41 = vld [vmem:[#allocation6 + $0x2a4] ss:$8 sps:$4 sm:$0xff]  }
 0x471   :  { %1410 = vmatpush2.bf16.msra.mxu0 %v3948_v26 }
 0x472   :  { %v4779_v45 = vadd.f32 %v1063_v43, %v4612_v53  ;;  %v1073_v57 = vpack.c.bf16 %v4776_v44, %v4782_v46  ;;  %v1071_v50 = vmul.f32 %v4776_v44, %v4776_v44  ;;  %v1069_v53 = vmul.f32 %v4782_v46, %v4782_v46  ;;  %1411 = vmatprep.subr.bf16.mxu0 %v3953_v40  ;;  %v3954_v43 = vld [vmem:[#allocation6 + $0x2a0] ss:$8 sps:$4 sm:$0xff]  }
 0x474   :  { %5228 = vst [vmem:[#allocation12_spill] sm:$0xff] %v4779_v45  ;;  %v1074_v55 = vpack.c.bf16 %v4779_v45, %v4772_v42  ;;  %v1072_v51 = vmul.f32 %v4779_v45, %v4779_v45  ;;  %v1075_v47 = vpack.c.bf16 %v1071_v50, %v1069_v53 }
 0x475   :  { %1412 = vmatpush2.bf16.msra.mxu0 %v3951_v23 }
 0x476   :  { %1109 = vmatprep.mubr.bf16.mxu1 %v1074_v55  ;;  %v1076_v52 = vpack.c.bf16 %v1072_v51, %v1070_v56  ;;  %1413 = vmatprep.subr.bf16.mxu0 %v3956_v41  ;;  %v3959_v55 = vld [vmem:[#allocation6 + $0x294] ss:$8 sps:$4 sm:$0xff]   ;;  %v3957_v56 = vld [vmem:[#allocation6 + $0x290] ss:$8 sps:$4 sm:$0xff]   ;;  %v3962_v51 = vld [vmem:[#allocation6 + $0x284] ss:$8 sps:$4 sm:$0xff]  }
 0x477   :  { %1110 = vmatmul.mubr.bf16.vlgmr.msra.gmra.mxu1 %v1073_v57  ;;  %v3960_v57 = vld [vmem:[#allocation6 + $0x280] ss:$8 sps:$4 sm:$0xff]   ;;  %v1139_v41 = vld [vmem:[#allocation4 + $0x4] ss:$8 sm:$0x3] }
 0x478   :  { %1119 = vmatprep.mubr.bf16.mxu1 %v1076_v52  ;;  %1439 = vmatpush1.bf16.msra.mxu1 %v4686_v3 }
 0x479   :  { %1440 = vmatprep.subr.bf16.mxu1 %v4691_v5  ;;  %1414 = vmatpush2.bf16.msra.mxu0 %v3954_v43 }
 0x47a   :  { %1415 = vmatprep.subr.bf16.mxu0 %v3959_v55 }
 0x47c   :  { %1441 = vmatpush1.bf16.msra.mxu1 %v4696_v8 }
 0x47d   :  { %1442 = vmatprep.subr.bf16.mxu1 %v4699_v9  ;;  %1416 = vmatpush2.bf16.msra.mxu0 %v3957_v56 }
 0x47e   :  { %1417 = vmatprep.subr.bf16.mxu0 %v3962_v51  ;;  %v1166_v51 = vrot.slane %v1139_v41, %v4658_v59 }
 0x47f   :  { %1120 = vmatmul.mubr.bf16.gmra.mxu1 %v1075_v47 }
 0x480   :  { %1443 = vmatpush1.bf16.msra.mxu1 %v4702_v10 }
 0x481   :  { %1444 = vmatprep.subr.bf16.mxu1 %v4705_v11  ;;  %1418 = vmatpush2.bf16.msra.mxu0 %v3960_v57 }
 0x484   :  { %1445 = vmatpush1.bf16.msra.mxu1 %v4708_v12 }
 0x485   :  { %1446 = vmatprep.subr.bf16.mxu1 %v4711_v13 }
 0x488   :  { %1447 = vmatpush1.bf16.msra.mxu1 %v4714_v14 }
 0x489   :  { %1448 = vmatprep.subr.bf16.mxu1 %v4717_v15 }
 0x48c   :  { %1449 = vmatpush1.bf16.msra.mxu1 %v4720_v16 }
 0x48d   :  { %1450 = vmatprep.subr.bf16.mxu1 %v4723_v17 }
 0x490   :  { %1451 = vmatpush1.bf16.msra.mxu1 %v4726_v18 }
 0x491   :  { %1452 = vmatprep.subr.bf16.mxu1 %v4729_v19 }
 0x494   :  { %1453 = vmatpush1.bf16.msra.mxu1 %v4732_v20 }
 0x495   :  { %1454 = vmatprep.subr.bf16.mxu1 %v4735_v21 }
 0x498   :  { %1455 = vmatpush2.bf16.msra.mxu1 %v4738_v22 }
 0x499   :  { %1456 = vmatprep.subr.bf16.mxu1 %v4741_v24 }
 0x49c   :  { %1457 = vmatpush2.bf16.msra.mxu1 %v4814_v48 }
 0x49d   :  { %1458 = vmatprep.subr.bf16.mxu1 %v4817_v62 }
 0x4a0   :  { %1459 = vmatpush2.bf16.msra.mxu1 %v4820_v63 }
 0x4a1   :  { %1460 = vmatprep.subr.bf16.mxu1 %v4823_v0 }
 0x4a4   :  { %1461 = vmatpush2.bf16.msra.mxu1 %v4826_v1 }
 0x4a5   :  { %1462 = vmatprep.subr.bf16.mxu1 %v4829_v2 }
 0x4a8   :  { %1463 = vmatpush2.bf16.msra.mxu1 %v4832_v58 }
 0x4a9   :  { %1464 = vmatprep.subr.bf16.mxu1 %v4835_v49 }
 0x4ac   :  { %1465 = vmatpush2.bf16.msra.mxu1 %v4838_v4 }
 0x4ad   :  { %1466 = vmatprep.subr.bf16.mxu1 %v4841_v6 }
 0x4b0   :  { %1467 = vmatpush2.bf16.msra.mxu1 %v4844_v7 }
 0x4b1   :  { %1468 = vmatprep.subr.bf16.mxu1 %v4847_v61 }
 0x4b4   :  { %1469 = vmatpush2.bf16.msra.mxu1 %v4850_v54 }
 0x4b5   :  { %1803 = vmatprep.subr.bf16.mxu1 %v4757_v28 }
 0x537   :  { %v1111_v52 = vpop.f32.mrf.mxu1 }
 0x538   :  { %v1130_v27 = vmul.f32 %v1111_v52, %v1111_v52  ;;  %v1142_v55 = vsub.f32 %v4782_v46, %v1111_v52 }
 0x539   :  { %v1113_v50 = vpop.f32.mrf.mxu1 }
 0x53a   :  { %v1131_v30 = vmul.f32 %v1113_v50, %v1113_v50  ;;  %v1143_v56 = vsub.f32 %v4772_v42, %v1113_v50 }
 0x53b   :  { %v1115_v53 = vpop.f32.mrf.mxu1 }
 0x53c   :  { %v1132_v33 = vmul.f32 %v1115_v53, %v1115_v53 }
 0x53d   :  { %v1117_v47 = vpop.f32.mrf.mxu1 }
 0x53e   :  { %v1133_v37 = vmul.f32 %v1117_v47, %v1117_v47 }
 0x53f   :  { %v1121_v29 = vpop.f32.mrf.mxu1 }
 0x540   :  { %v1134_v31 = vsub.f32 %v1121_v29, %v1130_v27  ;;  %v1162_v27 = vrot.slane %v1139_v41, %v4660_v60 }
 0x541   :  { %v1123_v32 = vpop.f32.mrf.mxu1 }
 0x542   :  { %v1146_v34 = vadd.f32 1e-05, %v1134_v31  ;;  %v1135_v35 = vsub.f32 %v1123_v32, %v1131_v30  ;;  %v1144_v30 = vsub.f32 %v4776_v44, %v1115_v53  ;;  %v1141_v31 = vld [vmem:[#allocation4 + $0x5] ss:$8 sm:$0x3] }
 0x543   :  { %v1125_v36 = vpop.f32.mrf.mxu1  ;;  %v1177_v50 = vrot.slane %v1141_v31, %v4660_v60 }
 0x544   :  { %4235 = vrsqrt.f32 %v1146_v34  ;;  %v1147_v38 = vadd.f32 1e-05, %v1135_v35  ;;  %v1136_v39 = vsub.f32 %v1125_v36, %v1132_v33  ;;  %v1145_v34 = vsub.f32 %v4779_v45, %v1117_v47  ;;  %v3968_v45 = vld [vmem:[#allocation6 + $0x364] ss:$8 sps:$4 sm:$0xff]  }
 0x545   :  { %v1127_v25 = vpop.f32.mrf.mxu1  ;;  %v1181_v36 = vrot.slane %v1141_v31, %v4658_v59  ;;  %v3974_v31 = vld [vmem:[#allocation6 + $0x344] ss:$8 sps:$4 sm:$0xff]  }
 0x546   :  { %4237 = vrsqrt.f32 %v1147_v38  ;;  %v1148_v26 = vadd.f32 1e-05, %v1136_v39  ;;  %v1137_v40 = vsub.f32 %v1127_v25, %v1133_v37 }
 0x548   :  { %4239 = vrsqrt.f32 %v1148_v26  ;;  %v1149_v23 = vadd.f32 1e-05, %v1137_v40 }
 0x54a   :  { %4241 = vrsqrt.f32 %v1149_v23 }
 0x551   :  { %v4236_v43 = vpop.eup %4235 }
 0x552   :  { %v1154_v29 = vmul.f32 %v4236_v43, %v1142_v55 }
 0x553   :  { %v4238_v57 = vpop.eup %4237 }
 0x554   :  { %v1155_v32 = vmul.f32 %v4238_v57, %v1143_v56  ;;  %v1169_v38 = vmul.f32 %v1162_v27, %v1154_v29  ;;  %v3966_v29 = vld [vmem:[#allocation6 + $0x360] ss:$8 sps:$4 sm:$0xff]  }
 0x555   :  { %v4240_v33 = vpop.eup %4239 }
 0x556   :  { %v1170_v35 = vmul.f32 %v1166_v51, %v1155_v32  ;;  %v1156_v37 = vmul.f32 %v4240_v33, %v1144_v30  ;;  %v1184_v41 = vadd.f32 %v1177_v50, %v1169_v38  ;;  %v3963_v30 = vld [vmem:[#allocation6 + $0x370] ss:$8 sps:$4 sm:$0xff]   ;;  %v3965_v33 = vld [vmem:[#allocation6 + $0x374] ss:$8 sps:$4 sm:$0xff]  }
 0x557   :  { %v4242_v52 = vpop.eup %4241  ;;  %1748 = vmatprep.subr.bf16.mxu0 %v3965_v33 }
 0x558   :  { %v1157_v39 = vmul.f32 %v4242_v52, %v1145_v34  ;;  %v1171_v25 = vmul.f32 %v1162_v27, %v1156_v37  ;;  %v1185_v40 = vadd.f32 %v1181_v36, %v1170_v35  ;;  %v1188_v57 = vmax.f32 %v1184_v41, 0.0  ;;  %v3969_v27 = vld [vmem:[#allocation6 + $0x350] ss:$8 sps:$4 sm:$0xff]   ;;  %v3972_v34 = vld [vmem:[#allocation6 + $0x340] ss:$8 sps:$4 sm:$0xff]  }
 0x559   :  { %v3977_v35 = vld [vmem:[#allocation6 + $0x334] ss:$8 sps:$4 sm:$0xff]  }
 0x55a   :  { %v1172_v26 = vmul.f32 %v1166_v51, %v1157_v39  ;;  %v1186_v23 = vadd.f32 %v1177_v50, %v1171_v25  ;;  %v1189_v55 = vmax.f32 %v1185_v40, 0.0  ;;  %v3971_v51 = vld [vmem:[#allocation6 + $0x354] ss:$8 sps:$4 sm:$0xff]  }
 0x55c   :  { %v1187_v53 = vadd.f32 %v1181_v36, %v1172_v26  ;;  %v1190_v43 = vmax.f32 %v1186_v23, 0.0  ;;  %v3975_v36 = vld [vmem:[#allocation6 + $0x330] ss:$8 sps:$4 sm:$0xff]  }
 0x55e   :  { %v1191_v56 = vmax.f32 %v1187_v53, 0.0  ;;  %v1225_v32 = vpack.c.bf16 %v1190_v43, %v1188_v57  ;;  %v4005_v43 = vld [vmem:[#allocation6 + $0x390] ss:$8 sps:$4 sm:$0xff]  }
 0x560   :  { %v1226_v47 = vpack.c.bf16 %v1191_v56, %v1189_v55  ;;  %v4010_v55 = vld [vmem:[#allocation6 + $0x384] ss:$8 sps:$4 sm:$0xff]   ;;  %v4008_v56 = vld [vmem:[#allocation6 + $0x380] ss:$8 sps:$4 sm:$0xff]  }
 0x562   :  { %1419 = vmatprep.mubr.bf16.mxu0 %v1226_v47 }
 0x563   :  { %1420 = vmatmul.mubr.bf16.vlgmr.msra.gmra.mxu0 %v1225_v32 }
 0x564   :  { %1749 = vmatpush1.bf16.msra.mxu0 %v3963_v30 }
 0x565   :  { %1750 = vmatprep.subr.bf16.mxu0 %v3968_v45 }
 0x568   :  { %1751 = vmatpush1.bf16.msra.mxu0 %v3966_v29 }
 0x569   :  { %1752 = vmatprep.subr.bf16.mxu0 %v3971_v51 }
 0x56c   :  { %1753 = vmatpush1.bf16.msra.mxu0 %v3969_v27 }
 0x56d   :  { %1754 = vmatprep.subr.bf16.mxu0 %v3974_v31 }
 0x570   :  { %1755 = vmatpush1.bf16.msra.mxu0 %v3972_v34 }
 0x571   :  { %1756 = vmatprep.subr.bf16.mxu0 %v3977_v35 }
 0x574   :  { %1757 = vmatpush1.bf16.msra.mxu0 %v3975_v36 }
 0x623   :  { %v4862_v37 = vpop.f32.mrf.mxu0 }
 0x624   :  { %v1430_v41 = vmul.f32 %v4862_v37, %v4862_v37 }
 0x625   :  { %v4864_v52 = vpop.f32.mrf.mxu0 }
 0x626   :  { %v1431_v38 = vmul.f32 %v4864_v52, %v4864_v52 }
 0x627   :  { %v4866_v50 = vpop.f32.mrf.mxu0 }
 0x628   :  { %v1434_v26 = vpack.c.bf16 %v4866_v50, %v4862_v37  ;;  %v1432_v23 = vmul.f32 %v4866_v50, %v4866_v50 }
 0x629   :  { %v4868_v45 = vpop.f32.mrf.mxu0 }
 0x62a   :  { %v1433_v39 = vmul.f32 %v4868_v45, %v4868_v45  ;;  %v1435_v25 = vpack.c.bf16 %v4868_v45, %v4864_v52  ;;  %v1436_v53 = vpack.c.bf16 %v1432_v23, %v1430_v41 }
 0x62c   :  { %1470 = vmatprep.mubr.bf16.mxu1 %v1435_v25  ;;  %v1437_v40 = vpack.c.bf16 %v1433_v39, %v1431_v38 }
 0x62d   :  { %1471 = vmatmul.mubr.bf16.vlgmr.msra.gmra.mxu1 %v1434_v26 }
 0x62e   :  { %1480 = vmatprep.mubr.bf16.mxu1 %v1437_v40  ;;  %1804 = vmatpush1.bf16.msra.mxu1 %v4686_v3  ;;  %v3980_v3 = vld [vmem:[#allocation6 + $0x324] ss:$8 sps:$4 sm:$0xff]  }
 0x62f   :  { %1805 = vmatprep.subr.bf16.mxu1 %v4691_v5  ;;  %v3978_v5 = vld [vmem:[#allocation6 + $0x320] ss:$8 sps:$4 sm:$0xff]   ;;  %1758 = vmatprep.subr.bf16.mxu0 %v3980_v3  ;;  %v1500_v3 = vld [vmem:[#allocation4 + $0x6] ss:$8 sm:$0x3] }
 0x630   :  { %1759 = vmatpush1.bf16.msra.mxu0 %v3978_v5 }
 0x632   :  { %1806 = vmatpush1.bf16.msra.mxu1 %v4696_v8  ;;  %v3983_v8 = vld [vmem:[#allocation6 + $0x314] ss:$8 sps:$4 sm:$0xff]  }
 0x633   :  { %1807 = vmatprep.subr.bf16.mxu1 %v4699_v9  ;;  %v3981_v9 = vld [vmem:[#allocation6 + $0x310] ss:$8 sps:$4 sm:$0xff]   ;;  %1760 = vmatprep.subr.bf16.mxu0 %v3983_v8 }
 0x634   :  { %1761 = vmatpush1.bf16.msra.mxu0 %v3981_v9 }
 0x635   :  { %1481 = vmatmul.mubr.bf16.gmra.mxu1 %v1436_v53 }
 0x636   :  { %1808 = vmatpush1.bf16.msra.mxu1 %v4702_v10  ;;  %v3986_v10 = vld [vmem:[#allocation6 + $0x304] ss:$8 sps:$4 sm:$0xff]  }
 0x637   :  { %1809 = vmatprep.subr.bf16.mxu1 %v4705_v11  ;;  %v3984_v11 = vld [vmem:[#allocation6 + $0x300] ss:$8 sps:$4 sm:$0xff]   ;;  %1762 = vmatprep.subr.bf16.mxu0 %v3986_v10  ;;  %v1527_v10 = vrot.slane %v1500_v3, %v4658_v59 }
 0x638   :  { %1763 = vmatpush1.bf16.msra.mxu0 %v3984_v11 }
 0x63a   :  { %1810 = vmatpush1.bf16.msra.mxu1 %v4708_v12  ;;  %v3989_v12 = vld [vmem:[#allocation6 + $0x3f4] ss:$8 sps:$4 sm:$0xff]  }
 0x63b   :  { %1811 = vmatprep.subr.bf16.mxu1 %v4711_v13  ;;  %v3987_v13 = vld [vmem:[#allocation6 + $0x3f0] ss:$8 sps:$4 sm:$0xff]   ;;  %1764 = vmatprep.subr.bf16.mxu0 %v3989_v12  ;;  %v1523_v12 = vrot.slane %v1500_v3, %v4660_v60 }
 0x63c   :  { %1765 = vmatpush2.bf16.msra.mxu0 %v3987_v13 }
 0x63e   :  { %1812 = vmatpush1.bf16.msra.mxu1 %v4714_v14  ;;  %v3992_v14 = vld [vmem:[#allocation6 + $0x3e4] ss:$8 sps:$4 sm:$0xff]  }
 0x63f   :  { %1813 = vmatprep.subr.bf16.mxu1 %v4717_v15  ;;  %v3990_v15 = vld [vmem:[#allocation6 + $0x3e0] ss:$8 sps:$4 sm:$0xff]   ;;  %1766 = vmatprep.subr.bf16.mxu0 %v3992_v14 }
 0x640   :  { %1767 = vmatpush2.bf16.msra.mxu0 %v3990_v15  ;;  %v1502_v15 = vld [vmem:[#allocation4 + $0x7] ss:$8 sm:$0x3] }
 0x642   :  { %1814 = vmatpush1.bf16.msra.mxu1 %v4720_v16  ;;  %v3995_v16 = vld [vmem:[#allocation6 + $0x3d4] ss:$8 sps:$4 sm:$0xff]  }
 0x643   :  { %1815 = vmatprep.subr.bf16.mxu1 %v4723_v17  ;;  %v3993_v17 = vld [vmem:[#allocation6 + $0x3d0] ss:$8 sps:$4 sm:$0xff]   ;;  %1768 = vmatprep.subr.bf16.mxu0 %v3995_v16 }
 0x644   :  { %1769 = vmatpush2.bf16.msra.mxu0 %v3993_v17 }
 0x646   :  { %1816 = vmatpush1.bf16.msra.mxu1 %v4726_v18  ;;  %v3998_v18 = vld [vmem:[#allocation6 + $0x3c4] ss:$8 sps:$4 sm:$0xff]  }
 0x647   :  { %1817 = vmatprep.subr.bf16.mxu1 %v4729_v19  ;;  %v3996_v19 = vld [vmem:[#allocation6 + $0x3c0] ss:$8 sps:$4 sm:$0xff]   ;;  %1770 = vmatprep.subr.bf16.mxu0 %v3998_v18 }
 0x648   :  { %1771 = vmatpush2.bf16.msra.mxu0 %v3996_v19 }
 0x64a   :  { %1818 = vmatpush1.bf16.msra.mxu1 %v4732_v20  ;;  %v4001_v20 = vld [vmem:[#allocation6 + $0x3b4] ss:$8 sps:$4 sm:$0xff]  }
 0x64b   :  { %1819 = vmatprep.subr.bf16.mxu1 %v4735_v21  ;;  %v3999_v21 = vld [vmem:[#allocation6 + $0x3b0] ss:$8 sps:$4 sm:$0xff]   ;;  %1772 = vmatprep.subr.bf16.mxu0 %v4001_v20  ;;  %v1542_v20 = vrot.slane %v1502_v15, %v4658_v59 }
 0x64c   :  { %1773 = vmatpush2.bf16.msra.mxu0 %v3999_v21 }
 0x64e   :  { %1820 = vmatpush2.bf16.msra.mxu1 %v4738_v22  ;;  %v4004_v22 = vld [vmem:[#allocation6 + $0x3a4] ss:$8 sps:$4 sm:$0xff]  }
 0x64f   :  { %1821 = vmatprep.subr.bf16.mxu1 %v4741_v24  ;;  %v4002_v24 = vld [vmem:[#allocation6 + $0x3a0] ss:$8 sps:$4 sm:$0xff]   ;;  %1774 = vmatprep.subr.bf16.mxu0 %v4004_v22 }
 0x650   :  { %1775 = vmatpush2.bf16.msra.mxu0 %v4002_v24 }
 0x652   :  { %1822 = vmatpush2.bf16.msra.mxu1 %v4814_v48 }
 0x653   :  { %1823 = vmatprep.subr.bf16.mxu1 %v4817_v62 }
 0x656   :  { %1824 = vmatpush2.bf16.msra.mxu1 %v4820_v63 }
 0x657   :  { %1825 = vmatprep.subr.bf16.mxu1 %v4823_v0 }
 0x65a   :  { %1826 = vmatpush2.bf16.msra.mxu1 %v4826_v1 }
 0x65b   :  { %1827 = vmatprep.subr.bf16.mxu1 %v4829_v2 }
 0x65e   :  { %1828 = vmatpush2.bf16.msra.mxu1 %v4832_v58 }
 0x65f   :  { %1829 = vmatprep.subr.bf16.mxu1 %v4835_v49 }
 0x662   :  { %1830 = vmatpush2.bf16.msra.mxu1 %v4838_v4 }
 0x663   :  { %1831 = vmatprep.subr.bf16.mxu1 %v4841_v6 }
 0x666   :  { %1832 = vmatpush2.bf16.msra.mxu1 %v4844_v7 }
 0x667   :  { %1833 = vmatprep.subr.bf16.mxu1 %v4847_v61 }
 0x66a   :  { %1834 = vmatpush2.bf16.msra.mxu1 %v4850_v54 }
 0x66b   :  { %2164 = vmatprep.subr.bf16.mxu1 %v4757_v28  ;;  %v4007_v28 = vld [vmem:[#allocation6 + $0x394] ss:$8 sps:$4 sm:$0xff]  }
 0x66c   :  { %1776 = vmatprep.subr.bf16.mxu0 %v4007_v28 }
 0x66d   :  { %1777 = vmatpush2.bf16.msra.mxu0 %v4005_v43 }
 0x66e   :  { %1778 = vmatprep.subr.bf16.mxu0 %v4010_v55 }
 0x671   :  { %1779 = vmatpush2.bf16.msra.mxu0 %v4008_v56 }
 0x6ed   :  { %v1472_v57 = vpop.f32.mrf.mxu1 }
 0x6ee   :  { %v1491_v33 = vmul.f32 %v1472_v57, %v1472_v57  ;;  %v1503_v8 = vsub.f32 %v4862_v37, %v1472_v57 }
 0x6ef   :  { %v1474_v47 = vpop.f32.mrf.mxu1 }
 0x6f0   :  { %v1492_v51 = vmul.f32 %v1474_v47, %v1474_v47  ;;  %v1504_v9 = vsub.f32 %v4864_v52, %v1474_v47  ;;  %v1538_v52 = vrot.slane %v1502_v15, %v4660_v60 }
 0x6f1   :  { %v1476_v32 = vpop.f32.mrf.mxu1 }
 0x6f2   :  { %v1493_v34 = vmul.f32 %v1476_v32, %v1476_v32  ;;  %v1505_v14 = vsub.f32 %v4866_v50, %v1476_v32 }
 0x6f3   :  { %v1478_v30 = vpop.f32.mrf.mxu1 }
 0x6f4   :  { %v1494_v39 = vmul.f32 %v1478_v30, %v1478_v30  ;;  %v1506_v18 = vsub.f32 %v4868_v45, %v1478_v30 }
 0x6f5   :  { %v1482_v29 = vpop.f32.mrf.mxu1 }
 0x6f6   :  { %v1495_v27 = vsub.f32 %v1482_v29, %v1491_v33 }
 0x6f7   :  { %v1484_v31 = vpop.f32.mrf.mxu1 }
 0x6f8   :  { %v1507_v35 = vadd.f32 1e-05, %v1495_v27  ;;  %v1496_v36 = vsub.f32 %v1484_v31, %v1492_v51  ;;  %v4011_v51 = vld [vmem:[#allocation6 + $0x470] ss:$8 sps:$4 sm:$0xff]   ;;  %v4013_v27 = vld [vmem:[#allocation6 + $0x474] ss:$8 sps:$4 sm:$0xff]  }
 0x6f9   :  { %v1486_v38 = vpop.f32.mrf.mxu1  ;;  %v4016_v31 = vld [vmem:[#allocation6 + $0x464] ss:$8 sps:$4 sm:$0xff]   ;;  %2113 = vmatprep.subr.bf16.mxu0 %v4013_v27  ;;  %v4044_v27 = vld [vmem:[#allocation6 + $0x4c0] ss:$8 sps:$4 sm:$0xff]  }
 0x6fa   :  { %4243 = vrsqrt.f32 %v1507_v35  ;;  %v1508_v25 = vadd.f32 1e-05, %v1496_v36  ;;  %v1497_v26 = vsub.f32 %v1486_v38, %v1493_v34  ;;  %v4014_v34 = vld [vmem:[#allocation6 + $0x460] ss:$8 sps:$4 sm:$0xff]   ;;  %v4019_v35 = vld [vmem:[#allocation6 + $0x454] ss:$8 sps:$4 sm:$0xff]  }
 0x6fb   :  { %v1488_v40 = vpop.f32.mrf.mxu1  ;;  %v4017_v36 = vld [vmem:[#allocation6 + $0x450] ss:$8 sps:$4 sm:$0xff]   ;;  %v4022_v38 = vld [vmem:[#allocation6 + $0x444] ss:$8 sps:$4 sm:$0xff]  }
 0x6fc   :  { %4245 = vrsqrt.f32 %v1508_v25  ;;  %v1509_v23 = vadd.f32 1e-05, %v1497_v26  ;;  %v1498_v41 = vsub.f32 %v1488_v40, %v1494_v39  ;;  %v4020_v39 = vld [vmem:[#allocation6 + $0x440] ss:$8 sps:$4 sm:$0xff]   ;;  %v4025_v25 = vld [vmem:[#allocation6 + $0x434] ss:$8 sps:$4 sm:$0xff]  }
 0x6fd   :  { %v4023_v26 = vld [vmem:[#allocation6 + $0x430] ss:$8 sps:$4 sm:$0xff]  }
 0x6fe   :  { %4247 = vrsqrt.f32 %v1509_v23  ;;  %v1510_v53 = vadd.f32 1e-05, %v1498_v41 }
 0x700   :  { %4249 = vrsqrt.f32 %v1510_v53 }
 0x707   :  { %v4244_v5 = vpop.eup %4243 }
 0x708   :  { %v1515_v13 = vmul.f32 %v4244_v5, %v1503_v8 }
 0x709   :  { %v4246_v11 = vpop.eup %4245 }
 0x70a   :  { %v1516_v16 = vmul.f32 %v4246_v11, %v1504_v9  ;;  %v1530_v22 = vmul.f32 %v1523_v12, %v1515_v13 }
 0x70b   :  { %v4248_v17 = vpop.eup %4247 }
 0x70c   :  { %v1531_v19 = vmul.f32 %v1527_v10, %v1516_v16  ;;  %v1517_v21 = vmul.f32 %v4248_v17, %v1505_v14  ;;  %v1545_v57 = vadd.f32 %v1538_v52, %v1530_v22  ;;  %v4962_v22 = vld [vmem:[#allocation2 + $0x50] ss:$8 sps:$4 sm:$0xff]  }
 0x70d   :  { %v4250_v37 = vpop.eup %4249 }
 0x70e   :  { %v1518_v24 = vmul.f32 %v4250_v37, %v1506_v18  ;;  %v1532_v28 = vmul.f32 %v1523_v12, %v1517_v21  ;;  %v1546_v55 = vadd.f32 %v1542_v20, %v1531_v19  ;;  %v1549_v29 = vmax.f32 %v1545_v57, 0.0  ;;  %v4946_v18 = vld [vmem:[#allocation2 + $0x70] ss:$8 sps:$4 sm:$0xff]   ;;  %v4951_v19 = vld [vmem:[#allocation2 + $0x64] ss:$8 sps:$4 sm:$0xff]  }
 0x70f   :  { %v4956_v21 = vld [vmem:[#allocation2 + $0x60] ss:$8 sps:$4 sm:$0xff]  }
 0x710   :  { %v1533_v43 = vmul.f32 %v1527_v10, %v1518_v24  ;;  %v1547_v56 = vadd.f32 %v1538_v52, %v1532_v28  ;;  %v1550_v32 = vmax.f32 %v1546_v55, 0.0  ;;  %v5229_v10 = vld [vmem:[#allocation12_spill] sm:$0xff]  ;;  %v4959_v52 = vld [vmem:[#allocation2 + $0x54] ss:$8 sps:$4 sm:$0xff]   ;;  %v4974_v55 = vld [vmem:[#allocation2 + $0x30] ss:$8 sps:$4 sm:$0xff]  }
 0x711   :  { %v4965_v24 = vld [vmem:[#allocation2 + $0x44] ss:$8 sps:$4 sm:$0xff]   ;;  %v4968_v28 = vld [vmem:[#allocation2 + $0x40] ss:$8 sps:$4 sm:$0xff]  }
 0x712   :  { %v1548_v50 = vadd.f32 %v1542_v20, %v1533_v43  ;;  %v1551_v47 = vmax.f32 %v1547_v56, 0.0  ;;  %v4971_v43 = vld [vmem:[#allocation2 + $0x34] ss:$8 sps:$4 sm:$0xff]   ;;  %v4977_v56 = vld [vmem:[#allocation2 + $0x24] ss:$8 sps:$4 sm:$0xff]  }
 0x713   :  { %v4980_v57 = vld [vmem:[#allocation2 + $0x20] ss:$8 sps:$4 sm:$0xff]  }
 0x714   :  { %v1552_v33 = vmax.f32 %v1548_v50, 0.0  ;;  %v1586_v30 = vpack.c.bf16 %v1551_v47, %v1549_v29  ;;  %v4983_v50 = vld [vmem:[#allocation2 + $0x14] ss:$8 sps:$4 sm:$0xff]   ;;  %v4986_v47 = vld [vmem:[#allocation2 + $0x10] ss:$8 sps:$4 sm:$0xff]  }
 0x715   :  { %v4995_v29 = vld [vmem:[#allocation2 + $0xf4] ss:$8 sps:$4 sm:$0xff]  }
 0x716   :  { %v1587_v45 = vpack.c.bf16 %v1552_v33, %v1550_v32  ;;  %v4989_v32 = vld [vmem:[#allocation2 + $0x4] ss:$8 sps:$4 sm:$0xff]   ;;  %v4992_v33 = vld [vmem:[#allocation2] ss:$8 sps:$4 sm:$0xff]  }
 0x718   :  { %1780 = vmatprep.mubr.bf16.mxu0 %v1587_v45  ;;  %v4998_v45 = vld [vmem:[#allocation2 + $0xf0] ss:$8 sps:$4 sm:$0xff]  }
 0x719   :  { %1781 = vmatmul.mubr.bf16.vlgmr.msra.gmra.mxu0 %v1586_v30  ;;  %v5001_v30 = vld [vmem:[#allocation2 + $0xe4] ss:$8 sps:$4 sm:$0xff]  }
 0x71a   :  { %2114 = vmatpush1.bf16.msra.mxu0 %v4011_v51  ;;  %v4046_v51 = vld [vmem:[#allocation6 + $0x4c4] ss:$8 sps:$4 sm:$0xff]  }
 0x71b   :  { %2115 = vmatprep.subr.bf16.mxu0 %v4016_v31  ;;  %v4049_v31 = vld [vmem:[#allocation6 + $0x4b4] ss:$8 sps:$4 sm:$0xff]  }
 0x71e   :  { %2116 = vmatpush1.bf16.msra.mxu0 %v4014_v34  ;;  %v4047_v34 = vld [vmem:[#allocation6 + $0x4b0] ss:$8 sps:$4 sm:$0xff]  }
 0x71f   :  { %2117 = vmatprep.subr.bf16.mxu0 %v4019_v35  ;;  %v4052_v35 = vld [vmem:[#allocation6 + $0x4a4] ss:$8 sps:$4 sm:$0xff]  }
 0x722   :  { %2118 = vmatpush1.bf16.msra.mxu0 %v4017_v36  ;;  %v4050_v36 = vld [vmem:[#allocation6 + $0x4a0] ss:$8 sps:$4 sm:$0xff]  }
 0x723   :  { %2119 = vmatprep.subr.bf16.mxu0 %v4022_v38  ;;  %v4055_v38 = vld [vmem:[#allocation6 + $0x494] ss:$8 sps:$4 sm:$0xff]  }
 0x726   :  { %2120 = vmatpush1.bf16.msra.mxu0 %v4020_v39  ;;  %v4053_v39 = vld [vmem:[#allocation6 + $0x490] ss:$8 sps:$4 sm:$0xff]  }
 0x727   :  { %2121 = vmatprep.subr.bf16.mxu0 %v4025_v25  ;;  %v4058_v25 = vld [vmem:[#allocation6 + $0x484] ss:$8 sps:$4 sm:$0xff]  }
 0x72a   :  { %2122 = vmatpush1.bf16.msra.mxu0 %v4023_v26  ;;  %v4056_v26 = vld [vmem:[#allocation6 + $0x480] ss:$8 sps:$4 sm:$0xff]  }
 0x7d9   :  { %v1782_v40 = vpop.f32.mrf.mxu0 }
 0x7da   :  { %v1783_v5 = vadd.f32 %v1782_v40, %v4782_v46 }
 0x7db   :  { %v1784_v23 = vpop.f32.mrf.mxu0 }
 0x7dc   :  { %v1785_v41 = vadd.f32 %v1784_v23, %v4772_v42  ;;  %v4936_v14 = vadd.f32 %v1783_v5, %v4782_v46 }
 0x7dd   :  { %v1786_v53 = vpop.f32.mrf.mxu0 }
 0x7de   :  { %v1787_v3 = vadd.f32 %v1786_v53, %v4776_v44  ;;  %v4926_v9 = vadd.f32 %v1785_v41, %v4772_v42  ;;  %v1795_v20 = vmul.f32 %v4936_v14, %v4936_v14 }
 0x7df   :  { %v1788_v8 = vpop.f32.mrf.mxu0 }
 0x7e0   :  { %v1789_v11 = vadd.f32 %v1788_v8, %v5229_v10  ;;  %v4930_v12 = vadd.f32 %v1787_v3, %v4776_v44  ;;  %v1796_v16 = vmul.f32 %v4926_v9, %v4926_v9 }
 0x7e2   :  { %v4933_v13 = vadd.f32 %v1789_v11, %v5229_v10  ;;  %v1799_v17 = vpack.c.bf16 %v4930_v12, %v4936_v14  ;;  %v1797_v46 = vmul.f32 %v4930_v12, %v4930_v12 }
 0x7e4   :  { %v1800_v15 = vpack.c.bf16 %v4933_v13, %v4926_v9  ;;  %v1798_v42 = vmul.f32 %v4933_v13, %v4933_v13  ;;  %v1801_v37 = vpack.c.bf16 %v1797_v46, %v1795_v20 }
 0x7e6   :  { %1835 = vmatprep.mubr.bf16.mxu1 %v1800_v15  ;;  %v1802_v44 = vpack.c.bf16 %v1798_v42, %v1796_v16 }
 0x7e7   :  { %1836 = vmatmul.mubr.bf16.vlgmr.msra.gmra.mxu1 %v1799_v17 }
 0x7e8   :  { %1845 = vmatprep.mubr.bf16.mxu1 %v1802_v44  ;;  %2165 = vmatpush1.bf16.msra.mxu1 %v4946_v18 }
 0x7e9   :  { %2166 = vmatprep.subr.bf16.mxu1 %v4951_v19 }
 0x7ec   :  { %2167 = vmatpush1.bf16.msra.mxu1 %v4956_v21 }
 0x7ed   :  { %2168 = vmatprep.subr.bf16.mxu1 %v4959_v52 }
 0x7ef   :  { %1846 = vmatmul.mubr.bf16.gmra.mxu1 %v1801_v37 }
 0x7f0   :  { %2169 = vmatpush1.bf16.msra.mxu1 %v4962_v22 }
 0x7f1   :  { %2170 = vmatprep.subr.bf16.mxu1 %v4965_v24 }
 0x7f4   :  { %2171 = vmatpush1.bf16.msra.mxu1 %v4968_v28 }
 0x7f5   :  { %2172 = vmatprep.subr.bf16.mxu1 %v4971_v43 }
 0x7f8   :  { %2173 = vmatpush1.bf16.msra.mxu1 %v4974_v55 }
 0x7f9   :  { %2174 = vmatprep.subr.bf16.mxu1 %v4977_v56 }
 0x7fc   :  { %2175 = vmatpush1.bf16.msra.mxu1 %v4980_v57 }
 0x7fd   :  { %2176 = vmatprep.subr.bf16.mxu1 %v4983_v50 }
 0x800   :  { %2177 = vmatpush1.bf16.msra.mxu1 %v4986_v47 }
 0x801   :  { %2178 = vmatprep.subr.bf16.mxu1 %v4989_v32 }
 0x804   :  { %2179 = vmatpush1.bf16.msra.mxu1 %v4992_v33 }
 0x805   :  { %2180 = vmatprep.subr.bf16.mxu1 %v4995_v29 }
 0x808   :  { %2181 = vmatpush2.bf16.msra.mxu1 %v4998_v45 }
 0x809   :  { %2182 = vmatprep.subr.bf16.mxu1 %v5001_v30 }
 0x80c   :  { %2183 = vmatpush2.bf16.msra.mxu1 %v4814_v48  ;;  %v4028_v48 = vld [vmem:[#allocation6 + $0x424] ss:$8 sps:$4 sm:$0xff]  }
 0x80d   :  { %2184 = vmatprep.subr.bf16.mxu1 %v4817_v62  ;;  %v5017_v62 = vld [vmem:[#allocation2 + $0x74] ss:$8 sps:$4 sm:$0xff]   ;;  %2123 = vmatprep.subr.bf16.mxu0 %v4028_v48 }
 0x810   :  { %2185 = vmatpush2.bf16.msra.mxu1 %v4820_v63  ;;  %v4026_v63 = vld [vmem:[#allocation6 + $0x420] ss:$8 sps:$4 sm:$0xff]  }
 0x811   :  { %2186 = vmatprep.subr.bf16.mxu1 %v4823_v0  ;;  %2124 = vmatpush1.bf16.msra.mxu0 %v4026_v63  ;;  %v4031_v0 = vld [vmem:[#allocation6 + $0x414] ss:$8 sps:$4 sm:$0xff]  }
 0x812   :  { %2125 = vmatprep.subr.bf16.mxu0 %v4031_v0 }
 0x814   :  { %2187 = vmatpush2.bf16.msra.mxu1 %v4826_v1  ;;  %v4029_v1 = vld [vmem:[#allocation6 + $0x410] ss:$8 sps:$4 sm:$0xff]  }
 0x815   :  { %2188 = vmatprep.subr.bf16.mxu1 %v4829_v2  ;;  %2126 = vmatpush1.bf16.msra.mxu0 %v4029_v1  ;;  %v4034_v2 = vld [vmem:[#allocation6 + $0x404] ss:$8 sps:$4 sm:$0xff]   ;;  %v1865_v1 = vld [vmem:[#allocation4 + $0x10] ss:$8 sm:$0x3] }
 0x816   :  { %2127 = vmatprep.subr.bf16.mxu0 %v4034_v2 }
 0x818   :  { %2189 = vmatpush2.bf16.msra.mxu1 %v4832_v58  ;;  %v4032_v58 = vld [vmem:[#allocation6 + $0x400] ss:$8 sps:$4 sm:$0xff]  }
 0x819   :  { %2190 = vmatprep.subr.bf16.mxu1 %v4835_v49  ;;  %2128 = vmatpush1.bf16.msra.mxu0 %v4032_v58  ;;  %v4037_v49 = vld [vmem:[#allocation6 + $0x4f4] ss:$8 sps:$4 sm:$0xff]  }
 0x81a   :  { %2129 = vmatprep.subr.bf16.mxu0 %v4037_v49 }
 0x81c   :  { %2191 = vmatpush2.bf16.msra.mxu1 %v4838_v4  ;;  %v4035_v4 = vld [vmem:[#allocation6 + $0x4f0] ss:$8 sps:$4 sm:$0xff]  }
 0x81d   :  { %2192 = vmatprep.subr.bf16.mxu1 %v4841_v6  ;;  %2130 = vmatpush2.bf16.msra.mxu0 %v4035_v4  ;;  %v4040_v6 = vld [vmem:[#allocation6 + $0x4e4] ss:$8 sps:$4 sm:$0xff]   ;;  %v1892_v4 = vrot.slane %v1865_v1, %v4658_v59 }
 0x81e   :  { %2131 = vmatprep.subr.bf16.mxu0 %v4040_v6 }
 0x820   :  { %2193 = vmatpush2.bf16.msra.mxu1 %v4844_v7  ;;  %v4038_v7 = vld [vmem:[#allocation6 + $0x4e0] ss:$8 sps:$4 sm:$0xff]  }
 0x821   :  { %2194 = vmatprep.subr.bf16.mxu1 %v4847_v61  ;;  %2132 = vmatpush2.bf16.msra.mxu0 %v4038_v7  ;;  %v4043_v61 = vld [vmem:[#allocation6 + $0x4d4] ss:$8 sps:$4 sm:$0xff]   ;;  %v1888_v7 = vrot.slane %v1865_v1, %v4660_v60  ;;  %v4068_v1 = vld [vmem:[#allocation6 + $0x540] ss:$8 sps:$4 sm:$0xff]  }
 0x822   :  { %2133 = vmatprep.subr.bf16.mxu0 %v4043_v61 }
 0x824   :  { %2195 = vmatpush2.bf16.msra.mxu1 %v4850_v54  ;;  %v4041_v54 = vld [vmem:[#allocation6 + $0x4d0] ss:$8 sps:$4 sm:$0xff]  }
 0x825   :  { %2529 = vmatprep.subr.bf16.mxu1 %v5017_v62  ;;  %2134 = vmatpush2.bf16.msra.mxu0 %v4041_v54 }
 0x826   :  { %2135 = vmatprep.subr.bf16.mxu0 %v4046_v51  ;;  %v1867_v51 = vld [vmem:[#allocation4 + $0x11] ss:$8 sm:$0x3] }
 0x829   :  { %2136 = vmatpush2.bf16.msra.mxu0 %v4044_v27 }
 0x82a   :  { %2137 = vmatprep.subr.bf16.mxu0 %v4049_v31 }
 0x82d   :  { %2138 = vmatpush2.bf16.msra.mxu0 %v4047_v34 }
 0x82e   :  { %2139 = vmatprep.subr.bf16.mxu0 %v4052_v35 }
 0x831   :  { %2140 = vmatpush2.bf16.msra.mxu0 %v4050_v36  ;;  %v1907_v36 = vrot.slane %v1867_v51, %v4658_v59 }
 0x832   :  { %2141 = vmatprep.subr.bf16.mxu0 %v4055_v38 }
 0x835   :  { %2142 = vmatpush2.bf16.msra.mxu0 %v4053_v39 }
 0x836   :  { %2143 = vmatprep.subr.bf16.mxu0 %v4058_v25  ;;  %v1903_v25 = vrot.slane %v1867_v51, %v4660_v60 }
 0x839   :  { %2144 = vmatpush2.bf16.msra.mxu0 %v4056_v26 }
 0x8a7   :  { %v1837_v40 = vpop.f32.mrf.mxu1 }
 0x8a8   :  { %v1856_v3 = vmul.f32 %v1837_v40, %v1837_v40  ;;  %v1868_v58 = vsub.f32 %v4936_v14, %v1837_v40 }
 0x8a9   :  { %v1839_v23 = vpop.f32.mrf.mxu1 }
 0x8aa   :  { %v1857_v8 = vmul.f32 %v1839_v23, %v1839_v23  ;;  %v1869_v49 = vsub.f32 %v4926_v9, %v1839_v23 }
 0x8ab   :  { %v1841_v41 = vpop.f32.mrf.mxu1 }
 0x8ac   :  { %v1858_v15 = vmul.f32 %v1841_v41, %v1841_v41  ;;  %v1870_v54 = vsub.f32 %v4930_v12, %v1841_v41 }
 0x8ad   :  { %v1843_v53 = vpop.f32.mrf.mxu1 }
 0x8ae   :  { %v1859_v44 = vmul.f32 %v1843_v53, %v1843_v53  ;;  %v1871_v34 = vsub.f32 %v4933_v13, %v1843_v53 }
 0x8af   :  { %v1847_v5 = vpop.f32.mrf.mxu1 }
 0x8b0   :  { %v1860_v10 = vsub.f32 %v1847_v5, %v1856_v3 }
 0x8b1   :  { %v1849_v11 = vpop.f32.mrf.mxu1 }
 0x8b2   :  { %v1872_v16 = vadd.f32 1e-05, %v1860_v10  ;;  %v1861_v42 = vsub.f32 %v1849_v11, %v1857_v8 }
 0x8b3   :  { %v1851_v17 = vpop.f32.mrf.mxu1 }
 0x8b4   :  { %4251 = vrsqrt.f32 %v1872_v16  ;;  %v1873_v46 = vadd.f32 1e-05, %v1861_v42  ;;  %v1862_v20 = vsub.f32 %v1851_v17, %v1858_v15 }
 0x8b5   :  { %v1853_v37 = vpop.f32.mrf.mxu1 }
 0x8b6   :  { %4253 = vrsqrt.f32 %v1873_v46  ;;  %v1874_v48 = vadd.f32 1e-05, %v1862_v20  ;;  %v1863_v63 = vsub.f32 %v1853_v37, %v1859_v44  ;;  %v4059_v44 = vld [vmem:[#allocation6 + $0x570] ss:$8 sps:$4 sm:$0xff]   ;;  %v4061_v46 = vld [vmem:[#allocation6 + $0x574] ss:$8 sps:$4 sm:$0xff]  }
 0x8b7   :  { %v4064_v20 = vld [vmem:[#allocation6 + $0x564] ss:$8 sps:$4 sm:$0xff]   ;;  %2474 = vmatprep.subr.bf16.mxu0 %v4061_v46  ;;  %v4062_v37 = vld [vmem:[#allocation6 + $0x560] ss:$8 sps:$4 sm:$0xff]  }
 0x8b8   :  { %4255 = vrsqrt.f32 %v1874_v48  ;;  %v1875_v0 = vadd.f32 1e-05, %v1863_v63  ;;  %v4067_v48 = vld [vmem:[#allocation6 + $0x554] ss:$8 sps:$4 sm:$0xff]   ;;  %v4065_v63 = vld [vmem:[#allocation6 + $0x550] ss:$8 sps:$4 sm:$0xff]  }
 0x8b9   :  { %v4080_v46 = vld [vmem:[#allocation6 + $0x500] ss:$8 sps:$4 sm:$0xff]  }
 0x8ba   :  { %4257 = vrsqrt.f32 %v1875_v0  ;;  %v4070_v0 = vld [vmem:[#allocation6 + $0x544] ss:$8 sps:$4 sm:$0xff]  }
 0x8c1   :  { %v4252_v2 = vpop.eup %4251 }
 0x8c2   :  { %v1880_v61 = vmul.f32 %v4252_v2, %v1868_v58  ;;  %v4073_v2 = vld [vmem:[#allocation6 + $0x534] ss:$8 sps:$4 sm:$0xff]   ;;  %v4071_v58 = vld [vmem:[#allocation6 + $0x530] ss:$8 sps:$4 sm:$0xff]  }
 0x8c3   :  { %v4254_v6 = vpop.eup %4253 }
 0x8c4   :  { %v1881_v27 = vmul.f32 %v4254_v6, %v1869_v49  ;;  %v1895_v26 = vmul.f32 %v1888_v7, %v1880_v61 }
 0x8c5   :  { %v4256_v31 = vpop.eup %4255 }
 0x8c6   :  { %v1896_v35 = vmul.f32 %v1892_v4, %v1881_v27  ;;  %v1882_v38 = vmul.f32 %v4256_v31, %v1870_v54  ;;  %v1910_v10 = vadd.f32 %v1903_v25, %v1895_v26  ;;  %v5075_v26 = vld [vmem:[#allocation2 + $0xc4] ss:$8 sps:$4 sm:$0xff]  }
 0x8c7   :  { %v4258_v39 = vpop.eup %4257 }
 0x8c8   :  { %v1883_v40 = vmul.f32 %v4258_v39, %v1871_v34  ;;  %v1897_v23 = vmul.f32 %v1888_v7, %v1882_v38  ;;  %v1911_v5 = vadd.f32 %v1907_v36, %v1896_v35  ;;  %v1914_v42 = vmax.f32 %v1910_v10, 0.0  ;;  %v5066_v38 = vld [vmem:[#allocation2 + $0xe0] ss:$8 sps:$4 sm:$0xff]   ;;  %v5069_v39 = vld [vmem:[#allocation2 + $0xd4] ss:$8 sps:$4 sm:$0xff]  }
 0x8c9   :  { %v5093_v10 = vld [vmem:[#allocation2 + $0x94] ss:$8 sps:$4 sm:$0xff]  }
 0x8ca   :  { %v1898_v3 = vmul.f32 %v1892_v4, %v1883_v40  ;;  %v1912_v8 = vadd.f32 %v1903_v25, %v1897_v23  ;;  %v1915_v15 = vmax.f32 %v1911_v5, 0.0  ;;  %v5072_v25 = vld [vmem:[#allocation2 + $0xd0] ss:$8 sps:$4 sm:$0xff]   ;;  %v5078_v40 = vld [vmem:[#allocation2 + $0xc0] ss:$8 sps:$4 sm:$0xff]  }
 0x8cb   :  { %v5081_v23 = vld [vmem:[#allocation2 + $0xb4] ss:$8 sps:$4 sm:$0xff]   ;;  %v5087_v5 = vld [vmem:[#allocation2 + $0xa4] ss:$8 sps:$4 sm:$0xff]  }
 0x8cc   :  { %v1913_v41 = vadd.f32 %v1907_v36, %v1898_v3  ;;  %v1916_v11 = vmax.f32 %v1912_v8, 0.0  ;;  %v5084_v3 = vld [vmem:[#allocation2 + $0xb0] ss:$8 sps:$4 sm:$0xff]   ;;  %v5090_v8 = vld [vmem:[#allocation2 + $0xa0] ss:$8 sps:$4 sm:$0xff]  }
 0x8ce   :  { %v1917_v16 = vmax.f32 %v1913_v41, 0.0  ;;  %v1951_v17 = vpack.c.bf16 %v1916_v11, %v1914_v42  ;;  %v5096_v41 = vld [vmem:[#allocation2 + $0x90] ss:$8 sps:$4 sm:$0xff]   ;;  %v5099_v11 = vld [vmem:[#allocation2 + $0x84] ss:$8 sps:$4 sm:$0xff]  }
 0x8cf   :  { %v4074_v42 = vld [vmem:[#allocation6 + $0x520] ss:$8 sps:$4 sm:$0xff]  }
 0x8d0   :  { %v1952_v53 = vpack.c.bf16 %v1917_v16, %v1915_v15  ;;  %v5102_v15 = vld [vmem:[#allocation2 + $0x80] ss:$8 sps:$4 sm:$0xff]   ;;  %v4076_v16 = vld [vmem:[#allocation6 + $0x524] ss:$8 sps:$4 sm:$0xff]  }
 0x8d2   :  { %2145 = vmatprep.mubr.bf16.mxu0 %v1952_v53  ;;  %v4079_v53 = vld [vmem:[#allocation6 + $0x514] ss:$8 sps:$4 sm:$0xff]  }
 0x8d3   :  { %2146 = vmatmul.mubr.bf16.vlgmr.msra.gmra.mxu0 %v1951_v17  ;;  %v4077_v17 = vld [vmem:[#allocation6 + $0x510] ss:$8 sps:$4 sm:$0xff]  }
 0x8d4   :  { %2475 = vmatpush1.bf16.msra.mxu0 %v4059_v44  ;;  %v4082_v44 = vld [vmem:[#allocation6 + $0x504] ss:$8 sps:$4 sm:$0xff]  }
 0x8d5   :  { %2476 = vmatprep.subr.bf16.mxu0 %v4064_v20  ;;  %v4085_v20 = vld [vmem:[#allocation6 + $0x5f4] ss:$8 sps:$4 sm:$0xff]  }
 0x8d8   :  { %2477 = vmatpush1.bf16.msra.mxu0 %v4062_v37  ;;  %v4083_v37 = vld [vmem:[#allocation6 + $0x5f0] ss:$8 sps:$4 sm:$0xff]  }
 0x8d9   :  { %2478 = vmatprep.subr.bf16.mxu0 %v4067_v48  ;;  %v4088_v48 = vld [vmem:[#allocation6 + $0x5e4] ss:$8 sps:$4 sm:$0xff]  }
 0x8dc   :  { %2479 = vmatpush1.bf16.msra.mxu0 %v4065_v63  ;;  %v4086_v63 = vld [vmem:[#allocation6 + $0x5e0] ss:$8 sps:$4 sm:$0xff]  }
 0x8dd   :  { %2480 = vmatprep.subr.bf16.mxu0 %v4070_v0  ;;  %v4089_v0 = vld [vmem:[#allocation6 + $0x5d0] ss:$8 sps:$4 sm:$0xff]  }
 0x8e0   :  { %2481 = vmatpush1.bf16.msra.mxu0 %v4068_v1  ;;  %v4094_v1 = vld [vmem:[#allocation6 + $0x5c4] ss:$8 sps:$4 sm:$0xff]  }
 0x8e1   :  { %2482 = vmatprep.subr.bf16.mxu0 %v4073_v2  ;;  %v4092_v2 = vld [vmem:[#allocation6 + $0x5c0] ss:$8 sps:$4 sm:$0xff]  }
 0x8e4   :  { %2483 = vmatpush1.bf16.msra.mxu0 %v4071_v58  ;;  %v4097_v58 = vld [vmem:[#allocation6 + $0x5b4] ss:$8 sps:$4 sm:$0xff]  }
 0x8e5   :  { %2484 = vmatprep.subr.bf16.mxu0 %v4076_v16 }
 0x8e8   :  { %2485 = vmatpush1.bf16.msra.mxu0 %v4074_v42 }
 0x8e9   :  { %2486 = vmatprep.subr.bf16.mxu0 %v4079_v53 }
 0x8ec   :  { %2487 = vmatpush1.bf16.msra.mxu0 %v4077_v17 }
 0x8ed   :  { %2488 = vmatprep.subr.bf16.mxu0 %v4082_v44 }
 0x8f0   :  { %2489 = vmatpush1.bf16.msra.mxu0 %v4080_v46 }
 0x8f1   :  { %2490 = vmatprep.subr.bf16.mxu0 %v4085_v20 }
 0x8f4   :  { %2491 = vmatpush2.bf16.msra.mxu0 %v4083_v37 }
 0x8f5   :  { %2492 = vmatprep.subr.bf16.mxu0 %v4088_v48 }
 0x8f8   :  { %2493 = vmatpush2.bf16.msra.mxu0 %v4086_v63 }
 0x993   :  { %v5028_v49 = vpop.f32.mrf.mxu0 }
 0x994   :  { %v2156_v35 = vmul.f32 %v5028_v49, %v5028_v49 }
 0x995   :  { %v5030_v4 = vpop.f32.mrf.mxu0 }
 0x996   :  { %v2157_v61 = vmul.f32 %v5030_v4, %v5030_v4 }
 0x997   :  { %v5032_v6 = vpop.f32.mrf.mxu0 }
 0x998   :  { %v2160_v27 = vpack.c.bf16 %v5032_v6, %v5028_v49  ;;  %v2158_v34 = vmul.f32 %v5032_v6, %v5032_v6 }
 0x999   :  { %v5034_v7 = vpop.f32.mrf.mxu0 }
 0x99a   :  { %v2159_v54 = vmul.f32 %v5034_v7, %v5034_v7  ;;  %v2161_v51 = vpack.c.bf16 %v5034_v7, %v5030_v4  ;;  %v2162_v36 = vpack.c.bf16 %v2158_v34, %v2156_v35  ;;  %v4106_v34 = vld [vmem:[#allocation6 + $0x584] ss:$8 sps:$4 sm:$0xff]   ;;  %v4104_v35 = vld [vmem:[#allocation6 + $0x580] ss:$8 sps:$4 sm:$0xff]  }
 0x99c   :  { %2196 = vmatprep.mubr.bf16.mxu1 %v2161_v51  ;;  %v2163_v31 = vpack.c.bf16 %v2159_v54, %v2157_v61  ;;  %v4095_v61 = vld [vmem:[#allocation6 + $0x5b0] ss:$8 sps:$4 sm:$0xff]   ;;  %v4100_v54 = vld [vmem:[#allocation6 + $0x5a4] ss:$8 sps:$4 sm:$0xff]   ;;  %v4098_v51 = vld [vmem:[#allocation6 + $0x5a0] ss:$8 sps:$4 sm:$0xff]  }
 0x99d   :  { %2197 = vmatmul.mubr.bf16.vlgmr.msra.gmra.mxu1 %v2160_v27  ;;  %v4103_v27 = vld [vmem:[#allocation6 + $0x594] ss:$8 sps:$4 sm:$0xff]  }
 0x99e   :  { %2206 = vmatprep.mubr.bf16.mxu1 %v2163_v31  ;;  %2530 = vmatpush1.bf16.msra.mxu1 %v4946_v18  ;;  %v4101_v31 = vld [vmem:[#allocation6 + $0x590] ss:$8 sps:$4 sm:$0xff]  }
 0x99f   :  { %2531 = vmatprep.subr.bf16.mxu1 %v4951_v19 }
 0x9a2   :  { %2532 = vmatpush1.bf16.msra.mxu1 %v4956_v21 }
 0x9a3   :  { %2533 = vmatprep.subr.bf16.mxu1 %v4959_v52 }
 0x9a5   :  { %2207 = vmatmul.mubr.bf16.gmra.mxu1 %v2162_v36 }
 0x9a6   :  { %2534 = vmatpush1.bf16.msra.mxu1 %v4962_v22 }
 0x9a7   :  { %2535 = vmatprep.subr.bf16.mxu1 %v4965_v24 }
 0x9aa   :  { %2536 = vmatpush1.bf16.msra.mxu1 %v4968_v28 }
 0x9ab   :  { %2537 = vmatprep.subr.bf16.mxu1 %v4971_v43 }
 0x9ae   :  { %2538 = vmatpush1.bf16.msra.mxu1 %v4974_v55 }
 0x9af   :  { %2539 = vmatprep.subr.bf16.mxu1 %v4977_v56 }
 0x9b2   :  { %2540 = vmatpush1.bf16.msra.mxu1 %v4980_v57 }
 0x9b3   :  { %2541 = vmatprep.subr.bf16.mxu1 %v4983_v50 }
 0x9b6   :  { %2542 = vmatpush1.bf16.msra.mxu1 %v4986_v47 }
 0x9b7   :  { %2543 = vmatprep.subr.bf16.mxu1 %v4989_v32 }
 0x9ba   :  { %2544 = vmatpush1.bf16.msra.mxu1 %v4992_v33 }
 0x9bb   :  { %2545 = vmatprep.subr.bf16.mxu1 %v4995_v29 }
 0x9be   :  { %2546 = vmatpush2.bf16.msra.mxu1 %v4998_v45 }
 0x9bf   :  { %2547 = vmatprep.subr.bf16.mxu1 %v5001_v30 }
 0x9c2   :  { %2548 = vmatpush2.bf16.msra.mxu1 %v5066_v38 }
 0x9c3   :  { %2549 = vmatprep.subr.bf16.mxu1 %v5069_v39 }
 0x9c6   :  { %2550 = vmatpush2.bf16.msra.mxu1 %v5072_v25 }
 0x9c7   :  { %2551 = vmatprep.subr.bf16.mxu1 %v5075_v26 }
 0x9ca   :  { %2552 = vmatpush2.bf16.msra.mxu1 %v5078_v40 }
 0x9cb   :  { %2553 = vmatprep.subr.bf16.mxu1 %v5081_v23 }
 0x9ce   :  { %2554 = vmatpush2.bf16.msra.mxu1 %v5084_v3 }
 0x9cf   :  { %2555 = vmatprep.subr.bf16.mxu1 %v5087_v5 }
 0x9d2   :  { %2556 = vmatpush2.bf16.msra.mxu1 %v5090_v8 }
 0x9d3   :  { %2557 = vmatprep.subr.bf16.mxu1 %v5093_v10 }
 0x9d6   :  { %2558 = vmatpush2.bf16.msra.mxu1 %v5096_v41 }
 0x9d7   :  { %2559 = vmatprep.subr.bf16.mxu1 %v5099_v11 }
 0x9da   :  { %2560 = vmatpush2.bf16.msra.mxu1 %v5102_v15 }
 0x9db   :  { %2890 = vmatprep.subr.bf16.mxu1 %v5017_v62  ;;  %v4091_v62 = vld [vmem:[#allocation6 + $0x5d4] ss:$8 sps:$4 sm:$0xff]  }
 0x9dc   :  { %2494 = vmatprep.subr.bf16.mxu0 %v4091_v62 }
 0x9dd   :  { %2495 = vmatpush2.bf16.msra.mxu0 %v4089_v0 }
 0x9de   :  { %2496 = vmatprep.subr.bf16.mxu0 %v4094_v1 }
 0x9e1   :  { %2497 = vmatpush2.bf16.msra.mxu0 %v4092_v2 }
 0x9e2   :  { %2498 = vmatprep.subr.bf16.mxu0 %v4097_v58 }
 0x9e5   :  { %2499 = vmatpush2.bf16.msra.mxu0 %v4095_v61 }
 0x9e6   :  { %2500 = vmatprep.subr.bf16.mxu0 %v4100_v54 }
 0x9e9   :  { %2501 = vmatpush2.bf16.msra.mxu0 %v4098_v51 }
 0x9ea   :  { %2502 = vmatprep.subr.bf16.mxu0 %v4103_v27 }
 0x9ed   :  { %2503 = vmatpush2.bf16.msra.mxu0 %v4101_v31  ;;  %v2226_v31 = vld [vmem:[#allocation4 + $0x12] ss:$8 sm:$0x3] }
 0x9ee   :  { %2504 = vmatprep.subr.bf16.mxu0 %v4106_v34 }
 0x9f1   :  { %2505 = vmatpush2.bf16.msra.mxu0 %v4104_v35 }
 0xa5d   :  { %v2198_v36 = vpop.f32.mrf.mxu1 }
 0xa5e   :  { %v2217_v17 = vmul.f32 %v2198_v36, %v2198_v36  ;;  %v2229_v35 = vsub.f32 %v5028_v49, %v2198_v36 }
 0xa5f   :  { %v2200_v16 = vpop.f32.mrf.mxu1 }
 0xa60   :  { %v2218_v46 = vmul.f32 %v2200_v16, %v2200_v16 }
 0xa61   :  { %v2202_v42 = vpop.f32.mrf.mxu1 }
 0xa62   :  { %v2219_v48 = vmul.f32 %v2202_v42, %v2202_v42 }
 0xa63   :  { %v2204_v53 = vpop.f32.mrf.mxu1 }
 0xa64   :  { %v2220_v1 = vmul.f32 %v2204_v53, %v2204_v53 }
 0xa65   :  { %v2208_v44 = vpop.f32.mrf.mxu1 }
 0xa66   :  { %v2221_v20 = vsub.f32 %v2208_v44, %v2217_v17  ;;  %v2230_v17 = vsub.f32 %v5030_v4, %v2200_v16  ;;  %v2253_v44 = vrot.slane %v2226_v31, %v4658_v59 }
 0xa67   :  { %v2210_v37 = vpop.f32.mrf.mxu1 }
 0xa68   :  { %v2233_v63 = vadd.f32 1e-05, %v2221_v20  ;;  %v2222_v62 = vsub.f32 %v2210_v37, %v2218_v46  ;;  %v2249_v20 = vrot.slane %v2226_v31, %v4660_v60 }
 0xa69   :  { %v2212_v0 = vpop.f32.mrf.mxu1 }
 0xa6a   :  { %4259 = vrsqrt.f32 %v2233_v63  ;;  %v2234_v2 = vadd.f32 1e-05, %v2222_v62  ;;  %v2223_v58 = vsub.f32 %v2212_v0, %v2219_v48  ;;  %v2231_v48 = vsub.f32 %v5032_v6, %v2202_v42  ;;  %v2228_v63 = vld [vmem:[#allocation4 + $0x13] ss:$8 sm:$0x3] }
 0xa6b   :  { %v2214_v61 = vpop.f32.mrf.mxu1  ;;  %v2264_v4 = vrot.slane %v2228_v63, %v4660_v60 }
 0xa6c   :  { %4261 = vrsqrt.f32 %v2234_v2  ;;  %v2235_v54 = vadd.f32 1e-05, %v2223_v58  ;;  %v2224_v51 = vsub.f32 %v2214_v61, %v2220_v1  ;;  %v2232_v1 = vsub.f32 %v5034_v7, %v2204_v53 }
 0xa6d   :  { %v2268_v58 = vrot.slane %v2228_v63, %v4658_v59  ;;  %v4118_v63 = vld [vmem:[#allocation6 + $0x644] ss:$8 sps:$4 sm:$0xff]  }
 0xa6e   :  { %4263 = vrsqrt.f32 %v2235_v54  ;;  %v2236_v27 = vadd.f32 1e-05, %v2224_v51 }
 0xa70   :  { %4265 = vrsqrt.f32 %v2236_v27 }
 0xa77   :  { %v4260_v34 = vpop.eup %4259 }
 0xa78   :  { %v2241_v37 = vmul.f32 %v4260_v34, %v2229_v35 }
 0xa79   :  { %v4262_v46 = vpop.eup %4261 }
 0xa7a   :  { %v2242_v62 = vmul.f32 %v4262_v46, %v2230_v17  ;;  %v2256_v36 = vmul.f32 %v2249_v20, %v2241_v37  ;;  %v4110_v37 = vld [vmem:[#allocation6 + $0x660] ss:$8 sps:$4 sm:$0xff]  }
 0xa7b   :  { %v4264_v0 = vpop.eup %4263 }
 0xa7c   :  { %v2257_v2 = vmul.f32 %v2253_v44, %v2242_v62  ;;  %v2243_v61 = vmul.f32 %v4264_v0, %v2231_v48  ;;  %v2271_v34 = vadd.f32 %v2264_v4, %v2256_v36  ;;  %v4107_v48 = vld [vmem:[#allocation6 + $0x670] ss:$8 sps:$4 sm:$0xff]   ;;  %v4109_v62 = vld [vmem:[#allocation6 + $0x674] ss:$8 sps:$4 sm:$0xff]   ;;  %v4112_v0 = vld [vmem:[#allocation6 + $0x664] ss:$8 sps:$4 sm:$0xff]  }
 0xa7d   :  { %v4266_v49 = vpop.eup %4265  ;;  %2839 = vmatprep.subr.bf16.mxu0 %v4109_v62 }
 0xa7e   :  { %v2244_v16 = vmul.f32 %v4266_v49, %v2232_v1  ;;  %v2258_v54 = vmul.f32 %v2249_v20, %v2243_v61  ;;  %v2272_v27 = vadd.f32 %v2268_v58, %v2257_v2  ;;  %v2275_v46 = vmax.f32 %v2271_v34, 0.0  ;;  %v4113_v20 = vld [vmem:[#allocation6 + $0x650] ss:$8 sps:$4 sm:$0xff]   ;;  %v4116_v1 = vld [vmem:[#allocation6 + $0x640] ss:$8 sps:$4 sm:$0xff]  }
 0xa7f   :  { %v4121_v2 = vld [vmem:[#allocation6 + $0x634] ss:$8 sps:$4 sm:$0xff]  }
 0xa80   :  { %v2259_v51 = vmul.f32 %v2253_v44, %v2244_v16  ;;  %v2273_v31 = vadd.f32 %v2264_v4, %v2258_v54  ;;  %v2276_v35 = vmax.f32 %v2272_v27, 0.0  ;;  %v4115_v44 = vld [vmem:[#allocation6 + $0x654] ss:$8 sps:$4 sm:$0xff]  }
 0xa82   :  { %v2274_v6 = vadd.f32 %v2268_v58, %v2259_v51  ;;  %v2277_v42 = vmax.f32 %v2273_v31, 0.0  ;;  %v4119_v58 = vld [vmem:[#allocation6 + $0x630] ss:$8 sps:$4 sm:$0xff]  }
 0xa84   :  { %v2278_v17 = vmax.f32 %v2274_v6, 0.0  ;;  %v2312_v53 = vpack.c.bf16 %v2277_v42, %v2275_v46 }
 0xa86   :  { %v2313_v7 = vpack.c.bf16 %v2278_v17, %v2276_v35 }
 0xa88   :  { %2506 = vmatprep.mubr.bf16.mxu0 %v2313_v7 }
 0xa89   :  { %2507 = vmatmul.mubr.bf16.vlgmr.msra.gmra.mxu0 %v2312_v53 }
 0xa8a   :  { %2840 = vmatpush1.bf16.msra.mxu0 %v4107_v48 }
 0xa8b   :  { %2841 = vmatprep.subr.bf16.mxu0 %v4112_v0 }
 0xa8e   :  { %2842 = vmatpush1.bf16.msra.mxu0 %v4110_v37 }
 0xa8f   :  { %2843 = vmatprep.subr.bf16.mxu0 %v4115_v44 }
 0xa92   :  { %2844 = vmatpush1.bf16.msra.mxu0 %v4113_v20 }
 0xa93   :  { %2845 = vmatprep.subr.bf16.mxu0 %v4118_v63 }
 0xa96   :  { %2846 = vmatpush1.bf16.msra.mxu0 %v4116_v1 }
 0xa97   :  { %2847 = vmatprep.subr.bf16.mxu0 %v4121_v2 }
 0xa9a   :  { %2848 = vmatpush1.bf16.msra.mxu0 %v4119_v58 }
 0xb49   :  { %v2508_v61 = vpop.f32.mrf.mxu0 }
 0xb4a   :  { %v2509_v54 = vadd.f32 %v2508_v61, %v4936_v14  ;;  %v2591_v61 = vld [vmem:[#allocation4 + $0x14] ss:$8 sm:$0x3] }
 0xb4b   :  { %v2510_v49 = vpop.f32.mrf.mxu0 }
 0xb4c   :  { %v2511_v4 = vadd.f32 %v2510_v49, %v4926_v9  ;;  %v5128_v42 = vadd.f32 %v2509_v54, %v4936_v14 }
 0xb4d   :  { %v2512_v36 = vpop.f32.mrf.mxu0 }
 0xb4e   :  { %v2513_v16 = vadd.f32 %v2512_v36, %v4930_v12  ;;  %v5118_v27 = vadd.f32 %v2511_v4, %v4926_v9  ;;  %v2521_v14 = vmul.f32 %v5128_v42, %v5128_v42 }
 0xb4f   :  { %v2514_v51 = vpop.f32.mrf.mxu0 }
 0xb50   :  { %v2515_v31 = vadd.f32 %v2514_v51, %v4933_v13  ;;  %v5122_v34 = vadd.f32 %v2513_v16, %v4930_v12  ;;  %v2522_v17 = vmul.f32 %v5118_v27, %v5118_v27  ;;  %v2618_v16 = vrot.slane %v2591_v61, %v4658_v59 }
 0xb51   :  { %v2614_v51 = vrot.slane %v2591_v61, %v4660_v60  ;;  %v4178_v61 = vld [vmem:[#allocation6 + $0x704] ss:$8 sps:$4 sm:$0xff]  }
 0xb52   :  { %v5125_v6 = vadd.f32 %v2515_v31, %v4933_v13  ;;  %v2525_v46 = vpack.c.bf16 %v5122_v34, %v5128_v42  ;;  %v2523_v13 = vmul.f32 %v5122_v34, %v5122_v34 }
 0xb54   :  { %v2526_v35 = vpack.c.bf16 %v5125_v6, %v5118_v27  ;;  %v2524_v9 = vmul.f32 %v5125_v6, %v5125_v6  ;;  %v2527_v7 = vpack.c.bf16 %v2523_v13, %v2521_v14 }
 0xb56   :  { %2561 = vmatprep.mubr.bf16.mxu1 %v2526_v35  ;;  %v2528_v12 = vpack.c.bf16 %v2524_v9, %v2522_v17  ;;  %v2593_v17 = vld [vmem:[#allocation4 + $0x15] ss:$8 sm:$0x3] }
 0xb57   :  { %2562 = vmatmul.mubr.bf16.vlgmr.msra.gmra.mxu1 %v2525_v46  ;;  %v2633_v14 = vrot.slane %v2593_v17, %v4658_v59 }
 0xb58   :  { %2571 = vmatprep.mubr.bf16.mxu1 %v2528_v12  ;;  %2891 = vmatpush1.bf16.msra.mxu1 %v4946_v18  ;;  %v4124_v18 = vld [vmem:[#allocation6 + $0x624] ss:$8 sps:$4 sm:$0xff]  }
 0xb59   :  { %2892 = vmatprep.subr.bf16.mxu1 %v4951_v19  ;;  %v4122_v19 = vld [vmem:[#allocation6 + $0x620] ss:$8 sps:$4 sm:$0xff]   ;;  %2849 = vmatprep.subr.bf16.mxu0 %v4124_v18 }
 0xb5a   :  { %2850 = vmatpush1.bf16.msra.mxu0 %v4122_v19  ;;  %v2629_v19 = vrot.slane %v2593_v17, %v4660_v60  ;;  %v4188_v17 = vld [vmem:[#allocation6 + $0x7c0] ss:$8 sps:$4 sm:$0xff]  }
 0xb5c   :  { %2893 = vmatpush1.bf16.msra.mxu1 %v4956_v21  ;;  %v4127_v21 = vld [vmem:[#allocation6 + $0x614] ss:$8 sps:$4 sm:$0xff]  }
 0xb5d   :  { %2894 = vmatprep.subr.bf16.mxu1 %v4959_v52  ;;  %v4125_v52 = vld [vmem:[#allocation6 + $0x610] ss:$8 sps:$4 sm:$0xff]   ;;  %2851 = vmatprep.subr.bf16.mxu0 %v4127_v21 }
 0xb5e   :  { %2852 = vmatpush1.bf16.msra.mxu0 %v4125_v52 }
 0xb5f   :  { %2572 = vmatmul.mubr.bf16.gmra.mxu1 %v2527_v7 }
 0xb60   :  { %2895 = vmatpush1.bf16.msra.mxu1 %v4962_v22  ;;  %v4130_v22 = vld [vmem:[#allocation6 + $0x604] ss:$8 sps:$4 sm:$0xff]  }
 0xb61   :  { %2896 = vmatprep.subr.bf16.mxu1 %v4965_v24  ;;  %v4128_v24 = vld [vmem:[#allocation6 + $0x600] ss:$8 sps:$4 sm:$0xff]   ;;  %2853 = vmatprep.subr.bf16.mxu0 %v4130_v22 }
 0xb62   :  { %2854 = vmatpush1.bf16.msra.mxu0 %v4128_v24 }
 0xb64   :  { %2897 = vmatpush1.bf16.msra.mxu1 %v4968_v28  ;;  %v4133_v28 = vld [vmem:[#allocation6 + $0x6f4] ss:$8 sps:$4 sm:$0xff]  }
 0xb65   :  { %2898 = vmatprep.subr.bf16.mxu1 %v4971_v43  ;;  %v4131_v43 = vld [vmem:[#allocation6 + $0x6f0] ss:$8 sps:$4 sm:$0xff]   ;;  %2855 = vmatprep.subr.bf16.mxu0 %v4133_v28 }
 0xb66   :  { %2856 = vmatpush2.bf16.msra.mxu0 %v4131_v43 }
 0xb68   :  { %2899 = vmatpush1.bf16.msra.mxu1 %v4974_v55  ;;  %v4136_v55 = vld [vmem:[#allocation6 + $0x6e4] ss:$8 sps:$4 sm:$0xff]  }
 0xb69   :  { %2900 = vmatprep.subr.bf16.mxu1 %v4977_v56  ;;  %v4134_v56 = vld [vmem:[#allocation6 + $0x6e0] ss:$8 sps:$4 sm:$0xff]   ;;  %2857 = vmatprep.subr.bf16.mxu0 %v4136_v55 }
 0xb6a   :  { %2858 = vmatpush2.bf16.msra.mxu0 %v4134_v56 }
 0xb6c   :  { %2901 = vmatpush1.bf16.msra.mxu1 %v4980_v57  ;;  %v4139_v57 = vld [vmem:[#allocation6 + $0x6d4] ss:$8 sps:$4 sm:$0xff]  }
 0xb6d   :  { %2902 = vmatprep.subr.bf16.mxu1 %v4983_v50  ;;  %v4137_v50 = vld [vmem:[#allocation6 + $0x6d0] ss:$8 sps:$4 sm:$0xff]   ;;  %2859 = vmatprep.subr.bf16.mxu0 %v4139_v57 }
 0xb6e   :  { %2860 = vmatpush2.bf16.msra.mxu0 %v4137_v50 }
 0xb70   :  { %2903 = vmatpush1.bf16.msra.mxu1 %v4986_v47  ;;  %v4142_v47 = vld [vmem:[#allocation6 + $0x6c4] ss:$8 sps:$4 sm:$0xff]  }
 0xb71   :  { %2904 = vmatprep.subr.bf16.mxu1 %v4989_v32  ;;  %v4140_v32 = vld [vmem:[#allocation6 + $0x6c0] ss:$8 sps:$4 sm:$0xff]   ;;  %2861 = vmatprep.subr.bf16.mxu0 %v4142_v47 }
 0xb72   :  { %2862 = vmatpush2.bf16.msra.mxu0 %v4140_v32 }
 0xb74   :  { %2905 = vmatpush1.bf16.msra.mxu1 %v4992_v33  ;;  %v4145_v33 = vld [vmem:[#allocation6 + $0x6b4] ss:$8 sps:$4 sm:$0xff]  }
 0xb75   :  { %2906 = vmatprep.subr.bf16.mxu1 %v4995_v29  ;;  %v4143_v29 = vld [vmem:[#allocation6 + $0x6b0] ss:$8 sps:$4 sm:$0xff]   ;;  %2863 = vmatprep.subr.bf16.mxu0 %v4145_v33 }
 0xb76   :  { %2864 = vmatpush2.bf16.msra.mxu0 %v4143_v29 }
 0xb78   :  { %2907 = vmatpush2.bf16.msra.mxu1 %v4998_v45  ;;  %v4148_v45 = vld [vmem:[#allocation6 + $0x6a4] ss:$8 sps:$4 sm:$0xff]  }
 0xb79   :  { %2908 = vmatprep.subr.bf16.mxu1 %v5001_v30  ;;  %v4146_v30 = vld [vmem:[#allocation6 + $0x6a0] ss:$8 sps:$4 sm:$0xff]   ;;  %2865 = vmatprep.subr.bf16.mxu0 %v4148_v45  ;;  %v4155_v45 = vld [vmem:[#allocation6 + $0x770] ss:$8 sps:$4 sm:$0xff]  }
 0xb7a   :  { %2866 = vmatpush2.bf16.msra.mxu0 %v4146_v30  ;;  %v4157_v30 = vld [vmem:[#allocation6 + $0x774] ss:$8 sps:$4 sm:$0xff]  }
 0xb7c   :  { %2909 = vmatpush2.bf16.msra.mxu1 %v5066_v38  ;;  %v4151_v38 = vld [vmem:[#allocation6 + $0x694] ss:$8 sps:$4 sm:$0xff]  }
 0xb7d   :  { %2910 = vmatprep.subr.bf16.mxu1 %v5069_v39  ;;  %v4149_v39 = vld [vmem:[#allocation6 + $0x690] ss:$8 sps:$4 sm:$0xff]   ;;  %2867 = vmatprep.subr.bf16.mxu0 %v4151_v38  ;;  %v4160_v38 = vld [vmem:[#allocation6 + $0x764] ss:$8 sps:$4 sm:$0xff]  }
 0xb7e   :  { %2868 = vmatpush2.bf16.msra.mxu0 %v4149_v39  ;;  %v4158_v39 = vld [vmem:[#allocation6 + $0x760] ss:$8 sps:$4 sm:$0xff]  }
 0xb80   :  { %2911 = vmatpush2.bf16.msra.mxu1 %v5072_v25  ;;  %v4154_v25 = vld [vmem:[#allocation6 + $0x684] ss:$8 sps:$4 sm:$0xff]  }
 0xb81   :  { %2912 = vmatprep.subr.bf16.mxu1 %v5075_v26  ;;  %v4152_v26 = vld [vmem:[#allocation6 + $0x680] ss:$8 sps:$4 sm:$0xff]   ;;  %2869 = vmatprep.subr.bf16.mxu0 %v4154_v25  ;;  %v4163_v25 = vld [vmem:[#allocation6 + $0x754] ss:$8 sps:$4 sm:$0xff]  }
 0xb82   :  { %2870 = vmatpush2.bf16.msra.mxu0 %v4152_v26  ;;  %v4161_v26 = vld [vmem:[#allocation6 + $0x750] ss:$8 sps:$4 sm:$0xff]  }
 0xb83   :  { %3200 = vmatprep.subr.bf16.mxu0 %v4157_v30 }
 0xb84   :  { %2913 = vmatpush2.bf16.msra.mxu1 %v5078_v40 }
 0xb85   :  { %2914 = vmatprep.subr.bf16.mxu1 %v5081_v23 }
 0xb88   :  { %2915 = vmatpush2.bf16.msra.mxu1 %v5084_v3 }
 0xb89   :  { %2916 = vmatprep.subr.bf16.mxu1 %v5087_v5 }
 0xb8c   :  { %2917 = vmatpush2.bf16.msra.mxu1 %v5090_v8 }
 0xb8d   :  { %2918 = vmatprep.subr.bf16.mxu1 %v5093_v10 }
 0xb90   :  { %2919 = vmatpush2.bf16.msra.mxu1 %v5096_v41 }
 0xb91   :  { %2920 = vmatprep.subr.bf16.mxu1 %v5099_v11 }
 0xb94   :  { %2921 = vmatpush2.bf16.msra.mxu1 %v5102_v15 }
 0xc17   :  { %v2563_v40 = vpop.f32.mrf.mxu1 }
 0xc18   :  { %v2582_v8 = vmul.f32 %v2563_v40, %v2563_v40  ;;  %v2594_v4 = vsub.f32 %v5128_v42, %v2563_v40  ;;  %v4166_v40 = vld [vmem:[#allocation6 + $0x744] ss:$8 sps:$4 sm:$0xff]  }
 0xc19   :  { %v2565_v23 = vpop.f32.mrf.mxu1 }
 0xc1a   :  { %v2583_v41 = vmul.f32 %v2565_v23, %v2565_v23  ;;  %v2595_v36 = vsub.f32 %v5118_v27, %v2565_v23  ;;  %v4164_v23 = vld [vmem:[#allocation6 + $0x740] ss:$8 sps:$4 sm:$0xff]  }
 0xc1b   :  { %v2567_v3 = vpop.f32.mrf.mxu1 }
 0xc1c   :  { %v2584_v53 = vmul.f32 %v2567_v3, %v2567_v3  ;;  %v2596_v35 = vsub.f32 %v5122_v34, %v2567_v3  ;;  %v4169_v3 = vld [vmem:[#allocation6 + $0x734] ss:$8 sps:$4 sm:$0xff]  }
 0xc1d   :  { %v2569_v5 = vpop.f32.mrf.mxu1 }
 0xc1e   :  { %v2585_v37 = vmul.f32 %v2569_v5, %v2569_v5  ;;  %v2597_v12 = vsub.f32 %v5125_v6, %v2569_v5  ;;  %v4167_v5 = vld [vmem:[#allocation6 + $0x730] ss:$8 sps:$4 sm:$0xff]  }
 0xc1f   :  { %v2573_v10 = vpop.f32.mrf.mxu1 }
 0xc20   :  { %v2586_v11 = vsub.f32 %v2573_v10, %v2582_v8 }
 0xc21   :  { %v2575_v15 = vpop.f32.mrf.mxu1 }
 0xc22   :  { %v2598_v48 = vadd.f32 1e-05, %v2586_v11  ;;  %v2587_v62 = vsub.f32 %v2575_v15, %v2583_v41 }
 0xc23   :  { %v2577_v0 = vpop.f32.mrf.mxu1 }
 0xc24   :  { %4267 = vrsqrt.f32 %v2598_v48  ;;  %v2599_v44 = vadd.f32 1e-05, %v2587_v62  ;;  %v2588_v20 = vsub.f32 %v2577_v0, %v2584_v53 }
 0xc25   :  { %v2579_v63 = vpop.f32.mrf.mxu1 }
 0xc26   :  { %4269 = vrsqrt.f32 %v2599_v44  ;;  %v2600_v1 = vadd.f32 1e-05, %v2588_v20  ;;  %v2589_v2 = vsub.f32 %v2579_v63, %v2585_v37  ;;  %v4172_v63 = vld [vmem:[#allocation6 + $0x724] ss:$8 sps:$4 sm:$0xff]  }
 0xc28   :  { %4271 = vrsqrt.f32 %v2600_v1  ;;  %v2601_v58 = vadd.f32 1e-05, %v2589_v2  ;;  %v4170_v1 = vld [vmem:[#allocation6 + $0x720] ss:$8 sps:$4 sm:$0xff]   ;;  %v4175_v2 = vld [vmem:[#allocation6 + $0x714] ss:$8 sps:$4 sm:$0xff]  }
 0xc2a   :  { %4273 = vrsqrt.f32 %v2601_v58  ;;  %v4173_v58 = vld [vmem:[#allocation6 + $0x710] ss:$8 sps:$4 sm:$0xff]  }
 0xc31   :  { %v4268_v49 = vpop.eup %4267 }
 0xc32   :  { %v2606_v31 = vmul.f32 %v4268_v49, %v2594_v4  ;;  %v4176_v49 = vld [vmem:[#allocation6 + $0x700] ss:$8 sps:$4 sm:$0xff]   ;;  %v4181_v4 = vld [vmem:[#allocation6 + $0x7f4] ss:$8 sps:$4 sm:$0xff]  }
 0xc33   :  { %v4270_v54 = vpop.eup %4269 }
 0xc34   :  { %v2607_v9 = vmul.f32 %v4270_v54, %v2595_v36  ;;  %v2621_v21 = vmul.f32 %v2614_v51, %v2606_v31  ;;  %v4179_v36 = vld [vmem:[#allocation6 + $0x7f0] ss:$8 sps:$4 sm:$0xff]   ;;  %v4182_v54 = vld [vmem:[#allocation6 + $0x7e0] ss:$8 sps:$4 sm:$0xff]  }
 0xc35   :  { %v4272_v46 = vpop.eup %4271  ;;  %v4185_v31 = vld [vmem:[#allocation6 + $0x7d0] ss:$8 sps:$4 sm:$0xff]  }
 0xc36   :  { %v2622_v13 = vmul.f32 %v2618_v16, %v2607_v9  ;;  %v2608_v7 = vmul.f32 %v4272_v46, %v2596_v35  ;;  %v2636_v55 = vadd.f32 %v2629_v19, %v2621_v21  ;;  %v4190_v35 = vld [vmem:[#allocation6 + $0x7c4] ss:$8 sps:$4 sm:$0xff]   ;;  %v4193_v9 = vld [vmem:[#allocation6 + $0x7b4] ss:$8 sps:$4 sm:$0xff]   ;;  %v4191_v46 = vld [vmem:[#allocation6 + $0x7b0] ss:$8 sps:$4 sm:$0xff]  }
 0xc37   :  { %v4274_v18 = vpop.eup %4273  ;;  %v4203_v21 = vld [vmem:[#allocation7 + $0x78] sm:$0xff]  }
 0xc38   :  { %v2609_v52 = vmul.f32 %v4274_v18, %v2597_v12  ;;  %v2623_v22 = vmul.f32 %v2614_v51, %v2608_v7  ;;  %v2637_v28 = vadd.f32 %v2633_v14, %v2622_v13  ;;  %v2640_v32 = vmax.f32 %v2636_v55, 0.0  ;;  %v4187_v51 = vld [vmem:[#allocation6 + $0x7d4] ss:$8 sps:$4 sm:$0xff]   ;;  %v4196_v12 = vld [vmem:[#allocation6 + $0x7a4] ss:$8 sps:$4 sm:$0xff]   ;;  %3732 = vmatprep.subr.bf16.mxu1 %v4203_v21 }
 0xc39   :  { %v4194_v13 = vld [vmem:[#allocation6 + $0x7a0] ss:$8 sps:$4 sm:$0xff]   ;;  %v4197_v7 = vld [vmem:[#allocation6 + $0x790] ss:$8 sps:$4 sm:$0xff]   ;;  %v4202_v18 = vld [vmem:[#allocation6 + $0x784] ss:$8 sps:$4 sm:$0xff]  }
 0xc3a   :  { %v2624_v24 = vmul.f32 %v2618_v16, %v2609_v52  ;;  %v2638_v43 = vadd.f32 %v2629_v19, %v2623_v22  ;;  %v2641_v50 = vmax.f32 %v2637_v28, 0.0  ;;  %v4184_v16 = vld [vmem:[#allocation6 + $0x7e4] ss:$8 sps:$4 sm:$0xff]   ;;  %v4200_v19 = vld [vmem:[#allocation6 + $0x780] ss:$8 sps:$4 sm:$0xff]   ;;  %v4204_v52 = vld [vmem:[#allocation7 + $0x38] sm:$0xff]  }
 0xc3b   :  { %v4205_v22 = vld [vmem:[#allocation7 + $0x70] sm:$0xff]   ;;  %v4207_v28 = vld [vmem:[#allocation7 + $0x68] sm:$0xff]   ;;  %v4209_v55 = vld [vmem:[#allocation7 + $0x60] sm:$0xff]  }
 0xc3c   :  { %v2639_v56 = vadd.f32 %v2633_v14, %v2624_v24  ;;  %v2642_v57 = vmax.f32 %v2638_v43, 0.0  ;;  %v4199_v14 = vld [vmem:[#allocation6 + $0x794] ss:$8 sps:$4 sm:$0xff]   ;;  %v4208_v43 = vld [vmem:[#allocation7 + $0x28] sm:$0xff]  }
 0xc3d   :  { %v4206_v24 = vld [vmem:[#allocation7 + $0x30] sm:$0xff]  }
 0xc3e   :  { %v2643_v47 = vmax.f32 %v2639_v56, 0.0  ;;  %v2677_v29 = vpack.c.bf16 %v2642_v57, %v2640_v32  ;;  %v4210_v56 = vld [vmem:[#allocation7 + $0x20] sm:$0xff]   ;;  %v4211_v57 = vld [vmem:[#allocation7 + $0x58] sm:$0xff]  }
 0xc40   :  { %v2678_v33 = vpack.c.bf16 %v2643_v47, %v2641_v50  ;;  %v4212_v50 = vld [vmem:[#allocation7 + $0x18] sm:$0xff]  }
 0xc42   :  { %2871 = vmatprep.mubr.bf16.mxu0 %v2678_v33 }
 0xc43   :  { %2872 = vmatmul.mubr.bf16.vlgmr.msra.gmra.mxu0 %v2677_v29 }
 0xc44   :  { %3201 = vmatpush1.bf16.msra.mxu0 %v4155_v45 }
 0xc45   :  { %3202 = vmatprep.subr.bf16.mxu0 %v4160_v38 }
 0xc48   :  { %3203 = vmatpush1.bf16.msra.mxu0 %v4158_v39 }
 0xc49   :  { %3204 = vmatprep.subr.bf16.mxu0 %v4163_v25 }
 0xc4c   :  { %3205 = vmatpush1.bf16.msra.mxu0 %v4161_v26 }
 0xc4d   :  { %3206 = vmatprep.subr.bf16.mxu0 %v4166_v40 }
 0xc50   :  { %3207 = vmatpush1.bf16.msra.mxu0 %v4164_v23 }
 0xc51   :  { %3208 = vmatprep.subr.bf16.mxu0 %v4169_v3 }
 0xc54   :  { %3209 = vmatpush1.bf16.msra.mxu0 %v4167_v5 }
 0xc55   :  { %3210 = vmatprep.subr.bf16.mxu0 %v4172_v63 }
 0xc58   :  { %3211 = vmatpush1.bf16.msra.mxu0 %v4170_v1 }
 0xc59   :  { %3212 = vmatprep.subr.bf16.mxu0 %v4175_v2 }
 0xc5c   :  { %3213 = vmatpush1.bf16.msra.mxu0 %v4173_v58 }
 0xc5d   :  { %3214 = vmatprep.subr.bf16.mxu0 %v4178_v61 }
 0xc60   :  { %3215 = vmatpush1.bf16.msra.mxu0 %v4176_v49 }
 0xc61   :  { %3216 = vmatprep.subr.bf16.mxu0 %v4181_v4 }
 0xc64   :  { %3217 = vmatpush2.bf16.msra.mxu0 %v4179_v36  ;;  %v2954_v36 = vld [vmem:[#allocation4 + $0x17] ss:$8 sm:$0x3] }
 0xc65   :  { %3218 = vmatprep.subr.bf16.mxu0 %v4184_v16 }
 0xc68   :  { %3219 = vmatpush2.bf16.msra.mxu0 %v4182_v54 }
 0xc69   :  { %3220 = vmatprep.subr.bf16.mxu0 %v4187_v51 }
 0xc6c   :  { %3221 = vmatpush2.bf16.msra.mxu0 %v4185_v31 }
 0xc6d   :  { %3222 = vmatprep.subr.bf16.mxu0 %v4190_v35  ;;  %v2994_v35 = vrot.slane %v2954_v36, %v4658_v59 }
 0xc70   :  { %3223 = vmatpush2.bf16.msra.mxu0 %v4188_v17 }
 0xc71   :  { %3224 = vmatprep.subr.bf16.mxu0 %v4193_v9 }
 0xc74   :  { %3225 = vmatpush2.bf16.msra.mxu0 %v4191_v46 }
 0xc75   :  { %3226 = vmatprep.subr.bf16.mxu0 %v4196_v12 }
 0xc78   :  { %3227 = vmatpush2.bf16.msra.mxu0 %v4194_v13 }
 0xc79   :  { %3228 = vmatprep.subr.bf16.mxu0 %v4199_v14 }
 0xc7c   :  { %3229 = vmatpush2.bf16.msra.mxu0 %v4197_v7 }
 0xc7d   :  { %3230 = vmatprep.subr.bf16.mxu0 %v4202_v18 }
 0xc80   :  { %3231 = vmatpush2.bf16.msra.mxu0 %v4200_v19 }
 0xd03   :  { %v5181_v8 = vpop.f32.mrf.mxu0 }
 0xd04   :  { %v2882_v44 = vmul.f32 %v5181_v8, %v5181_v8 }
 0xd05   :  { %v5183_v10 = vpop.f32.mrf.mxu0 }
 0xd06   :  { %v2883_v15 = vmul.f32 %v5183_v10, %v5183_v10 }
 0xd07   :  { %v5185_v41 = vpop.f32.mrf.mxu0 }
 0xd08   :  { %v2886_v62 = vpack.c.bf16 %v5185_v41, %v5181_v8  ;;  %v2884_v37 = vmul.f32 %v5185_v41, %v5185_v41 }
 0xd09   :  { %v5187_v11 = vpop.f32.mrf.mxu0 }
 0xd0a   :  { %v2885_v53 = vmul.f32 %v5187_v11, %v5187_v11  ;;  %v2887_v48 = vpack.c.bf16 %v5187_v11, %v5183_v10  ;;  %v2888_v20 = vpack.c.bf16 %v2884_v37, %v2882_v44  ;;  %v2952_v44 = vld [vmem:[#allocation4 + $0x16] ss:$8 sm:$0x3] }
 0xd0b   :  { %v2979_v2 = vrot.slane %v2952_v44, %v4658_v59  ;;  %v2975_v61 = vrot.slane %v2952_v44, %v4660_v60  ;;  %v4213_v59 = vld [vmem:[#allocation7 + $0x50] sm:$0xff]  }
 0xd0c   :  { %2922 = vmatprep.mubr.bf16.mxu1 %v2887_v48  ;;  %v2889_v0 = vpack.c.bf16 %v2885_v53, %v2883_v15 }
 0xd0d   :  { %2923 = vmatmul.mubr.bf16.vlgmr.msra.gmra.mxu1 %v2886_v62 }
 0xd0e   :  { %2932 = vmatprep.mubr.bf16.mxu1 %v2889_v0  ;;  %3733 = vmatpush3.bf16.msra.mxu1 %v4204_v52 }
 0xd0f   :  { %3734 = vmatprep.subr.bf16.mxu1 %v4205_v22 }
 0xd12   :  { %3735 = vmatpush3.bf16.msra.mxu1 %v4206_v24 }
 0xd13   :  { %3736 = vmatprep.subr.bf16.mxu1 %v4207_v28  ;;  %v4214_v28 = vld [vmem:[#allocation7 + $0x10] sm:$0xff]  }
 0xd15   :  { %2933 = vmatmul.mubr.bf16.gmra.mxu1 %v2888_v20 }
 0xd16   :  { %3737 = vmatpush3.bf16.msra.mxu1 %v4208_v43  ;;  %v4216_v43 = vld [vmem:[#allocation7 + $0x8] sm:$0xff]  }
 0xd17   :  { %3738 = vmatprep.subr.bf16.mxu1 %v4209_v55  ;;  %v4217_v55 = vld [vmem:[#allocation7 + $0x40] sm:$0xff]  }
 0xd1a   :  { %3739 = vmatpush3.bf16.msra.mxu1 %v4210_v56  ;;  %v4218_v56 = vld [vmem:[#allocation7] sm:$0xff]  }
 0xd1b   :  { %3740 = vmatprep.subr.bf16.mxu1 %v4211_v57 }
 0xd1e   :  { %3741 = vmatpush3.bf16.msra.mxu1 %v4212_v50 }
 0xd1f   :  { %3742 = vmatprep.subr.bf16.mxu1 %v4213_v59 }
 0xd22   :  { %3743 = vmatpush3.bf16.msra.mxu1 %v4214_v28 }
 0xdcd   :  { %v2924_v47 = vpop.f32.mrf.mxu1 }
 0xdce   :  { %v2943_v45 = vmul.f32 %v2924_v47, %v2924_v47  ;;  %v2955_v63 = vsub.f32 %v5181_v8, %v2924_v47 }
 0xdcf   :  { %v2926_v32 = vpop.f32.mrf.mxu1 }
 0xdd0   :  { %v2944_v38 = vmul.f32 %v2926_v32, %v2926_v32  ;;  %v2956_v1 = vsub.f32 %v5183_v10, %v2926_v32  ;;  %v2990_v10 = vrot.slane %v2954_v36, %v4660_v60  ;;  %v4215_v60 = vld [vmem:[#allocation7 + $0x48] sm:$0xff]  }
 0xdd1   :  { %v2928_v33 = vpop.f32.mrf.mxu1  ;;  %3744 = vmatprep.subr.bf16.mxu1 %v4215_v60 }
 0xdd2   :  { %v2945_v26 = vmul.f32 %v2928_v33, %v2928_v33  ;;  %v2957_v4 = vsub.f32 %v5185_v41, %v2928_v33  ;;  %3745 = vmatpush3.bf16.msra.mxu1 %v4216_v43 }
 0xdd3   :  { %v2930_v29 = vpop.f32.mrf.mxu1  ;;  %3746 = vmatprep.subr.bf16.mxu1 %v4217_v55 }
 0xdd4   :  { %v2946_v5 = vmul.f32 %v2930_v29, %v2930_v29  ;;  %v2958_v51 = vsub.f32 %v5187_v11, %v2930_v29 }
 0xdd5   :  { %v2934_v30 = vpop.f32.mrf.mxu1 }
 0xdd6   :  { %v2947_v39 = vsub.f32 %v2934_v30, %v2943_v45  ;;  %3747 = vmatpush3.bf16.msra.mxu1 %v4218_v56 }
 0xdd7   :  { %v2936_v25 = vpop.f32.mrf.mxu1 }
 0xdd8   :  { %v2959_v40 = vadd.f32 1e-05, %v2947_v39  ;;  %v2948_v23 = vsub.f32 %v2936_v25, %v2944_v38 }
 0xdd9   :  { %v2938_v3 = vpop.f32.mrf.mxu1 }
 0xdda   :  { %4275 = vrsqrt.f32 %v2959_v40  ;;  %v2960_v15 = vadd.f32 1e-05, %v2948_v23  ;;  %v2949_v53 = vsub.f32 %v2938_v3, %v2945_v26 }
 0xddb   :  { %v2940_v48 = vpop.f32.mrf.mxu1 }
 0xddc   :  { %4277 = vrsqrt.f32 %v2960_v15  ;;  %v2961_v62 = vadd.f32 1e-05, %v2949_v53  ;;  %v2950_v0 = vsub.f32 %v2940_v48, %v2946_v5 }
 0xdde   :  { %4279 = vrsqrt.f32 %v2961_v62  ;;  %v2962_v37 = vadd.f32 1e-05, %v2950_v0 }
 0xde0   :  { %4281 = vrsqrt.f32 %v2962_v37 }
 0xde7   :  { %v4276_v20 = vpop.eup %4275 }
 0xde8   :  { %v2967_v49 = vmul.f32 %v4276_v20, %v2955_v63 }
 0xde9   :  { %v4278_v58 = vpop.eup %4277 }
 0xdea   :  { %v2968_v16 = vmul.f32 %v4278_v58, %v2956_v1  ;;  %v2982_v9 = vmul.f32 %v2975_v61, %v2967_v49 }
 0xdeb   :  { %v4280_v54 = vpop.eup %4279 }
 0xdec   :  { %v2983_v31 = vmul.f32 %v2979_v2, %v2968_v16  ;;  %v2969_v17 = vmul.f32 %v4280_v54, %v2957_v4  ;;  %v2997_v18 = vadd.f32 %v2990_v10, %v2982_v9 }
 0xded   :  { %v4282_v8 = vpop.eup %4281 }
 0xdee   :  { %v2970_v46 = vmul.f32 %v4282_v8, %v2958_v51  ;;  %v2984_v12 = vmul.f32 %v2975_v61, %v2969_v17  ;;  %v2998_v14 = vadd.f32 %v2994_v35, %v2983_v31  ;;  %v3001_v22 = vmax.f32 %v2997_v18, 0.0 }
 0xdf0   :  { %v2985_v13 = vmul.f32 %v2979_v2, %v2970_v46  ;;  %v2999_v7 = vadd.f32 %v2990_v10, %v2984_v12  ;;  %v3002_v21 = vmax.f32 %v2998_v14, 0.0 }
 0xdf2   :  { %v3000_v41 = vadd.f32 %v2994_v35, %v2985_v13  ;;  %v3003_v19 = vmax.f32 %v2999_v7, 0.0 }
 0xdf4   :  { %v3004_v52 = vmax.f32 %v3000_v41, 0.0  ;;  %v3038_v24 = vpack.c.bf16 %v3003_v19, %v3001_v22 }
 0xdf6   :  { %v3039_v11 = vpack.c.bf16 %v3004_v52, %v3002_v21 }
 0xdf8   :  { %3232 = vmatprep.mubr.bf16.mxu0 %v3039_v11 }
 0xdf9   :  { %3233 = vmatmul.mubr.bf16.vlgmr.msra.gmra.mxu0 %v3038_v24 }
 0xeb9   :  { %v3234_v57 = vpop.f32.mrf.mxu0 }
 0xeba   :  { %v3235_v30 = vadd.f32 %v3234_v57, %v5128_v42 }
 0xebb   :  { %v3236_v50 = vpop.f32.mrf.mxu0 }
 0xebc   :  { %v3237_v29 = vadd.f32 %v3236_v50, %v5118_v27 }
 0xebd   :  { %v3238_v47 = vpop.f32.mrf.mxu0 }
 0xebe   :  { %v3239_v32 = vadd.f32 %v3238_v47, %v5122_v34 }
 0xebf   :  { %v3240_v33 = vpop.f32.mrf.mxu0 }
 0xec0   :  { %v3241_v45 = vadd.f32 %v3240_v33, %v5125_v6  ;;  %v3275_v39 = vpack.c.bf16 %v3239_v32, %v3235_v30 }
 0xec2   :  { %v3276_v38 = vpack.c.bf16 %v3241_v45, %v3237_v29 }
 0xec4   :  { %3405 = vmatprep.mubr.bf16.mxu1 %v3276_v38 }
 0xec5   :  { %3406 = vmatmul.mubr.bf16.vlgmr.msra.gmra.mxu1 %v3275_v39 }
 0xf85   :  { %v3748_v25 = vpop.f32.mrf.mxu1 }
 0xf87   :  { %v3749_v26 = vpop.f32.mrf.mxu1 }
 0xf88   :  { %v3750_v40 = vadd.f32 %v3749_v26, %v3748_v25 }
 0xf89   :  { %v3751_v23 = vpop.f32.mrf.mxu1 }
 0xf8a   :  { %3414 = vst [vmem:[%s5225_s6] sm:$0xff] %v3750_v40 }
 0xf8b   :  { %v3752_v34 = vpop.f32.mrf.mxu1 }
 0xf8c   :  { %v3753_v3 = vadd.f32 %v3752_v34, %v3751_v23 }
 0xf8e   :  { %3415 = vst [vmem:[%s5225_s6 + $0x8] sm:$0xff] %v3753_v3 }
 0xf8f   :  { %3420 = vsyncpa [#allocation3], 1 }
 0xf90   :  { %3421 = vsyncpa [#allocation5], 1 }
 0xf91   :  { %3422 = vsyncpa [#allocation8], 1 }

</bundles_post_ra>
